<compile_context>
chip_gen: v7x
topology: tpu7x:2x2x1
jax: 0.10.0
libtpu: 0.0.40
codegen_flags: <defaults>
</compile_context>

<pallas_src>
import functools

import numpy as np
import jax
import jax.numpy as jnp
from jax.experimental import pallas as pl
from jax.experimental.pallas import tpu as pltpu


def sinusoids_np(length, channels, max_timescale=512):
    """NumPy port of the PyTorch sinusoids() helper (same semantics)."""
    assert channels % 2 == 0
    log_timescale_increment = np.log(max_timescale) / (channels // 2 - 1)
    inv_timescales = np.exp(-log_timescale_increment * np.arange(channels // 2))
    scaled_time = np.arange(length)[:, np.newaxis] * inv_timescales[np.newaxis, :]
    return np.concatenate([np.sin(scaled_time), np.cos(scaled_time)], axis=1).astype(np.float32)


def _embed_kernel(ids_ref, w_ref, pos_ref, o_ref, *, n_bins, k):
    # ids_ref: (tile_g, k)           int32 -- k consecutive flattened-row token ids per output row
    # w_ref:   (k*n_bins, k*latent)  f32   -- k-block-diagonal embedding table (VMEM resident)
    # pos_ref: (tile_g, k*latent)    f32   -- positional embeddings, packed to the output layout
    # o_ref:   (tile_g, k*latent)    f32   -- lane-dense (k*latent == 128 when latent divides 128)
    tile_g = o_ref.shape[0]

    # Clamp ids like jnp.take(mode="clip") / a valid nn.Embedding range.
    ids = jnp.clip(ids_ref[...], 0, n_bins - 1)

    cols = jax.lax.broadcasted_iota(jnp.int32, (tile_g, n_bins), 1)

    # One one-hot selector per packed sub-row.  Total compare/cast work equals a single
    # (tile_rows, n_bins) selector (no inflation); each piece is n_bins (a multiple of 128)
    # lanes wide, so the concatenation is a lane-aligned vreg placement, not a lane shuffle.
    parts = [(cols == ids[:, j:j + 1]).astype(jnp.float32) for j in range(k)]
    sel = parts[0] if k == 1 else jnp.concatenate(parts, axis=-1)   # (tile_g, k*n_bins)

    # Single MXU pass selects emb_table[id] for all k packed rows at once via the
    # block-diagonal W and emits a lane-dense tile.  HIGHEST precision keeps the selected
    # f32 table rows exact (no bf16 truncation on the MXU).
    tok = jnp.dot(sel, w_ref[...],
                  preferred_element_type=jnp.float32,
                  precision=jax.lax.Precision.HIGHEST)

    # Positional add moved out of the matmul: one VPU add against the resident pos block.
    o_ref[...] = (tok + pos_ref[...]).astype(o_ref.dtype)


def _pick_row_tile(rows, k, max_tile=2048, min_steps=4):
    """Largest row tile (amortizes the ~0.35us per-step pipeline overhead) that still
    leaves >= min_steps grid steps, so a v7x megacore can shard the 'parallel' axis
    across both TensorCores.  Tiles are multiples of 8*k so packed blocks keep
    (8, 128)-aligned shapes."""
    ladder = [t for t in (2048, 1024, 512, 256, 128, 64, 32, 16, 8)
              if t % (8 * k) == 0 and t <= max_tile]
    for t in ladder:
        if rows >= t * min_steps:
            return t
    for t in ladder:          # small problem: biggest tile that still fits
        if t <= rows:
            return t
    return ladder[-1]         # tiny problem: single (padded) tile


def token_and_position_embedding(x, emb_table, pos_emb):
    """x: (batch, seq) int token ids; emb_table: (n_bins, latent) f32; pos_emb: (seq, latent) f32.

    Returns (batch, seq, latent) f32 == emb_table[x] + pos_emb[None, :, :],
    matching TokenAndPositionEmbedding.forward for batch > 1.
    """
    batch, seq = x.shape
    n_bins, latent = emb_table.shape
    assert pos_emb.shape == (seq, latent)

    # Lane-packing factor: fold k consecutive flattened rows into one output row so stores
    # are 128-lane dense (latent = 32/64 alone would force masked partial vst's).
    k = 128 // latent if (latent < 128 and 128 % latent == 0) else 1
    width = k * latent

    rows = batch * seq
    tile_rows = _pick_row_tile(rows, k)
    rows_pad = pl.cdiv(rows, tile_rows) * tile_rows        # pad-and-slice for ragged batch*seq
    grid = (rows_pad // tile_rows,)
    tile_g = tile_rows // k

    emb_f32 = emb_table.astype(jnp.float32)
    pos_f32 = pos_emb.astype(jnp.float32)

    # Token ids: flattened, zero-padded to the tile multiple, packed k-per-row.
    ids = x.reshape(rows).astype(jnp.int32)
    if rows_pad != rows:
        ids = jnp.concatenate([ids, jnp.zeros((rows_pad - rows,), jnp.int32)])
    ids = ids.reshape(rows_pad // k, k)

    # k-block-diagonal table: the one-hot dot then emits (tile_g, k*latent) directly.
    # At n_bins=256 this stays tiny (<=512 KiB) and is safely VMEM-resident on all
    # generations, including v7x's 64 MiB VMEM; a production vocabulary should instead
    # live in HBM (memory_space=pl.ANY) with a manual DMA row gather.
    if k == 1:
        w = emb_f32
    else:
        w = jnp.zeros((k * n_bins, k * latent), jnp.float32)
        for j in range(k):
            w = w.at[j * n_bins:(j + 1) * n_bins, j * latent:(j + 1) * latent].set(emb_f32)

    # Positional embedding as its own (small) block, packed to the output layout.
    def packed_pos(n):
        idx = jnp.arange(n, dtype=jnp.int32) % seq
        return jnp.take(pos_f32, idx, axis=0).reshape(n // k, width)

    if tile_rows % seq == 0:
        # Pattern repeats identically every tile -> one resident tile-sized slab.
        pos_arr = packed_pos(tile_rows)
        pos_spec = pl.BlockSpec((tile_g, width), lambda i: (0, 0))
    elif seq % tile_rows == 0:
        # Long sequences: one full seq-period slab, indexed per tile.
        pos_arr = packed_pos(seq)
        n_per_seq = seq // tile_rows
        pos_spec = pl.BlockSpec((tile_g, width), lambda i: (i % n_per_seq, 0))
    else:
        # General fallback (phase shifts per tile): rows-sized slab, one block per step.
        pos_arr = packed_pos(rows_pad)
        pos_spec = pl.BlockSpec((tile_g, width), lambda i: (i, 0))

    kernel = functools.partial(_embed_kernel, n_bins=n_bins, k=k)

    out_flat = pl.pallas_call(
        kernel,
        out_shape=jax.ShapeDtypeStruct((rows_pad // k, width), jnp.float32),
        grid_spec=pltpu.PrefetchScalarGridSpec(
            num_scalar_prefetch=0,
            grid=grid,
            in_specs=[
                pl.BlockSpec((tile_g, k), lambda i: (i, 0)),            # packed token ids
                pl.BlockSpec((k * n_bins, width), lambda i: (0, 0)),    # resident block-diag table
                pos_spec,                                               # positional block
            ],
            out_specs=pl.BlockSpec((tile_g, width), lambda i: (i, 0)),
        ),
        compiler_params=pltpu.CompilerParams(
            dimension_semantics=("parallel",),
            vmem_limit_bytes=32 * 1024 * 1024,
        ),
    )(ids, w, pos_arr)

    # Unpack the lane-dense layout back to (batch, seq, latent); this reshape is
    # row-major contiguous, so it is metadata-only at the XLA level.
    return out_flat.reshape(rows_pad, latent)[:rows].reshape(batch, seq, latent)


if __name__ == "__main__":
    def run_case(batch, seq_len, n_bins, latent_dim):
        key = jax.random.PRNGKey(0)
        k_emb, k_x = jax.random.split(key)
        # Deterministic "checkpoint": embedding weights ~ N(0,1) (nn.Embedding default init).
        emb_table = jax.random.normal(k_emb, (n_bins, latent_dim), dtype=jnp.float32)
        pos_emb = jnp.asarray(sinusoids_np(seq_len, latent_dim))   # (seq, latent)
        x = jax.random.randint(k_x, (batch, seq_len), 0, n_bins, dtype=jnp.int32)

        out = jax.block_until_ready(token_and_position_embedding(x, emb_table, pos_emb))

        # Pure-JAX reference: embedding lookup + broadcast-add of positional embedding.
        ref = jnp.take(emb_table, x, axis=0) + pos_emb[None, :, :]
        np.testing.assert_allclose(np.asarray(out), np.asarray(ref), rtol=1e-5, atol=1e-5)

    # Small shape consistent with the module spec (batch=2, seq=8, n_bins=256, latent=32).
    run_case(batch=2, seq_len=8, n_bins=256, latent_dim=32)
    # Larger case: 1024 rows -> four 256-row "parallel" grid steps, k=2 lane packing.
    run_case(batch=8, seq_len=128, n_bins=256, latent_dim=64)
    # Ragged case exercising the pad-and-slice path (rows not a multiple of the tile).
    run_case(batch=3, seq_len=40, n_bins=256, latent_dim=32)

    print("KERNEL_OK")
</pallas_src>

<mosaic_0001>
module attributes {stable_mosaic.version = 11 : i64} {
  func.func @_embed_kernel(%arg0: i32, %arg1: memref<8x4xi32, #tpu.memory_space<vmem>>, %arg2: memref<1024x128xf32, #tpu.memory_space<vmem>>, %arg3: memref<8x128xf32, #tpu.memory_space<vmem>>, %arg4: memref<8x128xf32, #tpu.memory_space<vmem>>) attributes {dimension_semantics = [#tpu.dimension_semantics<parallel>], iteration_bounds = array<i64: 1>, scalar_prefetch = 0 : i64, scratch_operands = 0 : i64, tpu.core_type = #tpu.core_type<tc>, window_params = [{transform_indices = @transform_0, window_bounds = array<i64: 8, 4>}, {pipeline_mode = #tpu.pipeline_mode<synchronous>, transform_indices = @transform_1, window_bounds = array<i64: 1024, 128>}, {pipeline_mode = #tpu.pipeline_mode<synchronous>, transform_indices = @transform_2, window_bounds = array<i64: 8, 128>}, {transform_indices = @transform_3, window_bounds = array<i64: 8, 128>}]} {
    %c0 = arith.constant 0 : index
    %c0_0 = arith.constant 0 : index
    %0 = vector.load %arg1[%c0, %c0_0] : memref<8x4xi32, #tpu.memory_space<vmem>>, vector<8x4xi32>
    %c0_i32 = arith.constant 0 : i32
    %c255_i32 = arith.constant 255 : i32
    %1 = vector.broadcast %c0_i32 : i32 to vector<8x4xi32>
    %2 = arith.maxsi %1, %0 : vector<8x4xi32>
    %3 = vector.broadcast %c255_i32 : i32 to vector<8x4xi32>
    %4 = arith.minsi %3, %2 : vector<8x4xi32>
    %5 = tpu.iota {dimensions = array<i32: 1>} : vector<8x256xi32>
    %6 = vector.extract_strided_slice %4 {offsets = [0, 0], sizes = [8, 1], strides = [1, 1]} : vector<8x4xi32> to vector<8x1xi32>
    %7 = vector.broadcast %6 : vector<8x1xi32> to vector<8x256xi32>
    %8 = arith.cmpi eq, %5, %7 : vector<8x256xi32>
    %9 = arith.extui %8 : vector<8x256xi1> to vector<8x256xi32>
    %10 = arith.sitofp %9 : vector<8x256xi32> to vector<8x256xf32>
    %11 = vector.extract_strided_slice %4 {offsets = [0, 1], sizes = [8, 1], strides = [1, 1]} : vector<8x4xi32> to vector<8x1xi32>
    %12 = vector.broadcast %11 : vector<8x1xi32> to vector<8x256xi32>
    %13 = arith.cmpi eq, %5, %12 : vector<8x256xi32>
    %14 = arith.extui %13 : vector<8x256xi1> to vector<8x256xi32>
    %15 = arith.sitofp %14 : vector<8x256xi32> to vector<8x256xf32>
    %16 = vector.extract_strided_slice %4 {offsets = [0, 2], sizes = [8, 1], strides = [1, 1]} : vector<8x4xi32> to vector<8x1xi32>
    %17 = vector.broadcast %16 : vector<8x1xi32> to vector<8x256xi32>
    %18 = arith.cmpi eq, %5, %17 : vector<8x256xi32>
    %19 = arith.extui %18 : vector<8x256xi1> to vector<8x256xi32>
    %20 = arith.sitofp %19 : vector<8x256xi32> to vector<8x256xf32>
    %21 = vector.extract_strided_slice %4 {offsets = [0, 3], sizes = [8, 1], strides = [1, 1]} : vector<8x4xi32> to vector<8x1xi32>
    %22 = vector.broadcast %21 : vector<8x1xi32> to vector<8x256xi32>
    %23 = arith.cmpi eq, %5, %22 : vector<8x256xi32>
    %24 = arith.extui %23 : vector<8x256xi1> to vector<8x256xi32>
    %25 = arith.sitofp %24 : vector<8x256xi32> to vector<8x256xf32>
    %26 = tpu.concatenate %10, %15, %20, %25 in 1 : vector<8x256xf32>, vector<8x256xf32>, vector<8x256xf32>, vector<8x256xf32> -> vector<8x1024xf32>
    %c0_1 = arith.constant 0 : index
    %c0_2 = arith.constant 0 : index
    %27 = vector.load %arg2[%c0_1, %c0_2] : memref<1024x128xf32, #tpu.memory_space<vmem>>, vector<1024x128xf32>
    %cst = arith.constant dense<0.000000e+00> : vector<8x128xf32>
    %28 = tpu.matmul %26, %27, %cst {dimension_numbers = #tpu.dot_dimension_numbers<[1], [0], [0], [1], [0, 0, 1, 1], [], []>, precision = #tpu.contract_precision<fp32>} : vector<8x1024xf32>, vector<1024x128xf32>, vector<8x128xf32> -> vector<8x128xf32>
    %c0_3 = arith.constant 0 : index
    %c0_4 = arith.constant 0 : index
    %29 = vector.load %arg3[%c0_3, %c0_4] : memref<8x128xf32, #tpu.memory_space<vmem>>, vector<8x128xf32>
    %30 = arith.addf %28, %29 : vector<8x128xf32>
    %c0_5 = arith.constant 0 : index
    %c0_6 = arith.constant 0 : index
    %31 = vector.load %arg4[%c0_5, %c0_6] : memref<8x128xf32, #tpu.memory_space<vmem>>, vector<8x128xf32>
    tpu.vector_store %arg4[%c0_5, %c0_6], %30 {strides = array<i32>} : memref<8x128xf32, #tpu.memory_space<vmem>>, vector<8x128xf32>,
    return
  }
  func.func @transform_0(%arg0: i32) -> (i32, i32) {
    %c0_i32 = arith.constant 0 : i32
    %c0_i32_0 = arith.constant 0 : i32
    return %arg0, %c0_i32 : i32, i32
  }
  func.func @transform_1(%arg0: i32) -> (i32, i32) {
    %c0_i32 = arith.constant 0 : i32
    %c0_i32_0 = arith.constant 0 : i32
    %c0_i32_1 = arith.constant 0 : i32
    return %c0_i32, %c0_i32_0 : i32, i32
  }
  func.func @transform_2(%arg0: i32) -> (i32, i32) {
    %c0_i32 = arith.constant 0 : i32
    %c0_i32_0 = arith.constant 0 : i32
    %c0_i32_1 = arith.constant 0 : i32
    return %c0_i32, %c0_i32_0 : i32, i32
  }
  func.func @transform_3(%arg0: i32) -> (i32, i32) {
    %c0_i32 = arith.constant 0 : i32
    %c0_i32_0 = arith.constant 0 : i32
    return %arg0, %c0_i32 : i32, i32
  }
}

</mosaic_0001>

<bundles_post_ra>
// kernel: tpu_custom_call.1
= control target key start
LH: loop header
LB: loop body
LE: loop exit
PB: predicated region body
PF: predicated region fallthrough
CT: control target
= control target key end

     0   :  { %8 = vsyncpa [#allocation3], 0  ;;  %s8290_s0 = inlined_call_operand.vmem [shape: s32[8,4], index: 0, kind: input, shape index: {}]   ;;  %s8291_s1 = inlined_call_operand.hbm [shape: f32[1024,128], index: 1, kind: input, shape index: {}]   ;;  %s8292_s2 = inlined_call_operand.vmem [shape: f32[8,128], index: 2, kind: input, shape index: {}]   ;;  %s8293_s3 = inlined_call_operand.hbm [shape: f32[8,128], index: 3, kind: output, shape index: {}]  }
   0x1   :  { %9 = vsyncpa [#allocation4], 0  ;;  %s5369_s12 = smov [#allocation2]   ;;  %s5321_s16 = scalar_lea.hbm %s8291_s1, 16384 }
   0x2   :  { %s17_s13 = sshll.u32 %s5369_s12, 4  ;;  %p5322_p0 = scmp.ne.s32.totalorder %s8291_s1, %s5321_s16  ;;  %s18_s13 = int_to_ptr.vmem [resolvable:$true] %s17_s13 }
   0x3   :  { %p5325_p1 = scmp.lt.u32.totalorder %s5321_s16, %s8291_s1 }
   0x5   :  { %p5327_p2 = pnand %p5325_p1, %p5322_p0 }
   0x7   :  { %5330 = shalt.err (!%p5327_p2)
}
   0x8   :  { %s5331_s21 = scalar_lea.vmem %s18_s13, 16384  ;;  %p5336_p4 = scmp.lt.s32.totalorder %s18_s13, %s18_s13 }
   0x9   :  { %p5332_p3 = scmp.ne.s32.totalorder %s18_s13, %s5331_s21  ;;  %p5337_p5 = scmp.lt.s32.totalorder %s5331_s21, %s5331_s21 }
   0xb   :  { %p5338_p6 = por %p5337_p5, %p5336_p4 }
   0xd   :  { %p5339_p7 = pnand %p5338_p6, %p5332_p3 }
   0xf   :  { %5342 = shalt.err (!%p5339_p7)
}
  0x10   :  { %s5370_s22 = smov 128   ;;  %s5371_s23 = smov 8  }
  0x11   :  { %23 = dma.hbm_to_vmem [thread:$0]  %s8291_s1, 16384, %s18_s13, [#allocation3], %s5370_s22, %s5370_s22, %s5371_s23  }
  0x12   :  { %5365 = dma.done.wait [#allocation3], 16384  }
  0x13   :  { %5366 = vsyncadd [#allocation3], 4294950912  ;;  %v5372_v0 = vmov 0   ;;  %v29_v1 = vld [vmem:[%s8290_s0] sm:$0xff]  ;;  %v5414_v2 = vld [vmem:[#allocation2 + $0x80] sm:$0xff]  ;;  %v5373_v40 = vmov 1  }
  0x14   :  { %5316 = vset.pattern.permute.xlu0 %v5372_v0  ;;  %v90_v3 = vld [vmem:[#allocation2 + $0x88] sm:$0xff]  ;;  %vm30_vm0 = vcmp.gt.s32.totalorder %v29_v1, 0  ;;  %v251_v4 = vand.u32 4294901760, %v5414_v2  ;;  %v5417_v6 = vld [vmem:[#allocation2] sm:$0xff]  ;;  %v5421_v8 = vld [vmem:[#allocation2 + $0x90] sm:$0xff] }
  0x15   :  { %v254_v5 = vand.u32 4294901760, %v90_v3  ;;  %v5419_v7 = vld [vmem:[#allocation2 + $0x8] sm:$0xff]  ;;  %v31_v9 = vsel %vm30_vm0, %v29_v1, 0  ;;  %v203_v10 = vand.u32 4294901760, %v5417_v6  ;;  %v5425_v12 = vld [vmem:[#allocation2 + $0x98] sm:$0xff]  ;;  %v257_v13 = vand.u32 4294901760, %v5421_v8 }
  0x16   :  { %v206_v11 = vand.u32 4294901760, %v5419_v7  ;;  %v5428_v14 = vld [vmem:[#allocation2 + $0x10] sm:$0xff]  ;;  %vm32_vm1 = vcmp.lt.s32.totalorder %v31_v9, 255  ;;  %v5431_v15 = vsub.f32 %v5414_v2, %v251_v4  ;;  %v260_v17 = vand.u32 4294901760, %v5425_v12  ;;  %v5436_v18 = vld [vmem:[#allocation2 + $0x18] sm:$0xff]  ;;  %v5494_v39 = vld [vmem:[#allocation2 + $0xa0] sm:$0xff] }
  0x17   :  { %v5433_v16 = vsub.f32 %v90_v3, %v254_v5  ;;  %v5438_v19 = vsel %vm32_vm1, %v31_v9, 255  ;;  %v5443_v20 = vsub.f32 %v5417_v6, %v203_v10  ;;  %v5453_v22 = vsub.f32 %v5421_v8, %v257_v13  ;;  %v5500_v45 = vld [vmem:[#allocation2 + $0xa8] sm:$0xff]  ;;  %v5504_v50 = vld [vmem:[#allocation2 + $0x20] sm:$0xff]  ;;  %v5518_v60 = vld [vmem:[#allocation2 + $0xb0] sm:$0xff] }
  0x18   :  { %v5448_v21 = vsub.f32 %v5419_v7, %v206_v11  ;;  %38 = vperm.xlu0 %5316, %v5438_v19   ;;  %v8313_v23 = vand.u32 4294901760, %v5431_v15  ;;  %v5461_v25 = vsub.f32 %v5425_v12, %v260_v17  ;;  %v209_v26 = vand.u32 4294901760, %v5428_v14  ;;  %v5510_v55 = vld [vmem:[#allocation2 + $0x28] sm:$0xff]  ;;  %v5520_v61 = vld [vmem:[#allocation2 + $0xb8] sm:$0xff] }
  0x19   :  { %v8311_v24 = vand.u32 4294901760, %v5433_v16  ;;  %v8310_v27 = vand.u32 4294901760, %v5443_v20  ;;  %v8307_v29 = vand.u32 4294901760, %v5453_v22  ;;  %v212_v30 = vand.u32 4294901760, %v5436_v18 }
  0x1a   :  { %v8308_v28 = vand.u32 4294901760, %v5448_v21  ;;  %v430_v31 = vsub.f32 %v5431_v15, %v8313_v23  ;;  %v8306_v33 = vand.u32 4294901760, %v5461_v25  ;;  %v5478_v34 = vsub.f32 %v5428_v14, %v209_v26 }
  0x1b   :  { %v437_v32 = vsub.f32 %v5433_v16, %v8311_v24  ;;  %v318_v35 = vsub.f32 %v5443_v20, %v8310_v27  ;;  %v444_v37 = vsub.f32 %v5453_v22, %v8307_v29  ;;  %v5492_v38 = vsub.f32 %v5436_v18, %v212_v30 }
  0x1c   :  { %v325_v36 = vsub.f32 %v5448_v21, %v8308_v28  ;;  %5317 = vset.pattern.permute.xlu0 %v5373_v40  ;;  %v431_v41 = vand.u32 4294901760, %v430_v31  ;;  %v451_v43 = vsub.f32 %v5461_v25, %v8306_v33  ;;  %v8301_v44 = vand.u32 4294901760, %v5478_v34 }
  0x1d   :  { %v438_v42 = vand.u32 4294901760, %v437_v32  ;;  %47 = vperm.xlu0 %5317, %v5438_v19   ;;  %v319_v46 = vand.u32 4294901760, %v318_v35  ;;  %v445_v48 = vand.u32 4294901760, %v444_v37  ;;  %v8298_v49 = vand.u32 4294901760, %v5492_v38  ;;  %v5551_v37 = vld [vmem:[#allocation2 + $0x38] sm:$0xff] }
  0x1e   :  { %v326_v47 = vand.u32 4294901760, %v325_v36  ;;  %v452_v52 = vand.u32 4294901760, %v451_v43  ;;  %v332_v53 = vsub.f32 %v5478_v34, %v8301_v44  ;;  %v263_v54 = vand.u32 4294901760, %v5494_v39  ;;  %v5549_v36 = vld [vmem:[#allocation2 + $0x30] sm:$0xff]  ;;  %v5628_v44 = vld [vmem:[#allocation2 + $0x48] sm:$0xff] }
  0x1f   :  { %v4570_v51 = vpack.c.bf16 %v438_v42, %v431_v41  ;;  %v339_v57 = vsub.f32 %v5492_v38, %v8298_v49  ;;  %v266_v58 = vand.u32 4294901760, %v5500_v45  ;;  %v5516_v59 = vpack.c.bf16 %v254_v5, %v251_v4 }
  0x20   :  { %v4572_v56 = vpack.c.bf16 %v326_v47, %v319_v46  ;;  %v4574_v62 = vpack.c.bf16 %v452_v52, %v445_v48  ;;  %v333_v63 = vand.u32 4294901760, %v332_v53  ;;  %v5525_v0 = vsub.f32 %v5494_v39, %v263_v54  ;;  %v5655_v39 = vld [vmem:[#allocation2 + $0xd8] sm:$0xff] }
  0x21   :  { %4571 = vmatprep.subr.bf16.mxu1 %v4570_v51  ;;  %v215_v1 = vand.u32 4294901760, %v5504_v50  ;;  %v340_v2 = vand.u32 4294901760, %v339_v57  ;;  %v5531_v3 = vsub.f32 %v5500_v45, %v266_v58  ;;  %4539 = vmatprep.subr.bf16.mxu0 %v5516_v59  ;;  %v218_v4 = vand.u32 4294901760, %v5510_v55 }
  0x22   :  { %4573 = vmatpush3.bf16.msra.mxu1 %v4572_v56  ;;  %v5539_v5 = vpack.c.bf16 %v206_v11, %v203_v10  ;;  %v8297_v9 = vand.u32 4294901760, %v5525_v0  ;;  %v269_v32 = vand.u32 4294901760, %v5518_v60  ;;  %v272_v35 = vand.u32 4294901760, %v5520_v61 }
  0x23   :  { %4575 = vmatprep.subr.bf16.mxu1 %v4574_v62  ;;  %v5545_v31 = vsub.f32 %v5504_v50, %v215_v1  ;;  %v4576_v6 = vpack.c.bf16 %v340_v2, %v333_v63  ;;  %v8296_v7 = vand.u32 4294901760, %v5531_v3  ;;  %v5557_v10 = vsub.f32 %v5510_v55, %v218_v4  ;;  %v5605_v62 = vld [vmem:[#allocation2 + $0xc0] sm:$0xff]  ;;  %v5607_v63 = vld [vmem:[#allocation2 + $0xc8] sm:$0xff] }
  0x24   :  { %4541 = vmatpush3.bf16.msra.mxu0 %v5539_v5  ;;  %v5564_v11 = vpack.c.bf16 %v260_v17, %v257_v13  ;;  %v458_v40 = vsub.f32 %v5525_v0, %v8297_v9  ;;  %v5573_v42 = vsub.f32 %v5518_v60, %v269_v32  ;;  %v5578_v43 = vsub.f32 %v5520_v61, %v272_v35  ;;  %v5623_v9 = vld [vmem:[#allocation2 + $0x40] sm:$0xff] }
  0x25   :  { %v8295_v41 = vand.u32 4294901760, %v5545_v31  ;;  %v465_v8 = vsub.f32 %v5531_v3, %v8296_v7  ;;  %v8294_v12 = vand.u32 4294901760, %v5557_v10  ;;  %v221_v13 = vand.u32 4294901760, %v5549_v36 }
  0x26   :  { %4577 = vmatpush3.bf16.msra.mxu1 %v4576_v6  ;;  %4543 = vmatprep.subr.bf16.mxu0 %v5564_v11  ;;  %v224_v17 = vand.u32 4294901760, %v5551_v37  ;;  %v459_v46 = vand.u32 4294901760, %v458_v40  ;;  %v8299_v48 = vand.u32 4294901760, %v5573_v42  ;;  %v8300_v51 = vand.u32 4294901760, %v5578_v43 }
  0x27   :  { %v346_v47 = vsub.f32 %v5545_v31, %v8295_v41  ;;  %v466_v52 = vand.u32 4294901760, %v465_v8  ;;  %v353_v53 = vsub.f32 %v5557_v10, %v8294_v12  ;;  %v5598_v56 = vsub.f32 %v5549_v36, %v221_v13 }
  0x28   :  { %v5603_v57 = vsub.f32 %v5551_v37, %v224_v17  ;;  %v472_v6 = vsub.f32 %v5573_v42, %v8299_v48  ;;  %v479_v40 = vsub.f32 %v5578_v43, %v8300_v51  ;;  %v5619_v8 = vpack.c.bf16 %v212_v30, %v209_v26 }
  0x29   :  { %v347_v2 = vand.u32 4294901760, %v346_v47  ;;  %v4578_v12 = vpack.c.bf16 %v466_v52, %v459_v46  ;;  %v354_v41 = vand.u32 4294901760, %v353_v53  ;;  %v8305_v7 = vand.u32 4294901760, %v5598_v56  ;;  %v5642_v52 = vld [vmem:[#allocation2 + $0xd0] sm:$0xff] }
  0x2a   :  { %v8302_v47 = vand.u32 4294901760, %v5603_v57  ;;  %v473_v49 = vand.u32 4294901760, %v472_v6  ;;  %v480_v48 = vand.u32 4294901760, %v479_v40  ;;  %4545 = vmatpush3.bf16.msra.mxu0 %v5619_v8  ;;  %v275_v51 = vand.u32 4294901760, %v5605_v62 }
  0x2b   :  { %v278_v14 = vand.u32 4294901760, %v5607_v63  ;;  %4579 = vmatprep.subr.bf16.mxu1 %v4578_v12  ;;  %v4580_v18 = vpack.c.bf16 %v354_v41, %v347_v2  ;;  %v360_v26 = vsub.f32 %v5598_v56, %v8305_v7  ;;  %v5640_v46 = vpack.c.bf16 %v266_v58, %v263_v54 }
  0x2c   :  { %v367_v30 = vsub.f32 %v5603_v57, %v8302_v47  ;;  %v4582_v53 = vpack.c.bf16 %v480_v48, %v473_v49  ;;  %v5647_v41 = vsub.f32 %v5605_v62, %v275_v51  ;;  %v227_v2 = vand.u32 4294901760, %v5623_v9  ;;  %v103_v62 = vld [vmem:[#allocation2 + $0xf0] sm:$0xff] }
  0x2d   :  { %v5652_v12 = vsub.f32 %v5607_v63, %v278_v14  ;;  %4581 = vmatpush3.bf16.msra.mxu1 %v4580_v18  ;;  %v361_v45 = vand.u32 4294901760, %v360_v26  ;;  %4547 = vmatprep.subr.bf16.mxu0 %v5640_v46  ;;  %v230_v49 = vand.u32 4294901760, %v5628_v44  ;;  %v5663_v58 = vpack.c.bf16 %v218_v4, %v215_v1  ;;  %v5673_v26 = vld [vmem:[#allocation2 + $0x50] sm:$0xff]  ;;  %v104_v63 = vld [vmem:[#allocation2 + $0xf8] sm:$0xff] }
  0x2e   :  { %v368_v54 = vand.u32 4294901760, %v367_v30  ;;  %4583 = vmatprep.subr.bf16.mxu1 %v4582_v53  ;;  %v8304_v48 = vand.u32 4294901760, %v5647_v41  ;;  %v5670_v40 = vsub.f32 %v5623_v9, %v227_v2  ;;  %v8319_v18 = vand.u32 4294901760, %v5642_v52  ;;  %v5675_v30 = vld [vmem:[#allocation2 + $0x58] sm:$0xff] }
  0x2f   :  { %v8303_v6 = vand.u32 4294901760, %v5652_v12  ;;  %v5680_v55 = vsub.f32 %v5628_v44, %v230_v49  ;;  %4549 = vmatpush3.bf16.msra.mxu0 %v5663_v58  ;;  %v8316_v1 = vand.u32 4294901760, %v5655_v39  ;;  %v5688_v4 = vpack.c.bf16 %v272_v35, %v269_v32 }
  0x30   :  { %v4584_v50 = vpack.c.bf16 %v368_v54, %v361_v45  ;;  %v486_v53 = vsub.f32 %v5647_v41, %v8304_v48  ;;  %v8309_v54 = vand.u32 4294901760, %v5670_v40  ;;  %v5700_v47 = vsub.f32 %v5642_v52, %v8319_v18 }
  0x31   :  { %8557 = vst [vmem:[#allocation8_spill] sm:$0xff] %v5688_v4  ;;  %v493_v45 = vsub.f32 %v5652_v12, %v8303_v6  ;;  %v8312_v60 = vand.u32 4294901760, %v5680_v55  ;;  %v5706_v61 = vsub.f32 %v5655_v39, %v8316_v1  ;;  %4551 = vmatprep.subr.bf16.mxu0 %v5688_v4  ;;  %v8314_v32 = vand.u32 4294901760, %v5673_v26 }
  0x32   :  { %4585 = vmatpush3.bf16.msra.mxu1 %v4584_v50  ;;  %v8315_v35 = vand.u32 4294901760, %v5675_v30  ;;  %v487_v6 = vand.u32 4294901760, %v486_v53  ;;  %v374_v7 = vsub.f32 %v5670_v40, %v8309_v54  ;;  %v8317_v50 = vand.u32 4294901760, %v5700_v47  ;;  %v5731_v54 = vld [vmem:[#allocation2 + $0xe8] sm:$0xff] }
  0x33   :  { %v494_v48 = vand.u32 4294901760, %v493_v45  ;;  %v381_v33 = vsub.f32 %v5680_v55, %v8312_v60  ;;  %v8318_v29 = vand.u32 4294901760, %v5706_v61  ;;  %v5722_v28 = vsub.f32 %v5673_v26, %v8314_v32  ;;  %v5729_v45 = vld [vmem:[#allocation2 + $0xe0] sm:$0xff] }
  0x34   :  { %v5727_v53 = vsub.f32 %v5675_v30, %v8315_v35  ;;  %v375_v24 = vand.u32 4294901760, %v374_v7  ;;  %v500_v60 = vsub.f32 %v5700_v47, %v8317_v50  ;;  %v5740_v23 = vpack.c.bf16 %v224_v17, %v221_v13  ;;  %v5747_v7 = vld [vmem:[#allocation2 + $0x60] sm:$0xff] }
  0x35   :  { %v4586_v27 = vpack.c.bf16 %v494_v48, %v487_v6  ;;  %v382_v32 = vand.u32 4294901760, %v381_v33  ;;  %v507_v35 = vsub.f32 %v5706_v61, %v8318_v29  ;;  %v8321_v1 = vand.u32 4294901760, %v5722_v28  ;;  %v5749_v6 = vld [vmem:[#allocation2 + $0x68] sm:$0xff] }
  0x36   :  { %8558 = vst [vmem:[#allocation9_spill] sm:$0xff] %v5740_v23  ;;  %v8320_v48 = vand.u32 4294901760, %v5727_v53  ;;  %v501_v50 = vand.u32 4294901760, %v500_v60  ;;  %4553 = vmatpush3.bf16.msra.mxu0 %v5740_v23  ;;  %v287_v36 = vand.u32 4294901760, %v5729_v45  ;;  %v290_v33 = vand.u32 4294901760, %v5731_v54 }
  0x37   :  { %4587 = vmatprep.subr.bf16.mxu1 %v4586_v27  ;;  %v5758_v37 = vpack.c.bf16 %v278_v14, %v275_v51  ;;  %v4588_v13 = vpack.c.bf16 %v382_v32, %v375_v24  ;;  %v508_v17 = vand.u32 4294901760, %v507_v35  ;;  %v388_v29 = vsub.f32 %v5722_v28, %v8321_v1 }
  0x38   :  { %v395_v27 = vsub.f32 %v5727_v53, %v8320_v48  ;;  %v5767_v60 = vsub.f32 %v5729_v45, %v287_v36  ;;  %v5770_v18 = vsub.f32 %v5731_v54, %v290_v33  ;;  %v239_v51 = vand.u32 4294901760, %v5747_v7 }
  0x39   :  { %8559 = vst [vmem:[#allocation10_spill] sm:$0xff] %v5758_v37  ;;  %4555 = vmatprep.subr.bf16.mxu0 %v5758_v37  ;;  %v242_v24 = vand.u32 4294901760, %v5749_v6  ;;  %4589 = vmatpush3.bf16.msra.mxu1 %v4588_v13  ;;  %v4590_v14 = vpack.c.bf16 %v508_v17, %v501_v50  ;;  %v389_v32 = vand.u32 4294901760, %v388_v29  ;;  %v5779_v45 = vpack.c.bf16 %v230_v49, %v227_v2  ;;  %v87_v13 = vld [vmem:[#allocation2 + $0x70] sm:$0xff]  ;;  %v88_v50 = vld [vmem:[#allocation2 + $0x78] sm:$0xff] }
  0x3a   :  { %v396_v35 = vand.u32 4294901760, %v395_v27  ;;  %v8324_v54 = vand.u32 4294901760, %v5767_v60  ;;  %v8325_v48 = vand.u32 4294901760, %v5770_v18  ;;  %v5784_v1 = vsub.f32 %v5747_v7, %v239_v51 }
  0x3b   :  { %8560 = vst [vmem:[#allocation11_spill] sm:$0xff] %v5779_v45  ;;  %v5787_v37 = vsub.f32 %v5749_v6, %v242_v24  ;;  %4591 = vmatprep.subr.bf16.mxu1 %v4590_v14  ;;  %4557 = vmatpush3.bf16.msra.mxu0 %v5779_v45  ;;  %v293_v9 = vand.u32 4294901760, %v103_v62  ;;  %v296_v44 = vand.u32 4294901760, %v104_v63  ;;  %v8561_v2 = vand.u32 4294901760, %v5642_v52 }
  0x3c   :  { %v4592_v29 = vpack.c.bf16 %v396_v35, %v389_v32  ;;  %v8562_v49 = vand.u32 4294901760, %v5655_v39  ;;  %v514_v7 = vsub.f32 %v5767_v60, %v8324_v54  ;;  %v521_v6 = vsub.f32 %v5770_v18, %v8325_v48 }
  0x3d   :  { %v8334_v27 = vand.u32 4294901760, %v5784_v1  ;;  %v8335_v14 = vand.u32 4294901760, %v5787_v37  ;;  %v5804_v32 = vsub.f32 %v103_v62, %v293_v9  ;;  %v5806_v52 = vsub.f32 %v104_v63, %v296_v44 }
  0x3e   :  { %v5794_v17 = vpack.c.bf16 %v8562_v49, %v8561_v2  ;;  %4593 = vmatpush3.bf16.msra.mxu1 %v4592_v29  ;;  %v245_v39 = vand.u32 4294901760, %v87_v13  ;;  %v248_v35 = vand.u32 4294901760, %v88_v50  ;;  %v515_v2 = vand.u32 4294901760, %v514_v7 }
  0x3f   :  { %v522_v49 = vand.u32 4294901760, %v521_v6  ;;  %v402_v54 = vsub.f32 %v5784_v1, %v8334_v27  ;;  %v409_v48 = vsub.f32 %v5787_v37, %v8335_v14  ;;  %v8337_v29 = vand.u32 4294901760, %v5804_v32 }
  0x40   :  { %8563 = vst [vmem:[#allocation12_spill] sm:$0xff] %v5794_v17  ;;  %4559 = vmatprep.subr.bf16.mxu0 %v5794_v17  ;;  %v8336_v62 = vand.u32 4294901760, %v5806_v52  ;;  %v5817_v63 = vsub.f32 %v87_v13, %v245_v39  ;;  %v5819_v45 = vsub.f32 %v88_v50, %v248_v35  ;;  %v8564_v6 = vand.u32 4294901760, %v5673_v26 }
  0x41   :  { %v4594_v17 = vpack.c.bf16 %v522_v49, %v515_v2  ;;  %v403_v23 = vand.u32 4294901760, %v402_v54  ;;  %v410_v7 = vand.u32 4294901760, %v409_v48  ;;  %v8565_v4 = vand.u32 4294901760, %v5675_v30 }
  0x42   :  { %v528_v14 = vsub.f32 %v5804_v32, %v8337_v29  ;;  %v535_v13 = vsub.f32 %v5806_v52, %v8336_v62  ;;  %v415_v50 = vand.u32 4294901760, %v5817_v63  ;;  %v422_v2 = vand.u32 4294901760, %v5819_v45 }
  0x43   :  { %v5825_v27 = vpack.c.bf16 %v8565_v4, %v8564_v6  ;;  %4595 = vmatprep.subr.bf16.mxu1 %v4594_v17  ;;  %v4596_v48 = vpack.c.bf16 %v410_v7, %v403_v23  ;;  %v5836_v26 = vpack.c.bf16 %v290_v33, %v287_v36  ;;  %v5838_v30 = vpack.c.bf16 %v242_v24, %v239_v51 }
  0x44   :  { %v529_v4 = vand.u32 4294901760, %v528_v14  ;;  %v536_v54 = vand.u32 4294901760, %v535_v13  ;;  %v416_v49 = vsub.f32 %v5817_v63, %v415_v50  ;;  %v423_v6 = vsub.f32 %v5819_v45, %v422_v2 }
  0x45   :  { %4561 = vmatpush3.bf16.msra.mxu0 %v5825_v27  ;;  %4597 = vmatpush3.bf16.msra.mxu1 %v4596_v48  ;;  %v5843_v62 = vpack.c.bf16 %v296_v44, %v293_v9  ;;  %v5845_v29 = vpack.c.bf16 %v248_v35, %v245_v39  ;;  %v4602_v23 = vpack.c.bf16 %v5433_v16, %v5431_v15  ;;  %v8572_v13 = vand.u32 4294901760, %v5478_v34 }
  0x46   :  { %4563 = vmatprep.subr.bf16.mxu0 %v5836_v26  ;;  %v4598_v36 = vpack.c.bf16 %v536_v54, %v529_v4  ;;  %v417_v33 = vand.u32 4294901760, %v416_v49  ;;  %v424_v51 = vand.u32 4294901760, %v423_v6  ;;  %v8568_v49 = vand.u32 4294901760, %v5443_v20 }
  0x47   :  { %v8569_v6 = vand.u32 4294901760, %v5448_v21  ;;  %v8594_v24 = vand.u32 4294901760, %v5767_v60 }
  0x48   :  { %4599 = vmatprep.subr.bf16.mxu1 %v4598_v36  ;;  %v4600_v39 = vpack.c.bf16 %v424_v51, %v417_v33  ;;  %v8566_v51 = vand.u32 4294901760, %v5431_v15  ;;  %v8570_v36 = vand.u32 4294901760, %v5453_v22  ;;  %v8571_v33 = vand.u32 4294901760, %v5461_v25 }
  0x49   :  { %4565 = vmatpush3.bf16.msra.mxu0 %v5838_v30  ;;  %v5893_v4 = vpack.c.bf16 %v8569_v6, %v8568_v49  ;;  %v8573_v15 = vand.u32 4294901760, %v5492_v38  ;;  %v8576_v49 = vand.u32 4294901760, %v5545_v31  ;;  %v8577_v6 = vand.u32 4294901760, %v5557_v10 }
  0x4a   :  { %4567 = vmatprep.subr.bf16.mxu0 %v5843_v62  ;;  %4601 = vmatpush3.bf16.msra.mxu1 %v4600_v39  ;;  %v8567_v39 = vand.u32 4294901760, %v5433_v16  ;;  %v5899_v48 = vpack.c.bf16 %v8571_v33, %v8570_v36  ;;  %v8579_v36 = vand.u32 4294901760, %v5578_v43 }
  0x4b   :  { %4635 = vmatprep.subr.bf16.mxu1 %v5516_v59  ;;  %v5905_v16 = vpack.c.bf16 %v8573_v15, %v8572_v13  ;;  %v5917_v35 = vpack.c.bf16 %v8577_v6, %v8576_v49  ;;  %v8580_v13 = vand.u32 4294901760, %v5598_v56  ;;  %v8581_v15 = vand.u32 4294901760, %v5603_v57 }
  0x4c   :  { %v5887_v54 = vpack.c.bf16 %v8567_v39, %v8566_v51  ;;  %v8574_v51 = vand.u32 4294901760, %v5525_v0  ;;  %v8575_v39 = vand.u32 4294901760, %v5531_v3  ;;  %v8585_v49 = vand.u32 4294901760, %v5670_v40 }
  0x4d   :  { %4569 = vmatpush3.bf16.msra.mxu0 %v5845_v29  ;;  %v5929_v14 = vpack.c.bf16 %v8581_v15, %v8580_v13  ;;  %v8586_v6 = vand.u32 4294901760, %v5680_v55  ;;  %v5374_v13 = vmov 2   ;;  %v8591_v15 = vand.u32 4294901760, %v5722_v28 }
  0x4e   :  { %4603 = vmatprep.subr.bf16.mxu0 %v4602_v23  ;;  %v5911_v7 = vpack.c.bf16 %v8575_v39, %v8574_v51  ;;  %v8578_v23 = vand.u32 4294901760, %v5573_v42  ;;  %v8582_v51 = vand.u32 4294901760, %v5647_v41  ;;  %v8583_v39 = vand.u32 4294901760, %v5652_v12  ;;  %5318 = vset.pattern.permute.xlu1 %v5374_v13 }
  0x4f   :  { %v5941_v9 = vpack.c.bf16 %v8586_v6, %v8585_v49  ;;  %56 = vperm.xlu1 %5318, %v5438_v19   ;;  %v8595_v49 = vand.u32 4294901760, %v5770_v18  ;;  %v8599_v13 = vand.u32 4294901760, %v5804_v32 }
  0x50   :  { %v5923_v33 = vpack.c.bf16 %v8579_v36, %v8578_v23  ;;  %v5935_v44 = vpack.c.bf16 %v8583_v39, %v8582_v51  ;;  %v8588_v23 = vand.u32 4294901760, %v5700_v47  ;;  %v8589_v36 = vand.u32 4294901760, %v5706_v61 }
  0x51   :  { %8587 = vst [vmem:[#allocation14_spill] sm:$0xff] %v5941_v9  ;;  %v8592_v51 = vand.u32 4294901760, %v5727_v53  ;;  %v5960_v6 = vpack.c.bf16 %v8595_v49, %v8594_v24  ;;  %v8596_v9 = vand.u32 4294901760, %v5784_v1 }
  0x52   :  { %8584 = vst [vmem:[#allocation13_spill] sm:$0xff] %v5935_v44  ;;  %v5947_v17 = vpack.c.bf16 %v8589_v36, %v8588_v23  ;;  %v8597_v23 = vand.u32 4294901760, %v5787_v37 }
  0x53   :  { %v5954_v39 = vpack.c.bf16 %v8592_v51, %v8591_v15  ;;  %v5974_v15 = vpack.c.bf16 %v422_v2, %v415_v50  ;;  %v34_v51 = vlaneseq }
  0x54   :  { %8590 = vst [vmem:[#allocation15_spill] sm:$0xff] %v5947_v17  ;;  %v5966_v36 = vpack.c.bf16 %v8597_v23, %v8596_v9  ;;  %v8600_v17 = vand.u32 4294901760, %v5806_v52  ;;  %v8338_v9 = vmov 0.0  }
  0x55   :  { %8593 = vst [vmem:[#allocation16_spill] sm:$0xff] %v5954_v39  ;;  %8602 = vst [vmem:[#allocation19_spill] sm:$0xff] %v5974_v15  ;;  %v5976_v39 = vand.u32 127, %v34_v51 }
  0x56   :  { %8598 = vst [vmem:[#allocation17_spill] sm:$0xff] %v5966_v36  ;;  %v5972_v44 = vpack.c.bf16 %v8600_v17, %v8599_v13  ;;  %v8340_v17 = vmov 1.0   ;;  %v8608_v36 = vld [vmem:[#allocation9_spill] sm:$0xff] }
  0x57   :  { %8603 = vst [vmem:[#allocation20_spill] sm:$0xff] %v5976_v39  ;;  %v5979_v24 = vadd.s32 128, %v5976_v39 }
  0x58   :  { %8601 = vst [vmem:[#allocation18_spill] sm:$0xff] %v5972_v44 }
  0x59   :  { %8604 = vst [vmem:[#allocation21_spill] sm:$0xff] %v5979_v24 }
  0x97   :  { %v5981_v49 = vpop.permute.xlu0 %38 }
  0x98   :  { %vm40_vm2 = vcmp.eq.s32.totalorder %v5976_v39, %v5981_v49  ;;  %vm41_vm3 = vcmp.eq.s32.totalorder %v5979_v24, %v5981_v49 }
  0x99   :  { %v3666_v50 = vsel %vm40_vm2, 1.0, %v8338_v9  ;;  %v3667_v2 = vsel %vm41_vm3, 1.0, %v8338_v9  ;;  %3674 = vmatprep.mubr.msk.f32.mxu1 %vm41_vm3, %v8340_v17 }
  0x9a   :  { %v299_v23 = vsub.f32 %v3667_v2, %v3667_v2  ;;  %v5999_v13 = vsub.f32 %v3666_v50, %v3666_v50  ;;  %3675 = vmatmul.mubr.msk.f32.vlgmr.msra.gmra.mrb[0].mxu1 %vm40_vm2, %v8340_v17  ;;  %v8605_v17 = vpack.c.bf16 %v5448_v21, %v5443_v20  ;;  %v8612_v20 = vld [vmem:[#allocation11_spill] sm:$0xff]  ;;  %v8613_v21 = vpack.c.bf16 %v5557_v10, %v5545_v31 }
  0x9b   :  { %4637 = vmatpush3.bf16.msra.mxu1 %v5539_v5  ;;  %v8620_v31 = vpack.c.bf16 %v5603_v57, %v5598_v56  ;;  %v8624_v57 = vpack.c.bf16 %v5680_v55, %v5670_v40  ;;  %v6083_v40 = vld [vmem:[#allocation2 + $0x188] sm:$0xff] }
  0x9c   :  { %4639 = vmatprep.subr.bf16.mxu1 %v5564_v11  ;;  %v300_v51 = vand.u32 4294901760, %v299_v23  ;;  %v8342_v9 = vand.u32 4294901760, %v5999_v13 }
  0x9e   :  { %783 = vmatprep.mubr.f32.mxu1 %v300_v51  ;;  %v301_v15 = vsub.f32 %v299_v23, %v300_v51  ;;  %v307_v2 = vsub.f32 %v5999_v13, %v8342_v9  ;;  %v8606_v51 = vld [vmem:[#allocation8_spill] sm:$0xff]  ;;  %v8607_v9 = vpack.c.bf16 %v5461_v25, %v5453_v22  ;;  %v6034_v25 = vld [vmem:[#allocation2 + $0x160] sm:$0xff] }
  0x9f   :  { %4641 = vmatpush3.bf16.msra.mxu1 %v5619_v8  ;;  %v8614_v22 = vld [vmem:[#allocation12_spill] sm:$0xff]  ;;  %8615 = vst [vmem:[#allocation8_spill] sm:$0xff] %v6034_v25 }
  0xa0   :  { %4643 = vmatprep.subr.bf16.mxu1 %v5640_v46  ;;  %v302_v50 = vand.u32 4294901760, %v301_v15  ;;  %v308_v44 = vand.u32 4294901760, %v307_v2  ;;  %v8609_v15 = vpack.c.bf16 %v5492_v38, %v5478_v34  ;;  %v8610_v2 = vld [vmem:[#allocation10_spill] sm:$0xff]  ;;  %v8616_v34 = vpack.c.bf16 %v5578_v43, %v5573_v42  ;;  %v6039_v38 = vld [vmem:[#allocation2 + $0x168] sm:$0xff]  ;;  %v6055_v43 = vld [vmem:[#allocation2 + $0x170] sm:$0xff] }
  0xa1   :  { %8617 = vst [vmem:[#allocation9_spill] sm:$0xff] %v6039_v38  ;;  %v8345_v10 = vand.u32 4294901760, %v6039_v38  ;;  %v8621_v42 = vpack.c.bf16 %v5652_v12, %v5647_v41  ;;  %8622 = vst [vmem:[#allocation12_spill] sm:$0xff] %v6055_v43  ;;  %v8346_v12 = vand.u32 4294901760, %v6055_v43 }
  0xa2   :  { %303 = vmatprep.mubr.f32.mxu0 %v302_v50 }
  0xa3   :  { %4645 = vmatpush3.bf16.msra.mxu1 %v5663_v58  ;;  %309 = vmatmul.mubr.f32.vlgmr.msra.gmra.mrb[0].mxu0 %v308_v44  ;;  %v8611_v44 = vpack.c.bf16 %v5531_v3, %v5525_v0  ;;  %v8347_v0 = vand.u32 4294901760, %v6034_v25  ;;  %v6043_v3 = vld [vmem:[#allocation2 + $0x1f0] sm:$0xff]  ;;  %v6074_v41 = vsub.f32 %v6039_v38, %v8345_v10  ;;  %v8628_v10 = vand.u32 4294901760, %v5999_v13 }
  0xa4   :  { %4605 = vmatpush3.bf16.msra.mxu0 %v8605_v17  ;;  %676 = vmatprep.mubr.f32.mxu0 %v299_v23  ;;  %8618 = vst [vmem:[#allocation10_spill] sm:$0xff] %v6043_v3  ;;  %v6057_v17 = vld [vmem:[#allocation2 + $0x178] sm:$0xff]  ;;  %v8344_v23 = vand.u32 4294901760, %v6043_v3 }
  0xa5   :  { %4647 = vmatprep.subr.bf16.mxu1 %v8606_v51  ;;  %4607 = vmatprep.subr.bf16.mxu0 %v8607_v9  ;;  %v6045_v9 = vld [vmem:[#allocation2 + $0x1f8] sm:$0xff]  ;;  %8623 = vst [vmem:[#allocation22_spill] sm:$0xff] %v6057_v17  ;;  %v6065_v56 = vsub.f32 %v6034_v25, %v8347_v0 }
  0xa6   :  { %8619 = vst [vmem:[#allocation11_spill] sm:$0xff] %v6045_v9  ;;  %v8343_v50 = vand.u32 4294901760, %v6045_v9  ;;  %v6088_v55 = vsub.f32 %v6043_v3, %v8344_v23  ;;  %v6126_v23 = vld [vmem:[#allocation2 + $0x110] sm:$0xff]  ;;  %v6131_v0 = vld [vmem:[#allocation2 + $0x118] sm:$0xff] }
  0xa7   :  { %4649 = vmatpush3.bf16.msra.mxu1 %v8608_v36 }
  0xa8   :  { %4609 = vmatpush3.bf16.msra.mxu0 %v8609_v15  ;;  %4651 = vmatprep.subr.bf16.mxu1 %v8610_v2  ;;  %v8348_v15 = vand.u32 4294901760, %v6057_v17 }
  0xa9   :  { %4611 = vmatprep.subr.bf16.mxu0 %v8611_v44  ;;  %v8625_v44 = vpack.c.bf16 %v5706_v61, %v5700_v47  ;;  %v6097_v47 = vld [vmem:[#allocation2 + $0x100] sm:$0xff]  ;;  %v8626_v61 = vpack.c.bf16 %v5727_v53, %v5722_v28  ;;  %v8632_v53 = vpack.c.bf16 %v5787_v37, %v5784_v1  ;;  %v8635_v1 = vpack.c.bf16 %v5806_v52, %v5804_v32  ;;  %v6168_v37 = vld [vmem:[#allocation2 + $0x1a8] sm:$0xff] }
  0xaa   :  { %v6119_v28 = vsub.f32 %v6057_v17, %v8348_v15  ;;  %v8350_v15 = vand.u32 4294901760, %v6088_v55  ;;  %v8722_v49 = vand.u32 4294901760, %v6168_v37 }
  0xab   :  { %4653 = vmatpush3.bf16.msra.mxu1 %v8612_v20 }
  0xac   :  { %4613 = vmatpush3.bf16.msra.mxu0 %v8613_v21  ;;  %4655 = vmatprep.subr.bf16.mxu1 %v8614_v22  ;;  %v5377_v21 = vmov 3   ;;  %v8642_v32 = vand.u32 4294901760, %v6119_v28 }
  0xad   :  { %4615 = vmatprep.subr.bf16.mxu0 %v8616_v34  ;;  %5319 = vset.pattern.permute.xlu1 %v5377_v21  ;;  %v6081_v34 = vld [vmem:[#allocation2 + $0x180] sm:$0xff] }
  0xae   :  { %65 = vperm.xlu1 %5319, %v5438_v19   ;;  %5320 = vset.pattern.permute.xlu0 %v5377_v21  ;;  %v6114_v21 = vsub.f32 %v6055_v43, %v8346_v12  ;;  %v6304_v43 = vld [vmem:[#allocation2 + $0x138] sm:$0xff] }
  0xaf   :  { %4657 = vmatpush3.bf16.msra.mxu1 %v5825_v27 }
  0xb0   :  { %4617 = vmatpush3.bf16.msra.mxu0 %v8620_v31  ;;  %4659 = vmatprep.subr.bf16.mxu1 %v5836_v26  ;;  %v6093_v31 = vsub.f32 %v6045_v9, %v8343_v50  ;;  %v8349_v50 = vand.u32 4294901760, %v6065_v56 }
  0xb1   :  { %4619 = vmatprep.subr.bf16.mxu0 %v8621_v42  ;;  %v6103_v42 = vld [vmem:[#allocation2 + $0x108] sm:$0xff] }
  0xb2   :  { %v8633_v12 = vand.u32 4294901760, %v6093_v31 }
  0xb3   :  { %4661 = vmatpush3.bf16.msra.mxu1 %v5838_v30 }
  0xb4   :  { %4621 = vmatpush3.bf16.msra.mxu0 %v8624_v57  ;;  %4663 = vmatprep.subr.bf16.mxu1 %v5843_v62  ;;  %v6105_v57 = vld [vmem:[#allocation2 + $0x190] sm:$0xff] }
  0xb5   :  { %4623 = vmatprep.subr.bf16.mxu0 %v8625_v44  ;;  %v6107_v44 = vld [vmem:[#allocation2 + $0x198] sm:$0xff] }
  0xb7   :  { %4665 = vmatpush3.bf16.msra.mxu1 %v5845_v29 }
  0xb8   :  { %4625 = vmatpush3.bf16.msra.mxu0 %v8626_v61  ;;  %4699 = vmatprep.subr.bf16.mxu1 %v5516_v59  ;;  %v8627_v59 = vpack.c.bf16 %v5770_v18, %v5767_v60  ;;  %v8629_v18 = vand.u32 4294901760, %v6074_v41  ;;  %v8638_v61 = vand.u32 4294901760, %v6083_v40 }
  0xba   :  { %4627 = vmatprep.subr.bf16.mxu0 %v8627_v59  ;;  %787 = vmatmul.mubr.f32.vlgmr.msra.gmra.mrb[2].mxu1 %v8628_v10  ;;  %v6139_v60 = vpack.c.bf16 %v8629_v18, %v8349_v50  ;;  %v8631_v59 = vmov 1.0   ;;  %v8351_v50 = vand.u32 4294901760, %v6114_v21  ;;  %v6162_v10 = vpack.c.bf16 %v8633_v12, %v8350_v15 }
  0xbb   :  { %4701 = vmatpush3.bf16.msra.mxu1 %v5539_v5  ;;  %3678 = vmatprep.mubr.msk.f32.mxu1 %vm41_vm3, %v8631_v59  ;;  %v6154_v5 = vld [vmem:[#allocation2 + $0x1a0] sm:$0xff]  ;;  %v6178_v19 = vsub.f32 %v6083_v40, %v8638_v61  ;;  %v8640_v12 = vand.u32 4294901760, %v6097_v47  ;;  %v8646_v61 = vand.u32 4294901760, %v6105_v57 }
  0xbc   :  { %8630 = vst [vmem:[#allocation23_spill] sm:$0xff] %v6139_v60  ;;  %4629 = vmatpush3.bf16.msra.mxu0 %v8632_v53  ;;  %4703 = vmatprep.subr.bf16.mxu1 %v5564_v11  ;;  %8634 = vst [vmem:[#allocation24_spill] sm:$0xff] %v6162_v10  ;;  %v8636_v53 = vand.u32 4294901760, %v6081_v34  ;;  %v6189_v52 = vpack.c.bf16 %v8642_v32, %v8351_v50  ;;  %v6224_v32 = vld [vmem:[#allocation2 + $0x120] sm:$0xff] }
  0xbd   :  { %4631 = vmatprep.subr.bf16.mxu0 %v8635_v1  ;;  %8639 = vst [vmem:[#allocation26_spill] sm:$0xff] %v6178_v19  ;;  %v6183_v15 = vsub.f32 %v6097_v47, %v8640_v12  ;;  %v8644_v1 = vand.u32 4294901760, %v6103_v42  ;;  %v6200_v11 = vsub.f32 %v6105_v57, %v8646_v61  ;;  %v8648_v12 = vand.u32 4294901760, %v6107_v44 }
  0xbe   :  { %v6173_v18 = vsub.f32 %v6081_v34, %v8636_v53  ;;  %8643 = vst [vmem:[#allocation28_spill] sm:$0xff] %v6189_v52 }
  0xbf   :  { %8641 = vst [vmem:[#allocation27_spill] sm:$0xff] %v6183_v15  ;;  %4705 = vmatpush3.bf16.msra.mxu1 %v5619_v8  ;;  %v6195_v53 = vsub.f32 %v6103_v42, %v8644_v1  ;;  %8647 = vst [vmem:[#allocation30_spill] sm:$0xff] %v6200_v11  ;;  %v6205_v10 = vsub.f32 %v6107_v44, %v8648_v12  ;;  %v8650_v8 = vpack.c.bf16 %v5819_v45, %v5817_v63 }
  0xc0   :  { %8637 = vst [vmem:[#allocation25_spill] sm:$0xff] %v6173_v18  ;;  %4707 = vmatprep.subr.bf16.mxu1 %v5640_v46  ;;  %v8651_v1 = vand.u32 4294901760, %v6126_v23  ;;  %v8653_v12 = vand.u32 4294901760, %v6131_v0  ;;  %v8352_v45 = vand.u32 4294901760, %v6173_v18  ;;  %v8353_v46 = vand.u32 4294901760, %v6178_v19 }
  0xc1   :  { %8645 = vst [vmem:[#allocation29_spill] sm:$0xff] %v6195_v53  ;;  %8649 = vst [vmem:[#allocation31_spill] sm:$0xff] %v6205_v10  ;;  %4633 = vmatpush3.bf16.msra.mxu0 %v8650_v8  ;;  %v8356_v63 = vand.u32 4294901760, %v6183_v15 }
  0xc2   :  { %v6215_v50 = vsub.f32 %v6126_v23, %v8651_v1  ;;  %4667 = vmatprep.subr.bf16.mxu0 %v5887_v54  ;;  %v6222_v52 = vsub.f32 %v6131_v0, %v8653_v12  ;;  %v8655_v12 = vand.u32 4294901760, %v6154_v5  ;;  %v1292_v8 = vsub.f32 %v6173_v18, %v8352_v45  ;;  %v6265_v1 = vld [vmem:[#allocation2 + $0x1b0] sm:$0xff] }
  0xc3   :  { %4709 = vmatpush3.bf16.msra.mxu1 %v5663_v58  ;;  %v1299_v58 = vsub.f32 %v6178_v19, %v8353_v46  ;;  %v8660_v45 = vand.u32 4294901760, %v6200_v11  ;;  %v8661_v46 = vand.u32 4294901760, %v6205_v10 }
  0xc4   :  { %8652 = vst [vmem:[#allocation32_spill] sm:$0xff] %v6215_v50  ;;  %8654 = vst [vmem:[#allocation33_spill] sm:$0xff] %v6222_v52  ;;  %679 = vmatmul.mubr.f32.vlgmr.msra.gmra.mrb[2].mxu0 %v5999_v13  ;;  %v6237_v61 = vsub.f32 %v6154_v5, %v8655_v12  ;;  %v8657_v13 = vand.u32 4294901760, %v6168_v37  ;;  %4711 = vmatprep.subr.bf16.mxu1 %v8606_v51  ;;  %v6254_v12 = vld [vmem:[#allocation2 + $0x128] sm:$0xff]  ;;  %v6267_v51 = vld [vmem:[#allocation2 + $0x1b8] sm:$0xff] }
  0xc5   :  { %4669 = vmatpush3.bf16.msra.mxu0 %v5893_v4  ;;  %3676 = vmatprep.mubr.msk.f32.mxu0 %vm41_vm3, %v8631_v59  ;;  %v1306_v60 = vsub.f32 %v6200_v11, %v8660_v45  ;;  %v1313_v19 = vsub.f32 %v6205_v10, %v8661_v46  ;;  %v8663_v45 = vand.u32 4294901760, %v6224_v32  ;;  %v8665_v46 = vand.u32 4294901760, %v6222_v52  ;;  %v6298_v10 = vld [vmem:[#allocation2 + $0x130] sm:$0xff] }
  0xc6   :  { %8656 = vst [vmem:[#allocation34_spill] sm:$0xff] %v6237_v61  ;;  %v6248_v54 = vsub.f32 %v6168_v37, %v8657_v13  ;;  %4671 = vmatprep.subr.bf16.mxu0 %v5899_v48  ;;  %v1180_v13 = vsub.f32 %v6183_v15, %v8356_v63  ;;  %v8659_v48 = vand.u32 4294901760, %v6195_v53  ;;  %v8376_v63 = vand.u32 4294901760, %v6267_v51 }
  0xc7   :  { %4713 = vmatpush3.bf16.msra.mxu1 %v8608_v36  ;;  %v8662_v36 = vand.u32 4294901760, %v6215_v50  ;;  %v6290_v11 = vsub.f32 %v6224_v32, %v8663_v45  ;;  %v1307_v45 = vand.u32 4294901760, %v1306_v60  ;;  %v1314_v18 = vand.u32 4294901760, %v1313_v19 }
  0xc8   :  { %8658 = vst [vmem:[#allocation35_spill] sm:$0xff] %v6248_v54  ;;  %v1187_v4 = vsub.f32 %v6195_v53, %v8659_v48  ;;  %4715 = vmatprep.subr.bf16.mxu1 %v8610_v2  ;;  %v8371_v2 = vand.u32 4294901760, %v6265_v1  ;;  %v1181_v48 = vand.u32 4294901760, %v1180_v13  ;;  %v8668_v19 = vand.u32 4294901760, %v6254_v12  ;;  %v6319_v13 = vpop.permute.xlu0 %47 }
  0xc9   :  { %4673 = vmatpush3.bf16.msra.mxu0 %v5905_v16  ;;  %v1194_v15 = vsub.f32 %v6215_v50, %v8662_v36  ;;  %8664 = vst [vmem:[#allocation36_spill] sm:$0xff] %v6290_v11  ;;  %v1201_v16 = vsub.f32 %v6222_v52, %v8665_v46  ;;  %v1293_v36 = vand.u32 4294901760, %v1292_v8  ;;  %v1300_v50 = vand.u32 4294901760, %v1299_v58  ;;  %v6306_v46 = vld [vmem:[#allocation2 + $0x1c0] sm:$0xff] }
  0xca   :  { %4675 = vmatprep.subr.bf16.mxu0 %v5911_v7  ;;  %v1188_v53 = vand.u32 4294901760, %v1187_v4  ;;  %v8666_v7 = vand.u32 4294901760, %v6237_v61  ;;  %v8667_v58 = vand.u32 4294901760, %v6248_v54  ;;  %v6317_v4 = vsub.f32 %v6254_v12, %v8668_v19 }
  0xcb   :  { %4717 = vmatpush3.bf16.msra.mxu1 %v8612_v20  ;;  %v1195_v8 = vand.u32 4294901760, %v1194_v15  ;;  %v8377_v15 = vand.u32 4294901760, %v6298_v10  ;;  %v4762_v19 = vpack.c.bf16 %v1300_v50, %v1293_v36  ;;  %v8378_v60 = vand.u32 4294901760, %v6304_v43 }
  0xcc   :  { %v1320_v17 = vsub.f32 %v6237_v61, %v8666_v7  ;;  %4719 = vmatprep.subr.bf16.mxu1 %v8614_v22  ;;  %v1327_v20 = vsub.f32 %v6248_v54, %v8667_v58  ;;  %8669 = vst [vmem:[#allocation37_spill] sm:$0xff] %v6317_v4  ;;  %v1202_v7 = vand.u32 4294901760, %v1201_v16  ;;  %v6330_v22 = vsub.f32 %v6267_v51, %v8376_v63  ;;  %v6333_v58 = vld [vmem:[#allocation2 + $0x1c8] sm:$0xff]  ;;  %v6342_v61 = vld [vmem:[#allocation2 + $0x140] sm:$0xff] }
  0xcd   :  { %4677 = vmatpush3.bf16.msra.mxu0 %v5917_v35  ;;  %v6325_v35 = vsub.f32 %v6265_v1, %v8371_v2  ;;  %v6338_v16 = vpack.c.bf16 %v1188_v53, %v1181_v48  ;;  %v6340_v2 = vpack.c.bf16 %v1314_v18, %v1307_v45  ;;  %vm50_vm4 = vcmp.eq.s32.totalorder %v5979_v24, %v6319_v13  ;;  %v6357_v53 = vld [vmem:[#allocation2 + $0x1d0] sm:$0xff]  ;;  %v6359_v48 = vld [vmem:[#allocation2 + $0x1d8] sm:$0xff] }
  0xce   :  { %4679 = vmatprep.subr.bf16.mxu0 %v5923_v33  ;;  %8671 = vst [vmem:[#allocation39_spill] sm:$0xff] %v6330_v22  ;;  %v1321_v54 = vand.u32 4294901760, %v1320_v17  ;;  %v1328_v50 = vand.u32 4294901760, %v1327_v20  ;;  %v8672_v36 = vand.u32 4294901760, %v6290_v11  ;;  %v6355_v17 = vld [vmem:[#allocation2 + $0x148] sm:$0xff]  ;;  %8673 = vst [vmem:[#allocation40_spill] sm:$0xff] %v6357_v53  ;;  %vm49_vm5 = vcmp.eq.s32.totalorder %v5976_v39, %v6319_v13 }
  0xcf   :  { %8670 = vst [vmem:[#allocation38_spill] sm:$0xff] %v6325_v35  ;;  %4721 = vmatpush3.bf16.msra.mxu1 %v5825_v27  ;;  %v8674_v45 = vld [vmem:[#allocation13_spill] sm:$0xff]  ;;  %v8676_v18 = vand.u32 4294901760, %v6081_v34  ;;  %v8677_v27 = vand.u32 4294901760, %v6083_v40  ;;  %v8681_v20 = vmov 0.0   ;;  %v8684_v40 = vand.u32 4294901760, %v6333_v58 }
  0xd0   :  { %4723 = vmatprep.subr.bf16.mxu1 %v5836_v26  ;;  %v6351_v63 = vsub.f32 %v6290_v11, %v8672_v36  ;;  %v6369_v36 = vsub.f32 %v6298_v10, %v8377_v15  ;;  %v3669_v15 = vsel %vm50_vm4, 1.0, %v8681_v20  ;;  %v6398_v26 = vld [vmem:[#allocation2 + $0x158] sm:$0xff]  ;;  %v4770_v11 = vpack.c.bf16 %v1328_v50, %v1321_v54  ;;  %v6419_v50 = vld [vmem:[#allocation2 + $0x1e0] sm:$0xff] }
  0xd1   :  { %4681 = vmatpush3.bf16.msra.mxu0 %v5929_v14  ;;  %v6362_v14 = vpack.c.bf16 %v1202_v7, %v1195_v8  ;;  %v6375_v33 = vpack.c.bf16 %v8677_v27, %v8676_v18  ;;  %v6380_v8 = vsub.f32 %v6304_v43, %v8378_v60  ;;  %v8679_v7 = vand.u32 4294901760, %v6306_v46  ;;  %v6396_v60 = vld [vmem:[#allocation2 + $0x150] sm:$0xff]  ;;  %v8686_v18 = vld [vmem:[#allocation15_spill] sm:$0xff]  ;;  %v6731_v39 = vld [vmem:[#allocation2 + $0x278] sm:$0xff] }
  0xd2   :  { %4683 = vmatprep.subr.bf16.mxu0 %v8674_v45  ;;  %8675 = vst [vmem:[#allocation13_spill] sm:$0xff] %v6369_v36  ;;  %v1209_v52 = vand.u32 4294901760, %v6351_v63  ;;  %v6409_v27 = vsub.f32 %v6333_v58, %v8684_v40  ;;  %v8687_v9 = vand.u32 4294901760, %v6325_v35  ;;  %8689 = vst [vmem:[#allocation15_spill] sm:$0xff] %v6419_v50  ;;  %v8692_v40 = vand.u32 4294901760, %v6357_v53 }
  0xd3   :  { %8678 = vst [vmem:[#allocation41_spill] sm:$0xff] %v6380_v8  ;;  %v6385_v45 = vsub.f32 %v6306_v46, %v8679_v7  ;;  %4725 = vmatpush3.bf16.msra.mxu1 %v5838_v30  ;;  %v8682_v7 = vld [vmem:[#allocation14_spill] sm:$0xff]  ;;  %v8683_v30 = vand.u32 4294901760, %v6317_v4  ;;  %v8693_v3 = vand.u32 4294901760, %v6359_v48  ;;  %v8695_v20 = vand.u32 4294901760, %v6369_v36 }
  0xd4   :  { %4727 = vmatprep.subr.bf16.mxu1 %v5843_v62  ;;  %8685 = vst [vmem:[#allocation14_spill] sm:$0xff] %v6409_v27  ;;  %v8688_v62 = vand.u32 4294901760, %v6330_v22  ;;  %v8726_v37 = vand.u32 4294901760, %v6074_v41 }
  0xd5   :  { %8680 = vst [vmem:[#allocation42_spill] sm:$0xff] %v6385_v45  ;;  %4685 = vmatpush3.bf16.msra.mxu0 %v8682_v7  ;;  %v1215_v34 = vsub.f32 %v6317_v4, %v8683_v30  ;;  %v1334_v7 = vsub.f32 %v6325_v35, %v8687_v9  ;;  %v6421_v30 = vld [vmem:[#allocation2 + $0x1e8] sm:$0xff]  ;;  %v6423_v4 = vsub.f32 %v3669_v15, %v3669_v15  ;;  %v8398_v35 = vand.u32 4294901760, %v6409_v27 }
  0xd6   :  { %4687 = vmatprep.subr.bf16.mxu0 %v8686_v18  ;;  %v1341_v54 = vsub.f32 %v6330_v22, %v8688_v62  ;;  %v8690_v62 = vand.u32 4294901760, %v6342_v61  ;;  %v8691_v22 = vand.u32 4294901760, %v6355_v17  ;;  %v6443_v18 = vsub.f32 %v6357_v53, %v8692_v40 }
  0xd7   :  { %4729 = vmatpush3.bf16.msra.mxu1 %v5845_v29  ;;  %v6448_v9 = vsub.f32 %v6359_v48, %v8693_v3  ;;  %v8694_v29 = vld [vmem:[#allocation16_spill] sm:$0xff]  ;;  %v1335_v25 = vand.u32 4294901760, %v1334_v7  ;;  %v1222_v53 = vsub.f32 %v6369_v36, %v8695_v20  ;;  %v8698_v7 = vand.u32 4294901760, %v6396_v60 }
  0xd8   :  { %v6433_v63 = vsub.f32 %v6342_v61, %v8690_v62  ;;  %v6438_v15 = vsub.f32 %v6355_v17, %v8691_v22  ;;  %4763 = vmatprep.subr.bf16.mxu1 %v4762_v19  ;;  %v1216_v62 = vand.u32 4294901760, %v1215_v34  ;;  %v1342_v40 = vand.u32 4294901760, %v1341_v54  ;;  %v8705_v22 = vld [vmem:[#allocation18_spill] sm:$0xff] }
  0xd9   :  { %4689 = vmatpush3.bf16.msra.mxu0 %v8694_v29  ;;  %v8696_v19 = vand.u32 4294901760, %v6380_v8  ;;  %v8697_v29 = vand.u32 4294901760, %v6385_v45  ;;  %v6472_v54 = vsub.f32 %v6396_v60, %v8698_v7  ;;  %v8699_v20 = vand.u32 4294901760, %v6398_v26  ;;  %v8700_v7 = vld [vmem:[#allocation17_spill] sm:$0xff] }
  0xda   :  { %4691 = vmatprep.subr.bf16.mxu0 %v5960_v6  ;;  %3679 = vmatmul.mubr.msk.f32.vlgmr.msra.gmra.mrb[4].mxu1 %vm40_vm2, %v8631_v59  ;;  %v4772_v24 = vpack.c.bf16 %v1216_v62, %v1209_v52  ;;  %v8709_v52 = vand.u32 4294901760, %v6433_v63  ;;  %v8711_v62 = vand.u32 4294901760, %v6443_v18 }
  0xdb   :  { %v1229_v34 = vsub.f32 %v6380_v8, %v8696_v19  ;;  %v1348_v6 = vsub.f32 %v6385_v45, %v8697_v29  ;;  %v6477_v3 = vsub.f32 %v6398_v26, %v8699_v20  ;;  %4765 = vmatpush3.bf16.msra.mxu1 %v6338_v16  ;;  %3680 = vmatprep.mubr.msk.f32.mxu1 %vm50_vm4, %v8631_v59  ;;  %v8701_v20 = vand.u32 4294901760, %v6419_v50 }
  0xdc   :  { %4767 = vmatprep.subr.bf16.mxu1 %v6340_v2  ;;  %v1355_v16 = vsub.f32 %v6409_v27, %v8398_v35  ;;  %v8703_v29 = vand.u32 4294901760, %v6421_v30  ;;  %v8707_v2 = vand.u32 4294901760, %v6103_v42  ;;  %v1223_v35 = vand.u32 4294901760, %v1222_v53 }
  0xdd   :  { %4693 = vmatpush3.bf16.msra.mxu0 %v8700_v7  ;;  %v6496_v19 = vsub.f32 %v6419_v50, %v8701_v20  ;;  %v8706_v7 = vand.u32 4294901760, %v6097_v47  ;;  %v8708_v27 = vand.u32 4294901760, %v6423_v4  ;;  %v4774_v8 = vpack.c.bf16 %v1342_v40, %v1335_v25  ;;  %v8713_v40 = vld [vmem:[#allocation19_spill] sm:$0xff] }
  0xde   :  { %v6501_v38 = vsub.f32 %v6421_v30, %v8703_v29  ;;  %4695 = vmatprep.subr.bf16.mxu0 %v8705_v22  ;;  %v1230_v36 = vand.u32 4294901760, %v1229_v34  ;;  %v1236_v47 = vsub.f32 %v6433_v63, %v8709_v52  ;;  %v8710_v42 = vand.u32 4294901760, %v6438_v15 }
  0xdf   :  { %8702 = vst [vmem:[#allocation16_spill] sm:$0xff] %v6496_v19  ;;  %v6508_v45 = vpack.c.bf16 %v8707_v2, %v8706_v7  ;;  %v1163_v20 = vsub.f32 %v6423_v4, %v8708_v27  ;;  %4769 = vmatpush3.bf16.msra.mxu1 %v6362_v14  ;;  %v1362_v27 = vsub.f32 %v6443_v18, %v8711_v62  ;;  %v8712_v25 = vand.u32 4294901760, %v6448_v9 }
  0xe0   :  { %8704 = vst [vmem:[#allocation17_spill] sm:$0xff] %v6501_v38  ;;  %v1243_v53 = vsub.f32 %v6438_v15, %v8710_v42  ;;  %4771 = vmatprep.subr.bf16.mxu1 %v4770_v11  ;;  %v1349_v14 = vand.u32 4294901760, %v1348_v6  ;;  %v1356_v34 = vand.u32 4294901760, %v1355_v16  ;;  %v8406_v7 = vand.u32 4294901760, %v6496_v19 }
  0xe1   :  { %v1369_v22 = vsub.f32 %v6448_v9, %v8712_v25  ;;  %4697 = vmatpush3.bf16.msra.mxu0 %v8713_v40  ;;  %v8714_v52 = vand.u32 4294901760, %v6105_v57  ;;  %v8715_v42 = vand.u32 4294901760, %v6107_v44  ;;  %v1164_v29 = vand.u32 4294901760, %v1163_v20 }
  0xe2   :  { %4731 = vmatprep.subr.bf16.mxu0 %v6375_v33  ;;  %v4776_v50 = vpack.c.bf16 %v1230_v36, %v1223_v35  ;;  %v8716_v25 = vand.u32 4294901760, %v6126_v23  ;;  %v8717_v11 = vand.u32 4294901760, %v6131_v0  ;;  %v8718_v16 = vand.u32 4294901760, %v6472_v54 }
  0xe3   :  { %v6536_v62 = vpack.c.bf16 %v8715_v42, %v8714_v52  ;;  %v8719_v2 = vand.u32 4294901760, %v6477_v3  ;;  %4773 = vmatpush3.bf16.msra.mxu1 %v4772_v24  ;;  %v1237_v44 = vand.u32 4294901760, %v1236_v47  ;;  %v1244_v23 = vand.u32 4294901760, %v1243_v53 }
  0xe4   :  { %v6542_v6 = vpack.c.bf16 %v8717_v11, %v8716_v25  ;;  %v1250_v40 = vsub.f32 %v6472_v54, %v8718_v16  ;;  %3677 = vmatmul.mubr.msk.f32.vlgmr.msra.gmra.mrb[4].mxu0 %vm40_vm2, %v8631_v59  ;;  %v1363_v35 = vand.u32 4294901760, %v1362_v27  ;;  %v1370_v0 = vand.u32 4294901760, %v1369_v22  ;;  %4775 = vmatprep.subr.bf16.mxu1 %v4774_v8 }
  0xe5   :  { %v1257_v57 = vsub.f32 %v6477_v3, %v8719_v2  ;;  %4733 = vmatpush3.bf16.msra.mxu0 %v6508_v45  ;;  %v4778_v36 = vpack.c.bf16 %v1356_v34, %v1349_v14  ;;  %v1376_v20 = vsub.f32 %v6496_v19, %v8406_v7  ;;  %v8720_v2 = vand.u32 4294901760, %v6501_v38  ;;  %1165 = vmatprep.mubr.f32.mxu0 %v1164_v29 }
  0xe6   :  { %4735 = vmatprep.subr.bf16.mxu0 %v6536_v62  ;;  %v8721_v24 = vand.u32 4294901760, %v6154_v5  ;;  %v8723_v8 = vand.u32 4294901760, %v6224_v32  ;;  %v8724_v53 = vand.u32 4294901760, %v6254_v12  ;;  %v1251_v22 = vand.u32 4294901760, %v1250_v40 }
  0xe7   :  { %v1383_v52 = vsub.f32 %v6501_v38, %v8720_v2  ;;  %v1258_v14 = vand.u32 4294901760, %v1257_v57  ;;  %4777 = vmatpush3.bf16.msra.mxu1 %v4776_v50  ;;  %v4780_v34 = vpack.c.bf16 %v1244_v23, %v1237_v44  ;;  %v4782_v42 = vpack.c.bf16 %v1370_v0, %v1363_v35 }
  0xe8   :  { %v6566_v47 = vpack.c.bf16 %v8722_v49, %v8721_v24  ;;  %v6572_v27 = vpack.c.bf16 %v8724_v53, %v8723_v8  ;;  %v8725_v25 = vand.u32 4294901760, %v6065_v56  ;;  %v1271_v11 = vsub.f32 %v6074_v41, %v8726_v37  ;;  %4779 = vmatprep.subr.bf16.mxu1 %v4778_v36 }
  0xe9   :  { %4737 = vmatpush3.bf16.msra.mxu0 %v6542_v6  ;;  %v1377_v32 = vand.u32 4294901760, %v1376_v20  ;;  %v1384_v12 = vand.u32 4294901760, %v1383_v52  ;;  %v8727_v29 = vand.u32 4294901760, %v6088_v55  ;;  %v8728_v50 = vand.u32 4294901760, %v6093_v31 }
  0xea   :  { %v1264_v5 = vsub.f32 %v6065_v56, %v8725_v25  ;;  %4739 = vmatprep.subr.bf16.mxu0 %v6566_v47  ;;  %v8729_v57 = vand.u32 4294901760, %v6265_v1  ;;  %v8730_v44 = vand.u32 4294901760, %v6267_v51  ;;  %v4784_v35 = vpack.c.bf16 %v1258_v14, %v1251_v22 }
  0xeb   :  { %v1390_v16 = vsub.f32 %v6088_v55, %v8727_v29  ;;  %v1397_v40 = vsub.f32 %v6093_v31, %v8728_v50  ;;  %4781 = vmatpush3.bf16.msra.mxu1 %v4780_v34  ;;  %v1272_v36 = vand.u32 4294901760, %v1271_v11  ;;  %v8731_v20 = vand.u32 4294901760, %v6114_v21 }
  0xec   :  { %v6592_v23 = vpack.c.bf16 %v8730_v44, %v8729_v57  ;;  %v1265_v0 = vand.u32 4294901760, %v1264_v5  ;;  %v8732_v52 = vand.u32 4294901760, %v6119_v28  ;;  %4783 = vmatprep.subr.bf16.mxu1 %v4782_v42  ;;  %v8733_v1 = vand.u32 4294901760, %v6298_v10 }
  0xed   :  { %v1278_v2 = vsub.f32 %v6114_v21, %v8731_v20  ;;  %4741 = vmatpush3.bf16.msra.mxu0 %v6572_v27  ;;  %v8734_v51 = vand.u32 4294901760, %v6304_v43  ;;  %v4786_v8 = vpack.c.bf16 %v1384_v12, %v1377_v32  ;;  %v1391_v53 = vand.u32 4294901760, %v1390_v16 }
  0xee   :  { %v1285_v24 = vsub.f32 %v6119_v28, %v8732_v52  ;;  %v1398_v22 = vand.u32 4294901760, %v1397_v40  ;;  %4743 = vmatprep.subr.bf16.mxu0 %v6592_v23  ;;  %v8735_v14 = vand.u32 4294901760, %v6306_v46  ;;  %v8736_v34 = vand.u32 4294901760, %v6333_v58  ;;  %v8739_v58 = vld [vmem:[#allocation40_spill] sm:$0xff] }
  0xef   :  { %v6605_v49 = vpack.c.bf16 %v8734_v51, %v8733_v1  ;;  %4785 = vmatpush3.bf16.msra.mxu1 %v4784_v35  ;;  %v4788_v5 = vpack.c.bf16 %v1272_v36, %v1265_v0  ;;  %v1279_v10 = vand.u32 4294901760, %v1278_v2  ;;  %v8737_v42 = vand.u32 4294901760, %v6342_v61  ;;  %v8755_v1 = vld [vmem:[#allocation10_spill] sm:$0xff] }
  0xf0   :  { %v6612_v25 = vpack.c.bf16 %v8736_v34, %v8735_v14  ;;  %v1286_v43 = vand.u32 4294901760, %v1285_v24  ;;  %4787 = vmatprep.subr.bf16.mxu1 %v4786_v8  ;;  %v8738_v37 = vand.u32 4294901760, %v6355_v17  ;;  %v4790_v46 = vpack.c.bf16 %v1398_v22, %v1391_v53  ;;  %v8761_v14 = vld [vmem:[#allocation12_spill] sm:$0xff] }
  0xf1   :  { %4745 = vmatpush3.bf16.msra.mxu0 %v6605_v49  ;;  %v8740_v32 = vand.u32 4294901760, %v8739_v58  ;;  %v8741_v12 = vand.u32 4294901760, %v6359_v48  ;;  %v8742_v16 = vmov 0.0   ;;  %v8743_v17 = vand.u32 4294901760, %v6396_v60  ;;  %v8746_v48 = vld [vmem:[#allocation15_spill] sm:$0xff]  ;;  %v8750_v60 = vld [vmem:[#allocation8_spill] sm:$0xff] }
  0xf2   :  { %v6621_v11 = vpack.c.bf16 %v8738_v37, %v8737_v42  ;;  %4747 = vmatprep.subr.bf16.mxu0 %v6612_v25  ;;  %v3668_v50 = vsel %vm49_vm5, 1.0, %v8742_v16  ;;  %v4792_v61 = vpack.c.bf16 %v1286_v43, %v1279_v10  ;;  %v8744_v40 = vand.u32 4294901760, %v6398_v26  ;;  %v8752_v26 = vld [vmem:[#allocation9_spill] sm:$0xff]  ;;  %v6770_v16 = vld [vmem:[#allocation2 + $0x200] sm:$0xff] }
  0xf3   :  { %v6628_v29 = vpack.c.bf16 %v8741_v12, %v8740_v32  ;;  %4789 = vmatpush3.bf16.msra.mxu1 %v4788_v5  ;;  %v6641_v44 = vsub.f32 %v3668_v50, %v3668_v50  ;;  %v8747_v35 = vand.u32 4294901760, %v8746_v48  ;;  %v8748_v0 = vand.u32 4294901760, %v6421_v30  ;;  %v8757_v30 = vld [vmem:[#allocation11_spill] sm:$0xff]  ;;  %v8763_v5 = vld [vmem:[#allocation22_spill] sm:$0xff]  ;;  %v8766_v37 = vld [vmem:[#allocation25_spill] sm:$0xff] }
  0xf4   :  { %4791 = vmatprep.subr.bf16.mxu1 %v4790_v46  ;;  %v6639_v57 = vpack.c.bf16 %v8744_v40, %v8743_v17  ;;  %v8751_v20 = vand.u32 4294901760, %v8750_v60  ;;  %v8753_v2 = vand.u32 4294901760, %v8752_v26  ;;  %v8756_v51 = vand.u32 4294901760, %v8755_v1  ;;  %v8767_v46 = vld [vmem:[#allocation26_spill] sm:$0xff]  ;;  %v8768_v32 = vld [vmem:[#allocation27_spill] sm:$0xff]  ;;  %v8769_v12 = vld [vmem:[#allocation29_spill] sm:$0xff] }
  0xf5   :  { %4749 = vmatpush3.bf16.msra.mxu0 %v6621_v11  ;;  %v6648_v36 = vpack.c.bf16 %v8748_v0, %v8747_v35  ;;  %v8407_v24 = vand.u32 4294901760, %v6641_v44  ;;  %v8758_v8 = vand.u32 4294901760, %v8757_v30  ;;  %v8760_v22 = vand.u32 4294901760, %v6423_v4  ;;  %v8770_v17 = vld [vmem:[#allocation30_spill] sm:$0xff]  ;;  %v8771_v40 = vld [vmem:[#allocation31_spill] sm:$0xff]  ;;  %v8772_v35 = vld [vmem:[#allocation32_spill] sm:$0xff] }
  0xf6   :  { %8745 = vst [vmem:[#allocation18_spill] sm:$0xff] %v6639_v57  ;;  %4751 = vmatprep.subr.bf16.mxu0 %v6628_v29  ;;  %v6656_v52 = vpack.c.bf16 %v8753_v2, %v8751_v20  ;;  %v8762_v34 = vand.u32 4294901760, %v8761_v14  ;;  %v8764_v10 = vand.u32 4294901760, %v8763_v5  ;;  %v4794_v58 = vpack.c.bf16 %v8767_v46, %v8766_v37  ;;  %v8773_v0 = vld [vmem:[#allocation33_spill] sm:$0xff]  ;;  %v8774_v20 = vld [vmem:[#allocation34_spill] sm:$0xff]  ;;  %v8775_v26 = vld [vmem:[#allocation35_spill] sm:$0xff] }
  0xf7   :  { %8749 = vst [vmem:[#allocation19_spill] sm:$0xff] %v6648_v36  ;;  %4793 = vmatpush3.bf16.msra.mxu1 %v4792_v61  ;;  %v6664_v53 = vpack.c.bf16 %v8758_v8, %v8756_v51  ;;  %v1169_v42 = vsub.f32 %v6641_v44, %v8407_v24  ;;  %v4796_v50 = vpack.c.bf16 %v8769_v12, %v8768_v32  ;;  %v8776_v1 = vld [vmem:[#allocation36_spill] sm:$0xff]  ;;  %v8777_v51 = vld [vmem:[#allocation37_spill] sm:$0xff]  ;;  %v8778_v8 = vld [vmem:[#allocation38_spill] sm:$0xff] }
  0xf8   :  { %4827 = vmatprep.subr.bf16.mxu1 %v6375_v33  ;;  %8754 = vst [vmem:[#allocation40_spill] sm:$0xff] %v6656_v52  ;;  %v6679_v43 = vpack.c.bf16 %v8764_v10, %v8762_v34  ;;  %v4798_v48 = vpack.c.bf16 %v8771_v40, %v8770_v17  ;;  %v4800_v60 = vpack.c.bf16 %v8773_v0, %v8772_v35  ;;  %v8780_v14 = vld [vmem:[#allocation13_spill] sm:$0xff]  ;;  %v8782_v10 = vld [vmem:[#allocation42_spill] sm:$0xff]  ;;  %8789 = vst [vmem:[#allocation25_spill] sm:$0xff] %v6731_v39 }
  0xf9   :  { %4753 = vmatpush3.bf16.msra.mxu0 %v6639_v57  ;;  %8759 = vst [vmem:[#allocation15_spill] sm:$0xff] %v6664_v53  ;;  %v1170_v61 = vand.u32 4294901760, %v1169_v42  ;;  %v4802_v2 = vpack.c.bf16 %v8775_v26, %v8774_v20  ;;  %v4804_v30 = vpack.c.bf16 %v8777_v51, %v8776_v1  ;;  %v8781_v34 = vld [vmem:[#allocation41_spill] sm:$0xff]  ;;  %v8783_v42 = vld [vmem:[#allocation14_spill] sm:$0xff]  ;;  %v4814_v7 = vpack.c.bf16 %v6448_v9, %v6443_v18 }
  0xfa   :  { %4755 = vmatprep.subr.bf16.mxu0 %v6648_v36  ;;  %3681 = vmatmul.mubr.msk.f32.vlgmr.msra.gmra.mrb[6].mxu1 %vm49_vm5, %v8631_v59  ;;  %8765 = vst [vmem:[#allocation8_spill] sm:$0xff] %v6679_v43  ;;  %v4808_v5 = vpack.c.bf16 %v8781_v34, %v8780_v14  ;;  %v6729_v24 = vld [vmem:[#allocation2 + $0x270] sm:$0xff] }
  0xfb   :  { %4829 = vmatpush3.bf16.msra.mxu1 %v6508_v45  ;;  %1645 = vmatprep.mubr.f32.mxu1 %v8760_v22  ;;  %8788 = vst [vmem:[#allocation22_spill] sm:$0xff] %v6729_v24 }
  0xfc   :  { %4831 = vmatprep.subr.bf16.mxu1 %v6536_v62 }
  0xfd   :  { %4757 = vmatpush3.bf16.msra.mxu0 %v6656_v52 }
  0xfe   :  { %4759 = vmatprep.subr.bf16.mxu0 %v6664_v53 }
  0xff   :  { %4833 = vmatpush3.bf16.msra.mxu1 %v6542_v6 }
 0x100   :  { %4835 = vmatprep.subr.bf16.mxu1 %v6566_v47 }
 0x101   :  { %4761 = vmatpush3.bf16.msra.mxu0 %v6679_v43 }
 0x102   :  { %4795 = vmatprep.subr.bf16.mxu0 %v4794_v58  ;;  %v4810_v58 = vpack.c.bf16 %v8783_v42, %v8782_v10 }
 0x103   :  { %4837 = vmatpush3.bf16.msra.mxu1 %v6572_v27 }
 0x104   :  { %1171 = vmatmul.mubr.f32.vlgmr.msra.gmra.mrb[6].mxu0 %v1170_v61  ;;  %4839 = vmatprep.subr.bf16.mxu1 %v6592_v23  ;;  %v6715_v61 = vld [vmem:[#allocation2 + $0x268] sm:$0xff] }
 0x105   :  { %4797 = vmatpush3.bf16.msra.mxu0 %v4796_v50  ;;  %1538 = vmatprep.mubr.f32.mxu0 %v6423_v4  ;;  %v8779_v4 = vld [vmem:[#allocation39_spill] sm:$0xff]  ;;  %8785 = vst [vmem:[#allocation10_spill] sm:$0xff] %v6715_v61 }
 0x106   :  { %4799 = vmatprep.subr.bf16.mxu0 %v4798_v48  ;;  %v4806_v22 = vpack.c.bf16 %v8779_v4, %v8778_v8  ;;  %v6713_v50 = vld [vmem:[#allocation2 + $0x260] sm:$0xff]  ;;  %v6718_v48 = vld [vmem:[#allocation2 + $0x2f0] sm:$0xff] }
 0x107   :  { %4841 = vmatpush3.bf16.msra.mxu1 %v6605_v49  ;;  %8784 = vst [vmem:[#allocation9_spill] sm:$0xff] %v6713_v50  ;;  %8786 = vst [vmem:[#allocation11_spill] sm:$0xff] %v6718_v48 }
 0x108   :  { %4843 = vmatprep.subr.bf16.mxu1 %v6612_v25 }
 0x109   :  { %4801 = vmatpush3.bf16.msra.mxu0 %v4800_v60  ;;  %v6720_v60 = vld [vmem:[#allocation2 + $0x2f8] sm:$0xff] }
 0x10a   :  { %4803 = vmatprep.subr.bf16.mxu0 %v4802_v2  ;;  %8787 = vst [vmem:[#allocation12_spill] sm:$0xff] %v6720_v60  ;;  %v4812_v2 = vpack.c.bf16 %v6438_v15, %v6433_v63 }
 0x10b   :  { %4845 = vmatpush3.bf16.msra.mxu1 %v6621_v11 }
 0x10c   :  { %4847 = vmatprep.subr.bf16.mxu1 %v6628_v29 }
 0x10d   :  { %4805 = vmatpush3.bf16.msra.mxu0 %v4804_v30  ;;  %v8414_v30 = vand.u32 4294901760, %v6713_v50 }
 0x10e   :  { %4807 = vmatprep.subr.bf16.mxu0 %v4806_v22  ;;  %v8416_v22 = vand.u32 4294901760, %v6715_v61 }
 0x10f   :  { %4849 = vmatpush3.bf16.msra.mxu1 %v6639_v57 }
 0x110   :  { %4851 = vmatprep.subr.bf16.mxu1 %v6648_v36  ;;  %v4816_v36 = vpack.c.bf16 %v6477_v3, %v6472_v54  ;;  %v6747_v57 = vsub.f32 %v6715_v61, %v8416_v22  ;;  %v8791_v22 = vand.u32 4294901760, %v6720_v60 }
 0x111   :  { %4809 = vmatpush3.bf16.msra.mxu0 %v4808_v5  ;;  %v6773_v5 = vld [vmem:[#allocation2 + $0x208] sm:$0xff] }
 0x112   :  { %4811 = vmatprep.subr.bf16.mxu0 %v4810_v58  ;;  %v6742_v58 = vsub.f32 %v6713_v50, %v8414_v30  ;;  %v8790_v30 = vand.u32 4294901760, %v6718_v48  ;;  %v6765_v61 = vsub.f32 %v6720_v60, %v8791_v22  ;;  %v8792_v60 = vand.u32 4294901760, %v6729_v24 }
 0x113   :  { %4853 = vmatpush3.bf16.msra.mxu1 %v6656_v52  ;;  %v6753_v52 = vld [vmem:[#allocation2 + $0x280] sm:$0xff]  ;;  %v8796_v22 = vand.u32 4294901760, %v6641_v44 }
 0x114   :  { %4855 = vmatprep.subr.bf16.mxu1 %v6664_v53  ;;  %v6755_v53 = vld [vmem:[#allocation2 + $0x288] sm:$0xff]  ;;  %v6760_v50 = vsub.f32 %v6718_v48, %v8790_v30  ;;  %v6777_v30 = vld [vmem:[#allocation2 + $0x298] sm:$0xff]  ;;  %v8800_v48 = vld [vmem:[#allocation21_spill] sm:$0xff] }
 0x115   :  { %4813 = vmatpush3.bf16.msra.mxu0 %v4812_v2  ;;  %v4818_v2 = vpack.c.bf16 %v6501_v38, %v6496_v19  ;;  %v6775_v38 = vld [vmem:[#allocation2 + $0x290] sm:$0xff] }
 0x116   :  { %4815 = vmatprep.subr.bf16.mxu0 %v4814_v7  ;;  %v4820_v7 = vpack.c.bf16 %v6074_v41, %v6065_v56  ;;  %v8794_v56 = vand.u32 4294901760, %v6731_v39  ;;  %v6795_v19 = vld [vmem:[#allocation2 + $0x210] sm:$0xff] }
 0x117   :  { %4857 = vmatpush3.bf16.msra.mxu1 %v6679_v43  ;;  %v6784_v43 = vsub.f32 %v6729_v24, %v8792_v60  ;;  %v6800_v24 = vld [vmem:[#allocation2 + $0x218] sm:$0xff]  ;;  %v8806_v60 = vand.u32 4294901760, %v6753_v52 }
 0x118   :  { %4891 = vmatprep.subr.bf16.mxu1 %v6375_v33  ;;  %v6789_v41 = vsub.f32 %v6731_v39, %v8794_v56  ;;  %v4822_v33 = vpack.c.bf16 %v6093_v31, %v6088_v55  ;;  %v8797_v39 = vand.u32 4294901760, %v6742_v58  ;;  %v8798_v55 = vand.u32 4294901760, %v6747_v57 }
 0x119   :  { %4817 = vmatpush3.bf16.msra.mxu0 %v4816_v36  ;;  %8793 = vst [vmem:[#allocation26_spill] sm:$0xff] %v6784_v43  ;;  %v6837_v36 = vld [vmem:[#allocation2 + $0x2a8] sm:$0xff]  ;;  %v6842_v56 = vsub.f32 %v6753_v52, %v8806_v60  ;;  %v8815_v60 = vand.u32 4294901760, %v6773_v5 }
 0x11a   :  { %8795 = vst [vmem:[#allocation27_spill] sm:$0xff] %v6789_v41  ;;  %4819 = vmatprep.subr.bf16.mxu0 %v4818_v2  ;;  %1649 = vmatmul.mubr.f32.vlgmr.msra.gmra.mrb[8].mxu1 %v8796_v22  ;;  %v6808_v31 = vpack.c.bf16 %v8798_v55, %v8797_v39  ;;  %v4824_v22 = vpack.c.bf16 %v6119_v28, %v6114_v21  ;;  %v8802_v21 = vand.u32 4294901760, %v6765_v61  ;;  %v8804_v2 = vand.u32 4294901760, %v8766_v37 }
 0x11b   :  { %4893 = vmatpush3.bf16.msra.mxu1 %v6508_v45  ;;  %3684 = vmatprep.mubr.msk.f32.mxu1 %vm50_vm4, %v8631_v59  ;;  %v6822_v45 = vld [vmem:[#allocation2 + $0x2a0] sm:$0xff]  ;;  %8807 = vst [vmem:[#allocation31_spill] sm:$0xff] %v6842_v56  ;;  %v8808_v55 = vand.u32 4294901760, %v6755_v53 }
 0x11c   :  { %8799 = vst [vmem:[#allocation29_spill] sm:$0xff] %v6808_v31  ;;  %4895 = vmatprep.subr.bf16.mxu1 %v6536_v62  ;;  %v8801_v31 = vand.u32 4294901760, %v6760_v50  ;;  %v8917_v13 = vand.u32 4294901760, %v6822_v45 }
 0x11d   :  { %4821 = vmatpush3.bf16.msra.mxu0 %v4820_v7  ;;  %v8805_v7 = vand.u32 4294901760, %v8767_v46  ;;  %v8812_v46 = vand.u32 4294901760, %v6784_v43 }
 0x11e   :  { %v6830_v28 = vpack.c.bf16 %v8802_v21, %v8801_v31  ;;  %4823 = vmatprep.subr.bf16.mxu0 %v4822_v33  ;;  %v6847_v31 = vsub.f32 %v6755_v53, %v8808_v55  ;;  %v8810_v33 = vand.u32 4294901760, %v6770_v16  ;;  %v8817_v55 = vand.u32 4294901760, %v6775_v38 }
 0x11f   :  { %v4858_v62 = vpack.c.bf16 %v8805_v7, %v8804_v2  ;;  %v8813_v2 = vand.u32 4294901760, %v6789_v41  ;;  %4897 = vmatpush3.bf16.msra.mxu1 %v6542_v6  ;;  %v6864_v7 = vsub.f32 %v6773_v5, %v8815_v60  ;;  %v8821_v6 = vand.u32 4294901760, %v8768_v32 }
 0x120   :  { %8803 = vst [vmem:[#allocation30_spill] sm:$0xff] %v6830_v28  ;;  %8809 = vst [vmem:[#allocation32_spill] sm:$0xff] %v6847_v31  ;;  %v6852_v37 = vsub.f32 %v6770_v16, %v8810_v33  ;;  %v6869_v39 = vsub.f32 %v6775_v38, %v8817_v55  ;;  %v8819_v33 = vand.u32 4294901760, %v6777_v30  ;;  %4899 = vmatprep.subr.bf16.mxu1 %v6566_v47  ;;  %v8429_v41 = vand.u32 4294901760, %v6837_v36 }
 0x121   :  { %v6858_v21 = vpack.c.bf16 %v8813_v2, %v8812_v46  ;;  %8816 = vst [vmem:[#allocation35_spill] sm:$0xff] %v6864_v7  ;;  %4825 = vmatpush3.bf16.msra.mxu0 %v4824_v22  ;;  %v8822_v2 = vand.u32 4294901760, %v8769_v12  ;;  %v8826_v46 = vand.u32 4294901760, %v8771_v40  ;;  %v8827_v47 = vand.u32 4294901760, %v8772_v35 }
 0x122   :  { %8811 = vst [vmem:[#allocation33_spill] sm:$0xff] %v6852_v37  ;;  %8818 = vst [vmem:[#allocation36_spill] sm:$0xff] %v6869_v39  ;;  %v6874_v28 = vsub.f32 %v6777_v30, %v8819_v33  ;;  %4859 = vmatprep.subr.bf16.mxu0 %v4858_v62  ;;  %v8825_v33 = vand.u32 4294901760, %v8770_v17  ;;  %v8828_v32 = vand.u32 4294901760, %v8773_v0  ;;  %v8829_v12 = vand.u32 4294901760, %v6800_v24 }
 0x123   :  { %8814 = vst [vmem:[#allocation34_spill] sm:$0xff] %v6858_v21  ;;  %v4860_v60 = vpack.c.bf16 %v8822_v2, %v8821_v6  ;;  %v8823_v21 = vand.u32 4294901760, %v6795_v19  ;;  %v8831_v2 = vand.u32 4294901760, %v8774_v20  ;;  %v8832_v62 = vand.u32 4294901760, %v8775_v26  ;;  %4901 = vmatpush3.bf16.msra.mxu1 %v6572_v27 }
 0x124   :  { %8820 = vst [vmem:[#allocation37_spill] sm:$0xff] %v6874_v28  ;;  %v4862_v22 = vpack.c.bf16 %v8826_v46, %v8825_v33  ;;  %v4864_v43 = vpack.c.bf16 %v8828_v32, %v8827_v47  ;;  %v6899_v6 = vsub.f32 %v6800_v24, %v8829_v12  ;;  %v8434_v40 = vand.u32 4294901760, %v6842_v56  ;;  %1541 = vmatmul.mubr.f32.vlgmr.msra.gmra.mrb[8].mxu0 %v6641_v44 }
 0x125   :  { %v6885_v55 = vsub.f32 %v6795_v19, %v8823_v21  ;;  %v6901_v21 = vld [vmem:[#allocation2 + $0x220] sm:$0xff]  ;;  %v4866_v17 = vpack.c.bf16 %v8832_v62, %v8831_v2  ;;  %v8433_v46 = vand.u32 4294901760, %v6847_v31  ;;  %v8432_v35 = vand.u32 4294901760, %v6852_v37  ;;  %4861 = vmatpush3.bf16.msra.mxu0 %v4860_v60  ;;  %3682 = vmatprep.mubr.msk.f32.mxu0 %vm50_vm4, %v8631_v59 }
 0x126   :  { %8830 = vst [vmem:[#allocation39_spill] sm:$0xff] %v6899_v6  ;;  %v8431_v0 = vand.u32 4294901760, %v6864_v7  ;;  %v8430_v33 = vand.u32 4294901760, %v6869_v39  ;;  %v8833_v20 = vand.u32 4294901760, %v6822_v45  ;;  %v8835_v44 = vand.u32 4294901760, %v8776_v1  ;;  %4903 = vmatprep.subr.bf16.mxu1 %v6592_v23  ;;  %4863 = vmatprep.subr.bf16.mxu0 %v4862_v22  ;;  %v6951_v23 = vld [vmem:[#allocation2 + $0x228] sm:$0xff] }
 0x127   :  { %8824 = vst [vmem:[#allocation38_spill] sm:$0xff] %v6885_v55  ;;  %v8836_v27 = vand.u32 4294901760, %v8777_v51  ;;  %v6932_v2 = vsub.f32 %v6837_v36, %v8429_v41  ;;  %v8838_v60 = vand.u32 4294901760, %v8778_v8  ;;  %v8840_v51 = vand.u32 4294901760, %v8780_v14  ;;  %4905 = vmatpush3.bf16.msra.mxu1 %v6605_v49 }
 0x128   :  { %v6918_v26 = vsub.f32 %v6822_v45, %v8833_v20  ;;  %v8839_v20 = vand.u32 4294901760, %v8779_v4  ;;  %v8842_v12 = vand.u32 4294901760, %v8782_v10  ;;  %v8843_v41 = vand.u32 4294901760, %v8783_v42  ;;  %v6968_v42 = vld [vmem:[#allocation2 + $0x2b0] sm:$0xff]  ;;  %4907 = vmatprep.subr.bf16.mxu1 %v6612_v25 }
 0x129   :  { %v4868_v32 = vpack.c.bf16 %v8836_v27, %v8835_v44  ;;  %8837 = vst [vmem:[#allocation41_spill] sm:$0xff] %v6932_v2  ;;  %v8841_v44 = vand.u32 4294901760, %v8781_v34  ;;  %v8435_v62 = vand.u32 4294901760, %v6899_v6  ;;  %v8844_v8 = vand.u32 4294901760, %v6433_v63  ;;  %4865 = vmatpush3.bf16.msra.mxu0 %v4864_v43 }
 0x12a   :  { %8834 = vst [vmem:[#allocation13_spill] sm:$0xff] %v6918_v26  ;;  %v4870_v1 = vpack.c.bf16 %v8839_v20, %v8838_v60  ;;  %v6948_v47 = vpack.c.bf16 %v8843_v41, %v8842_v12  ;;  %v8845_v4 = vand.u32 4294901760, %v6438_v15  ;;  %v2154_v14 = vsub.f32 %v6842_v56, %v8434_v40  ;;  %v6970_v41 = vld [vmem:[#allocation2 + $0x2b8] sm:$0xff]  ;;  %4867 = vmatprep.subr.bf16.mxu0 %v4866_v17  ;;  %v8889_v56 = vld [vmem:[#allocation20_spill] sm:$0xff] }
 0x12b   :  { %v4872_v27 = vpack.c.bf16 %v8841_v44, %v8840_v51  ;;  %v2161_v34 = vsub.f32 %v6847_v31, %v8433_v46  ;;  %v2042_v10 = vsub.f32 %v6852_v37, %v8432_v35  ;;  %v2049_v63 = vsub.f32 %v6864_v7, %v8431_v0  ;;  %4909 = vmatpush3.bf16.msra.mxu1 %v6621_v11  ;;  %v8862_v11 = vld [vmem:[#allocation17_spill] sm:$0xff] }
 0x12c   :  { %v6957_v22 = vpack.c.bf16 %v8845_v4, %v8844_v8  ;;  %v2168_v15 = vsub.f32 %v6869_v39, %v8430_v33  ;;  %v8846_v12 = vand.u32 4294901760, %v6874_v28  ;;  %v8437_v20 = vand.u32 4294901760, %v6918_v26  ;;  %4911 = vmatprep.subr.bf16.mxu1 %v6628_v29 }
 0x12d   :  { %v8847_v51 = vand.u32 4294901760, %v6885_v55  ;;  %v8436_v44 = vand.u32 4294901760, %v6932_v2  ;;  %v8848_v4 = vand.u32 4294901760, %v6901_v21  ;;  %v8851_v43 = vand.u32 4294901760, %v6448_v9  ;;  %v7011_v9 = vld [vmem:[#allocation2 + $0x230] sm:$0xff]  ;;  %4869 = vmatpush3.bf16.msra.mxu0 %v4868_v32 }
 0x12e   :  { %v2175_v60 = vsub.f32 %v6874_v28, %v8846_v12  ;;  %v8850_v12 = vand.u32 4294901760, %v6443_v18  ;;  %v2063_v25 = vsub.f32 %v6899_v6, %v8435_v62  ;;  %v8852_v46 = vand.u32 4294901760, %v6472_v54  ;;  %v7019_v54 = vld [vmem:[#allocation2 + $0x2c0] sm:$0xff]  ;;  %4871 = vmatprep.subr.bf16.mxu0 %v4870_v1 }
 0x12f   :  { %v2056_v49 = vsub.f32 %v6885_v55, %v8847_v51  ;;  %v6992_v33 = vsub.f32 %v6901_v21, %v8848_v4  ;;  %v8853_v4 = vand.u32 4294901760, %v6477_v3  ;;  %v2155_v17 = vand.u32 4294901760, %v2154_v14  ;;  %v7017_v51 = vld [vmem:[#allocation2 + $0x238] sm:$0xff] }
 0x130   :  { %v6998_v0 = vpack.c.bf16 %v8851_v43, %v8850_v12  ;;  %v2162_v18 = vand.u32 4294901760, %v2161_v34  ;;  %v2043_v8 = vand.u32 4294901760, %v2042_v10  ;;  %v2050_v12 = vand.u32 4294901760, %v2049_v63  ;;  %v7031_v10 = vpop.permute.xlu1 %56 }
 0x131   :  { %8849 = vst [vmem:[#allocation42_spill] sm:$0xff] %v6992_v33  ;;  %v7009_v40 = vpack.c.bf16 %v8853_v4, %v8852_v46  ;;  %v2169_v43 = vand.u32 4294901760, %v2168_v15  ;;  %v2176_v62 = vand.u32 4294901760, %v2175_v60  ;;  %v2182_v35 = vsub.f32 %v6918_v26, %v8437_v20  ;;  %v7044_v4 = vld [vmem:[#allocation2 + $0x2c8] sm:$0xff]  ;;  %v8864_v26 = vld [vmem:[#allocation18_spill] sm:$0xff]  ;;  %4873 = vmatpush3.bf16.msra.mxu0 %v4872_v27 }
 0x132   :  { %v2057_v3 = vand.u32 4294901760, %v2056_v49  ;;  %v2189_v46 = vsub.f32 %v6932_v2, %v8436_v44  ;;  %v8854_v14 = vand.u32 4294901760, %v6951_v23  ;;  %v2064_v63 = vand.u32 4294901760, %v2063_v25  ;;  %v8860_v44 = vld [vmem:[#allocation16_spill] sm:$0xff]  ;;  %4913 = vmatpush3.bf16.msra.mxu1 %v8864_v26  ;;  %v7057_v49 = vld [vmem:[#allocation2 + $0x240] sm:$0xff]  ;;  %4875 = vmatprep.subr.bf16.mxu0 %v6948_v47 }
 0x133   :  { %v8856_v32 = vand.u32 4294901760, %v6968_v42  ;;  %v8858_v15 = vand.u32 4294901760, %v6970_v41  ;;  %v8861_v20 = vand.u32 4294901760, %v8860_v44  ;;  %v8863_v1 = vand.u32 4294901760, %v8862_v11  ;;  %v8865_v44 = vld [vmem:[#allocation19_spill] sm:$0xff] }
 0x134   :  { %v7029_v34 = vsub.f32 %v6951_v23, %v8854_v14  ;;  %v4954_v14 = vpack.c.bf16 %v2162_v18, %v2155_v17  ;;  %v8446_v2 = vand.u32 4294901760, %v7017_v51  ;;  %v7053_v6 = vpack.c.bf16 %v2050_v12, %v2043_v8  ;;  %4915 = vmatprep.subr.bf16.mxu1 %v8865_v44  ;;  %v7069_v8 = vld [vmem:[#allocation2 + $0x248] sm:$0xff]  ;;  %v7073_v12 = vld [vmem:[#allocation2 + $0x2d8] sm:$0xff] }
 0x135   :  { %v7036_v29 = vsub.f32 %v6968_v42, %v8856_v32  ;;  %v7041_v60 = vsub.f32 %v6970_v41, %v8858_v15  ;;  %v4882_v25 = vpack.c.bf16 %v8863_v1, %v8861_v20  ;;  %v8447_v32 = vand.u32 4294901760, %v7019_v54  ;;  %4877 = vmatpush3.bf16.msra.mxu0 %v6957_v22 }
 0x136   :  { %8855 = vst [vmem:[#allocation14_spill] sm:$0xff] %v7029_v34  ;;  %v7055_v15 = vpack.c.bf16 %v2176_v62, %v2169_v43  ;;  %v2183_v55 = vand.u32 4294901760, %v2182_v35  ;;  %vm59_vm6 = vcmp.eq.s32.totalorder %v8800_v48, %v7031_v10  ;;  %v2190_v20 = vand.u32 4294901760, %v2189_v46  ;;  %v7071_v35 = vld [vmem:[#allocation2 + $0x2d0] sm:$0xff]  ;;  %v7112_v43 = vld [vmem:[#allocation2 + $0x258] sm:$0xff]  ;;  %4879 = vmatprep.subr.bf16.mxu0 %v6998_v0 }
 0x137   :  { %8857 = vst [vmem:[#allocation43_spill] sm:$0xff] %v7036_v29  ;;  %8859 = vst [vmem:[#allocation44_spill] sm:$0xff] %v7041_v60  ;;  %v8866_v17 = vand.u32 4294901760, %v6992_v33  ;;  %v7076_v27 = vpack.c.bf16 %v2064_v63, %v2057_v3  ;;  %v8867_v11 = vand.u32 4294901760, %v7011_v9  ;;  %v8869_v44 = vand.u32 4294901760, %v6753_v52  ;;  %v8874_v52 = vld [vmem:[#allocation40_spill] sm:$0xff] }
 0x138   :  { %v7094_v47 = vsub.f32 %v7017_v51, %v8446_v2  ;;  %v7099_v3 = vsub.f32 %v7019_v54, %v8447_v32  ;;  %v8873_v63 = vmov 0.0   ;;  %4917 = vmatpush3.bf16.msra.mxu1 %v8874_v52  ;;  %v7110_v46 = vld [vmem:[#allocation2 + $0x250] sm:$0xff]  ;;  %v8875_v32 = vld [vmem:[#allocation15_spill] sm:$0xff]  ;;  %v4962_v26 = vpack.c.bf16 %v2190_v20, %v2183_v55 }
 0x139   :  { %v7065_v18 = vsub.f32 %v6992_v33, %v8866_v17  ;;  %v7083_v1 = vsub.f32 %v7011_v9, %v8867_v11  ;;  %v8870_v17 = vand.u32 4294901760, %v6755_v53  ;;  %v3671_v11 = vsel %vm59_vm6, 1.0, %v8873_v63  ;;  %4919 = vmatprep.subr.bf16.mxu1 %v8875_v32  ;;  %4881 = vmatpush3.bf16.msra.mxu0 %v7009_v40 }
 0x13a   :  { %8871 = vst [vmem:[#allocation17_spill] sm:$0xff] %v7094_v47  ;;  %8872 = vst [vmem:[#allocation18_spill] sm:$0xff] %v7099_v3  ;;  %v8876_v52 = vand.u32 4294901760, %v7029_v34  ;;  %v8879_v2 = vand.u32 4294901760, %v7036_v29  ;;  %v8880_v32 = vand.u32 4294901760, %v7041_v60  ;;  %v8886_v28 = vand.u32 4294901760, %v7073_v12  ;;  %4883 = vmatprep.subr.bf16.mxu0 %v4882_v25 }
 0x13b   :  { %8868 = vst [vmem:[#allocation16_spill] sm:$0xff] %v7083_v1  ;;  %v7089_v62 = vpack.c.bf16 %v8870_v17, %v8869_v44  ;;  %v2071_v33 = vand.u32 4294901760, %v7065_v18  ;;  %v8877_v44 = vand.u32 4294901760, %v7044_v4  ;;  %v7133_v18 = vld [vmem:[#allocation2 + $0x2e0] sm:$0xff]  ;;  %v8890_v40 = vand.u32 4294901760, %v7094_v47 }
 0x13c   :  { %v2077_v53 = vsub.f32 %v7029_v34, %v8876_v52  ;;  %v2196_v22 = vsub.f32 %v7036_v29, %v8879_v2  ;;  %v2203_v55 = vsub.f32 %v7041_v60, %v8880_v32  ;;  %8881 = vst [vmem:[#allocation40_spill] sm:$0xff] %v7133_v18  ;;  %v7135_v52 = vld [vmem:[#allocation2 + $0x2e8] sm:$0xff]  ;;  %v7137_v34 = vsub.f32 %v3671_v11, %v3671_v11 }
 0x13d   :  { %v7123_v17 = vsub.f32 %v7044_v4, %v8877_v44  ;;  %v8882_v29 = vld [vmem:[#allocation8_spill] sm:$0xff]  ;;  %v8883_v32 = vand.u32 4294901760, %v7057_v49  ;;  %v8884_v60 = vand.u32 4294901760, %v7069_v8  ;;  %v8885_v44 = vand.u32 4294901760, %v7071_v35 }
 0x13e   :  { %4921 = vmatpush3.bf16.msra.mxu1 %v8882_v29  ;;  %v7162_v2 = vsub.f32 %v7073_v12, %v8886_v28  ;;  %v2078_v29 = vand.u32 4294901760, %v2077_v53  ;;  %v2197_v7 = vand.u32 4294901760, %v2196_v22  ;;  %v2204_v37 = vand.u32 4294901760, %v2203_v55 }
 0x13f   :  { %8878 = vst [vmem:[#allocation19_spill] sm:$0xff] %v7123_v17  ;;  %v7147_v20 = vsub.f32 %v7057_v49, %v8883_v32  ;;  %v7152_v11 = vsub.f32 %v7069_v8, %v8884_v60  ;;  %v7157_v0 = vsub.f32 %v7071_v35, %v8885_v44  ;;  %4955 = vmatprep.subr.bf16.mxu1 %v4954_v14  ;;  %v8471_v32 = vand.u32 4294901760, %v7123_v17  ;;  %v8901_v60 = vld [vmem:[#allocation24_spill] sm:$0xff] }
 0x140   :  { %8887 = vst [vmem:[#allocation15_spill] sm:$0xff] %v7162_v2  ;;  %v8888_v44 = vand.u32 4294901760, %v7083_v1  ;;  %v2091_v14 = vsub.f32 %v7094_v47, %v8890_v40  ;;  %v8891_v53 = vand.u32 4294901760, %v7099_v3  ;;  %v8892_v22 = vand.u32 4294901760, %v7110_v46 }
 0x141   :  { %3685 = vmatmul.mubr.msk.f32.vlgmr.msra.gmra.mrb[10].mxu1 %vm49_vm5, %v8631_v59  ;;  %v4964_v48 = vpack.c.bf16 %v2078_v29, %v2071_v33  ;;  %v4966_v47 = vpack.c.bf16 %v2204_v37, %v2197_v7  ;;  %v8905_v33 = vand.u32 4294901760, %v7147_v20  ;;  %v8907_v29 = vand.u32 4294901760, %v7157_v0 }
 0x142   :  { %v2084_v31 = vsub.f32 %v7083_v1, %v8888_v44  ;;  %v2210_v25 = vsub.f32 %v7099_v3, %v8891_v53  ;;  %v7185_v55 = vsub.f32 %v7110_v46, %v8892_v22  ;;  %v8894_v44 = vand.u32 4294901760, %v7112_v43  ;;  %4957 = vmatpush3.bf16.msra.mxu1 %v7053_v6  ;;  %3686 = vmatprep.mubr.msk.f32.mxu1 %vm59_vm6, %v8631_v59  ;;  %v8896_v22 = vld [vmem:[#allocation23_spill] sm:$0xff] }
 0x143   :  { %4885 = vmatpush3.bf16.msra.mxu0 %v8896_v22  ;;  %4959 = vmatprep.subr.bf16.mxu1 %v7055_v15  ;;  %v2217_v6 = vsub.f32 %v7123_v17, %v8471_v32  ;;  %v8899_v53 = vand.u32 4294901760, %v7135_v52  ;;  %v8902_v22 = vand.u32 4294901760, %v6770_v16  ;;  %v8903_v15 = vand.u32 4294901760, %v6773_v5 }
 0x144   :  { %8893 = vst [vmem:[#allocation8_spill] sm:$0xff] %v7185_v55  ;;  %v7190_v28 = vsub.f32 %v7112_v43, %v8894_v44  ;;  %v8897_v44 = vand.u32 4294901760, %v7133_v18  ;;  %4887 = vmatprep.subr.bf16.mxu0 %v8901_v60  ;;  %v2085_v32 = vand.u32 4294901760, %v2084_v31  ;;  %v8904_v17 = vand.u32 4294901760, %v7137_v34  ;;  %v8909_v60 = vld [vmem:[#allocation28_spill] sm:$0xff] }
 0x145   :  { %v7214_v39 = vsub.f32 %v7135_v52, %v8899_v53  ;;  %v7221_v3 = vpack.c.bf16 %v8903_v15, %v8902_v22  ;;  %v2092_v1 = vand.u32 4294901760, %v2091_v14  ;;  %v2098_v16 = vsub.f32 %v7147_v20, %v8905_v33 }
 0x146   :  { %8895 = vst [vmem:[#allocation45_spill] sm:$0xff] %v7190_v28  ;;  %v7209_v40 = vsub.f32 %v7133_v18, %v8897_v44  ;;  %v2025_v44 = vsub.f32 %v7137_v34, %v8904_v17  ;;  %4961 = vmatpush3.bf16.msra.mxu1 %v7076_v27  ;;  %v8906_v5 = vand.u32 4294901760, %v7152_v11  ;;  %v2224_v17 = vsub.f32 %v7157_v0, %v8907_v29 }
 0x147   :  { %8900 = vst [vmem:[#allocation46_spill] sm:$0xff] %v7214_v39  ;;  %v8908_v37 = vand.u32 4294901760, %v7162_v2  ;;  %4889 = vmatpush3.bf16.msra.mxu0 %v8909_v60  ;;  %4963 = vmatprep.subr.bf16.mxu1 %v4962_v26  ;;  %v2211_v27 = vand.u32 4294901760, %v2210_v25  ;;  %v2218_v14 = vand.u32 4294901760, %v2217_v6  ;;  %v8910_v33 = vand.u32 4294901760, %v6775_v38 }
 0x148   :  { %8898 = vst [vmem:[#allocation23_spill] sm:$0xff] %v7209_v40  ;;  %v2105_v31 = vsub.f32 %v7152_v11, %v8906_v5  ;;  %v8479_v22 = vand.u32 4294901760, %v7209_v40  ;;  %4923 = vmatprep.subr.bf16.mxu0 %v7089_v62  ;;  %v8911_v5 = vand.u32 4294901760, %v6777_v30  ;;  %v2026_v53 = vand.u32 4294901760, %v2025_v44 }
 0x149   :  { %v2231_v7 = vsub.f32 %v7162_v2, %v8908_v37  ;;  %v4968_v18 = vpack.c.bf16 %v2092_v1, %v2085_v32  ;;  %v8912_v37 = vand.u32 4294901760, %v6795_v19  ;;  %v8913_v26 = vand.u32 4294901760, %v6800_v24 }
 0x14a   :  { %v7249_v29 = vpack.c.bf16 %v8911_v5, %v8910_v33  ;;  %v8914_v6 = vand.u32 4294901760, %v7185_v55  ;;  %v8915_v15 = vand.u32 4294901760, %v7190_v28  ;;  %3683 = vmatmul.mubr.msk.f32.vlgmr.msra.gmra.mrb[10].mxu0 %vm49_vm5, %v8631_v59  ;;  %4965 = vmatpush3.bf16.msra.mxu1 %v4964_v48  ;;  %v2099_v30 = vand.u32 4294901760, %v2098_v16 }
 0x14b   :  { %v7255_v25 = vpack.c.bf16 %v8913_v26, %v8912_v37  ;;  %v2106_v19 = vand.u32 4294901760, %v2105_v31  ;;  %v2225_v1 = vand.u32 4294901760, %v2224_v17  ;;  %v2232_v24 = vand.u32 4294901760, %v2231_v7  ;;  %4925 = vmatpush3.bf16.msra.mxu0 %v7221_v3  ;;  %4967 = vmatprep.subr.bf16.mxu1 %v4966_v47 }
 0x14c   :  { %v2112_v60 = vsub.f32 %v7185_v55, %v8914_v6  ;;  %v2119_v38 = vsub.f32 %v7190_v28, %v8915_v15  ;;  %v4970_v32 = vpack.c.bf16 %v2218_v14, %v2211_v27  ;;  %v2238_v44 = vsub.f32 %v7209_v40, %v8479_v22  ;;  %4927 = vmatprep.subr.bf16.mxu0 %v7249_v29  ;;  %v7435_v22 = vld [vmem:[#allocation2 + $0x3f8] sm:$0xff] }
 0x14d   :  { %v8916_v15 = vand.u32 4294901760, %v7214_v39  ;;  %v8918_v48 = vand.u32 4294901760, %v6837_v36  ;;  %2027 = vmatprep.mubr.f32.mxu0 %v2026_v53  ;;  %v8919_v47 = vand.u32 4294901760, %v6901_v21  ;;  %v8920_v31 = vand.u32 4294901760, %v6951_v23 }
 0x14e   :  { %v2113_v7 = vand.u32 4294901760, %v2112_v60  ;;  %v2120_v27 = vand.u32 4294901760, %v2119_v38  ;;  %4969 = vmatpush3.bf16.msra.mxu1 %v4968_v18  ;;  %v4972_v14 = vpack.c.bf16 %v2106_v19, %v2099_v30  ;;  %v4974_v5 = vpack.c.bf16 %v2232_v24, %v2225_v1 }
 0x14f   :  { %v2245_v33 = vsub.f32 %v7214_v39, %v8916_v15  ;;  %v7279_v16 = vpack.c.bf16 %v8918_v48, %v8917_v13  ;;  %v7285_v17 = vpack.c.bf16 %v8920_v31, %v8919_v47  ;;  %v8921_v37 = vand.u32 4294901760, %v6742_v58  ;;  %4929 = vmatpush3.bf16.msra.mxu0 %v7255_v25  ;;  %4971 = vmatprep.subr.bf16.mxu1 %v4970_v32  ;;  %v8929_v13 = vld [vmem:[#allocation27_spill] sm:$0xff] }
 0x150   :  { %v8922_v36 = vand.u32 4294901760, %v6747_v57  ;;  %v2239_v21 = vand.u32 4294901760, %v2238_v44  ;;  %v8923_v53 = vand.u32 4294901760, %v6760_v50  ;;  %v8924_v18 = vand.u32 4294901760, %v6765_v61  ;;  %v8927_v44 = vld [vmem:[#allocation26_spill] sm:$0xff] }
 0x151   :  { %v2126_v45 = vsub.f32 %v6742_v58, %v8921_v37  ;;  %v2246_v23 = vand.u32 4294901760, %v2245_v33  ;;  %4931 = vmatprep.subr.bf16.mxu0 %v7279_v16  ;;  %v8925_v38 = vand.u32 4294901760, %v6968_v42  ;;  %v8926_v30 = vand.u32 4294901760, %v6970_v41 }
 0x152   :  { %v2133_v26 = vsub.f32 %v6747_v57, %v8922_v36  ;;  %v2252_v6 = vsub.f32 %v6760_v50, %v8923_v53  ;;  %v2259_v60 = vsub.f32 %v6765_v61, %v8924_v18  ;;  %v4976_v1 = vpack.c.bf16 %v2120_v27, %v2113_v7  ;;  %4973 = vmatpush3.bf16.msra.mxu1 %v4972_v14 }
 0x153   :  { %v7305_v19 = vpack.c.bf16 %v8926_v30, %v8925_v38  ;;  %v2127_v24 = vand.u32 4294901760, %v2126_v45  ;;  %v8928_v15 = vand.u32 4294901760, %v8927_v44  ;;  %v8930_v48 = vand.u32 4294901760, %v8929_v13  ;;  %4933 = vmatpush3.bf16.msra.mxu0 %v7285_v17  ;;  %4975 = vmatprep.subr.bf16.mxu1 %v4974_v5 }
 0x154   :  { %v2134_v32 = vand.u32 4294901760, %v2133_v26  ;;  %v8931_v42 = vand.u32 4294901760, %v7011_v9  ;;  %v8932_v41 = vand.u32 4294901760, %v7017_v51  ;;  %v4978_v7 = vpack.c.bf16 %v2246_v23, %v2239_v21 }
 0x155   :  { %v2140_v33 = vsub.f32 %v8927_v44, %v8928_v15  ;;  %v2147_v47 = vsub.f32 %v8929_v13, %v8930_v48  ;;  %v2253_v27 = vand.u32 4294901760, %v2252_v6  ;;  %v2260_v14 = vand.u32 4294901760, %v2259_v60  ;;  %4935 = vmatprep.subr.bf16.mxu0 %v7305_v19  ;;  %v8953_v48 = vld [vmem:[#allocation11_spill] sm:$0xff] }
 0x156   :  { %v7318_v31 = vpack.c.bf16 %v8932_v41, %v8931_v42  ;;  %v8933_v37 = vand.u32 4294901760, %v7019_v54  ;;  %v8934_v45 = vand.u32 4294901760, %v7044_v4  ;;  %4977 = vmatpush3.bf16.msra.mxu1 %v4976_v1  ;;  %v4980_v26 = vpack.c.bf16 %v2134_v32, %v2127_v24  ;;  %v8955_v42 = vld [vmem:[#allocation12_spill] sm:$0xff] }
 0x157   :  { %vm58_vm7 = vcmp.eq.s32.totalorder %v8889_v56, %v7031_v10  ;;  %v2141_v9 = vand.u32 4294901760, %v2140_v33  ;;  %v2148_v51 = vand.u32 4294901760, %v2147_v47  ;;  %4979 = vmatprep.subr.bf16.mxu1 %v4978_v7  ;;  %v8935_v5 = vand.u32 4294901760, %v7057_v49  ;;  %v201_v56 = vld [vmem:[%s8292_s2] sm:$0xff]  ;;  %s5378_s2 = smov [#allocation5]  }
 0x158   :  { %v7325_v36 = vpack.c.bf16 %v8934_v45, %v8933_v37  ;;  %4937 = vmatpush3.bf16.msra.mxu0 %v7318_v31  ;;  %v8936_v21 = vand.u32 4294901760, %v7069_v8  ;;  %v4982_v54 = vpack.c.bf16 %v2260_v14, %v2253_v27  ;;  %v8938_v4 = vand.u32 4294901760, %v7071_v35  ;;  %v8959_v14 = vld [vmem:[#allocation22_spill] sm:$0xff]  ;;  %v8961_v45 = vld [vmem:[#allocation25_spill] sm:$0xff]  ;;  %s3657_s28 = sshll.u32 %s5378_s2, 4  ;;  %s3658_s28 = int_to_ptr.vmem [resolvable:$true] %s3657_s28 }
 0x159   :  { %v8939_v53 = vand.u32 4294901760, %v7073_v12  ;;  %v3670_v18 = vsel %vm58_vm7, 1.0, %v8873_v63  ;;  %v4984_v49 = vpack.c.bf16 %v2148_v51, %v2141_v9  ;;  %v8941_v8 = vand.u32 4294901760, %v7110_v46  ;;  %v8944_v12 = vld [vmem:[#allocation40_spill] sm:$0xff]  ;;  %v8948_v46 = vld [vmem:[#allocation9_spill] sm:$0xff]  ;;  %8985 = vst [vmem:[#allocation25_spill] sm:$0xff] %v7435_v22  ;;  %p5348_p9 = scmp.lt.s32.totalorder %s3658_s28, %s3658_s28 }
 0x15a   :  { %v7334_v23 = vpack.c.bf16 %v8936_v21, %v8935_v5  ;;  %4939 = vmatprep.subr.bf16.mxu0 %v7325_v36  ;;  %4981 = vmatpush3.bf16.msra.mxu1 %v4980_v26  ;;  %v8942_v60 = vand.u32 4294901760, %v7112_v43  ;;  %v7354_v35 = vsub.f32 %v3670_v18, %v3670_v18  ;;  %v8945_v30 = vand.u32 4294901760, %v8944_v12  ;;  %v8950_v43 = vld [vmem:[#allocation10_spill] sm:$0xff]  ;;  %v8964_v5 = vld [vmem:[#allocation31_spill] sm:$0xff]  ;;  %v8965_v21 = vld [vmem:[#allocation32_spill] sm:$0xff]  ;;  %s5343_s29 = scalar_lea.vmem %s3658_s28, 128 }
 0x15b   :  { %v7341_v6 = vpack.c.bf16 %v8939_v53, %v8938_v4  ;;  %4983 = vmatprep.subr.bf16.mxu1 %v4982_v54  ;;  %v8946_v1 = vand.u32 4294901760, %v7135_v52  ;;  %v8949_v32 = vand.u32 4294901760, %v8948_v46  ;;  %v8951_v15 = vand.u32 4294901760, %v8950_v43  ;;  %v8966_v4 = vld [vmem:[#allocation33_spill] sm:$0xff]  ;;  %v8967_v53 = vld [vmem:[#allocation35_spill] sm:$0xff]  ;;  %p5344_p8 = scmp.ne.s32.totalorder %s3658_s28, %s5343_s29  ;;  %p5349_p10 = scmp.lt.s32.totalorder %s5343_s29, %s5343_s29 }
 0x15c   :  { %8937 = vst [vmem:[#allocation24_spill] sm:$0xff] %v7334_v23  ;;  %4941 = vmatpush3.bf16.msra.mxu0 %v7334_v23  ;;  %v7352_v38 = vpack.c.bf16 %v8942_v60, %v8941_v8  ;;  %v8954_v47 = vand.u32 4294901760, %v8953_v48  ;;  %v8956_v41 = vand.u32 4294901760, %v8955_v42  ;;  %v8480_v7 = vand.u32 4294901760, %v7354_v35  ;;  %v8968_v8 = vld [vmem:[#allocation36_spill] sm:$0xff]  ;;  %v8969_v60 = vld [vmem:[#allocation37_spill] sm:$0xff] }
 0x15d   :  { %8940 = vst [vmem:[#allocation28_spill] sm:$0xff] %v7341_v6  ;;  %4943 = vmatprep.subr.bf16.mxu0 %v7341_v6  ;;  %v7361_v24 = vpack.c.bf16 %v8946_v1, %v8945_v30  ;;  %v7369_v33 = vpack.c.bf16 %v8951_v15, %v8949_v32  ;;  %v8958_v27 = vand.u32 4294901760, %v7137_v34  ;;  %v8960_v37 = vand.u32 4294901760, %v8959_v14  ;;  %v8970_v30 = vld [vmem:[#allocation38_spill] sm:$0xff]  ;;  %v8971_v1 = vld [vmem:[#allocation39_spill] sm:$0xff]  ;;  %v8972_v32 = vld [vmem:[#allocation13_spill] sm:$0xff]  ;;  %p5350_p11 = por %p5349_p10, %p5348_p9 }
 0x15e   :  { %8943 = vst [vmem:[#allocation26_spill] sm:$0xff] %v7352_v38  ;;  %4985 = vmatpush3.bf16.msra.mxu1 %v4984_v49  ;;  %v7376_v52 = vpack.c.bf16 %v8956_v41, %v8954_v47  ;;  %v8962_v26 = vand.u32 4294901760, %v8961_v45  ;;  %v2031_v51 = vsub.f32 %v7354_v35, %v8480_v7  ;;  %v4986_v54 = vpack.c.bf16 %v8965_v21, %v8964_v5  ;;  %v8973_v43 = vld [vmem:[#allocation41_spill] sm:$0xff]  ;;  %v8974_v48 = vld [vmem:[#allocation42_spill] sm:$0xff]  ;;  %v8976_v41 = vld [vmem:[#allocation43_spill] sm:$0xff] }
 0x15f   :  { %8947 = vst [vmem:[#allocation27_spill] sm:$0xff] %v7361_v24  ;;  %5019 = vmatprep.subr.bf16.mxu1 %v7089_v62  ;;  %8952 = vst [vmem:[#allocation40_spill] sm:$0xff] %v7369_v33  ;;  %v4988_v18 = vpack.c.bf16 %v8967_v53, %v8966_v4  ;;  %v4990_v12 = vpack.c.bf16 %v8969_v60, %v8968_v8  ;;  %v4992_v46 = vpack.c.bf16 %v8971_v1, %v8970_v30  ;;  %v8975_v47 = vld [vmem:[#allocation14_spill] sm:$0xff]  ;;  %v8978_v14 = vld [vmem:[#allocation16_spill] sm:$0xff]  ;;  %p5351_p12 = pnand %p5350_p11, %p5344_p8 }
 0x160   :  { %4945 = vmatpush3.bf16.msra.mxu0 %v7352_v38  ;;  %8957 = vst [vmem:[#allocation9_spill] sm:$0xff] %v7376_v52  ;;  %v7392_v9 = vpack.c.bf16 %v8962_v26, %v8960_v37  ;;  %v2032_v49 = vand.u32 4294901760, %v2031_v51  ;;  %v4994_v15 = vpack.c.bf16 %v8973_v43, %v8972_v32  ;;  %v4996_v42 = vpack.c.bf16 %v8975_v47, %v8974_v48  ;;  %v8979_v37 = vld [vmem:[#allocation17_spill] sm:$0xff]  ;;  %v8980_v51 = vld [vmem:[#allocation18_spill] sm:$0xff] }
 0x161   :  { %4947 = vmatprep.subr.bf16.mxu0 %v7361_v24  ;;  %3687 = vmatmul.mubr.msk.f32.vlgmr.msra.gmra.mrb[12].mxu1 %vm58_vm7, %v8631_v59  ;;  %v5000_v45 = vpack.c.bf16 %v8979_v37, %v8978_v14  ;;  %v7442_v63 = vld [vmem:[#allocation2 + $0x370] sm:$0xff]  ;;  %v5010_v7 = vpack.c.bf16 %v7214_v39, %v7209_v40  ;;  %v5012_v39 = vpack.c.bf16 %v6747_v57, %v6742_v58  ;;  %v7510_v57 = vld [vmem:[#allocation2 + $0x398] sm:$0xff] }
 0x162   :  { %5021 = vmatpush3.bf16.msra.mxu1 %v7221_v3  ;;  %2507 = vmatprep.mubr.f32.mxu1 %v8958_v27  ;;  %8963 = vst [vmem:[#allocation10_spill] sm:$0xff] %v7392_v9  ;;  %8986 = vst [vmem:[#allocation31_spill] sm:$0xff] %v7442_v63  ;;  %v5014_v40 = vpack.c.bf16 %v6765_v61, %v6760_v50  ;;  %v7512_v58 = vld [vmem:[#allocation2 + $0x310] sm:$0xff]  ;;  %v8998_v50 = vand.u32 4294901760, %v7354_v35  ;;  %v7530_v61 = vld [vmem:[#allocation2 + $0x318] sm:$0xff] }
 0x163   :  { %5023 = vmatprep.subr.bf16.mxu1 %v7249_v29 }
 0x164   :  { %4949 = vmatpush3.bf16.msra.mxu0 %v7369_v33 }
 0x165   :  { %4951 = vmatprep.subr.bf16.mxu0 %v7376_v52 }
 0x166   :  { %5025 = vmatpush3.bf16.msra.mxu1 %v7255_v25 }
 0x167   :  { %5027 = vmatprep.subr.bf16.mxu1 %v7279_v16 }
 0x168   :  { %4953 = vmatpush3.bf16.msra.mxu0 %v7392_v9 }
 0x169   :  { %4987 = vmatprep.subr.bf16.mxu0 %v4986_v54  ;;  %v8981_v54 = vld [vmem:[#allocation19_spill] sm:$0xff] }
 0x16a   :  { %5029 = vmatpush3.bf16.msra.mxu1 %v7285_v17 }
 0x16b   :  { %2033 = vmatmul.mubr.f32.vlgmr.msra.gmra.mrb[12].mxu0 %v2032_v49  ;;  %5031 = vmatprep.subr.bf16.mxu1 %v7305_v19  ;;  %v7426_v49 = vld [vmem:[#allocation2 + $0x360] sm:$0xff] }
 0x16c   :  { %4989 = vmatpush3.bf16.msra.mxu0 %v4988_v18  ;;  %2400 = vmatprep.mubr.f32.mxu0 %v7137_v34  ;;  %v8977_v34 = vld [vmem:[#allocation44_spill] sm:$0xff]  ;;  %v5002_v18 = vpack.c.bf16 %v8981_v54, %v8980_v51  ;;  %8982 = vst [vmem:[#allocation11_spill] sm:$0xff] %v7426_v49 }
 0x16d   :  { %4991 = vmatprep.subr.bf16.mxu0 %v4990_v12  ;;  %v4998_v27 = vpack.c.bf16 %v8977_v34, %v8976_v41  ;;  %v3765_v26 = vpop.f32.mrb[0].mxu1  ;;  %v7428_v12 = vld [vmem:[#allocation2 + $0x368] sm:$0xff] }
 0x16e   :  { %5033 = vmatpush3.bf16.msra.mxu1 %v7318_v31  ;;  %8983 = vst [vmem:[#allocation12_spill] sm:$0xff] %v7428_v12 }
 0x16f   :  { %5035 = vmatprep.subr.bf16.mxu1 %v7325_v36 }
 0x170   :  { %4993 = vmatpush3.bf16.msra.mxu0 %v4992_v46  ;;  %v3766_v46 = vpop.f32.mrb[1].mxu1 }
 0x171   :  { %4995 = vmatprep.subr.bf16.mxu0 %v4994_v15  ;;  %v7430_v15 = vadd.f32 %v3766_v46, %v3765_v26  ;;  %v7444_v26 = vld [vmem:[#allocation2 + $0x378] sm:$0xff]  ;;  %v5006_v46 = vpack.c.bf16 %v7162_v2, %v7157_v0 }
 0x172   :  { %5037 = vmatpush3.bf16.msra.mxu1 %v7334_v23  ;;  %8987 = vst [vmem:[#allocation32_spill] sm:$0xff] %v7444_v26  ;;  %v8988_v23 = vand.u32 4294901760, %v7426_v49 }
 0x173   :  { %5039 = vmatprep.subr.bf16.mxu1 %v7341_v6 }
 0x174   :  { %4997 = vmatpush3.bf16.msra.mxu0 %v4996_v42  ;;  %v7433_v42 = vld [vmem:[#allocation2 + $0x3f0] sm:$0xff]  ;;  %v7463_v2 = vsub.f32 %v7426_v49, %v8988_v23 }
 0x175   :  { %4999 = vmatprep.subr.bf16.mxu0 %v4998_v27  ;;  %8984 = vst [vmem:[#allocation22_spill] sm:$0xff] %v7433_v42  ;;  %v5004_v27 = vpack.c.bf16 %v7152_v11, %v7147_v20  ;;  %v7478_v23 = vld [vmem:[#allocation2 + $0x390] sm:$0xff]  ;;  %v8990_v49 = vand.u32 4294901760, %v7433_v42 }
 0x176   :  { %5041 = vmatpush3.bf16.msra.mxu1 %v7352_v38  ;;  %v7448_v38 = vld [vmem:[#allocation2 + $0x380] sm:$0xff] }
 0x177   :  { %5043 = vmatprep.subr.bf16.mxu1 %v7361_v24  ;;  %v8989_v24 = vand.u32 4294901760, %v7428_v12 }
 0x178   :  { %5001 = vmatpush3.bf16.msra.mxu0 %v5000_v45  ;;  %v7450_v45 = vld [vmem:[#allocation2 + $0x388] sm:$0xff] }
 0x179   :  { %5003 = vmatprep.subr.bf16.mxu0 %v5002_v18  ;;  %v5008_v18 = vpack.c.bf16 %v7190_v28, %v7185_v55  ;;  %v7468_v6 = vsub.f32 %v7428_v12, %v8989_v24  ;;  %v7476_v28 = vld [vmem:[#allocation2 + $0x308] sm:$0xff]  ;;  %v7483_v24 = vsub.f32 %v7433_v42, %v8990_v49  ;;  %v8992_v49 = vand.u32 4294901760, %v7442_v63 }
 0x17a   :  { %5045 = vmatpush3.bf16.msra.mxu1 %v7369_v33  ;;  %v3730_v33 = vpop.f32.mrb[0].mxu0 }
 0x17b   :  { %5047 = vmatprep.subr.bf16.mxu1 %v7376_v52  ;;  %v7474_v52 = vld [vmem:[#allocation2 + $0x300] sm:$0xff]  ;;  %v7501_v42 = vsub.f32 %v7442_v63, %v8992_v49  ;;  %v8994_v49 = vand.u32 4294901760, %v7448_v38  ;;  %v9000_v63 = vand.u32 4294901760, %v7468_v6 }
 0x17c   :  { %5005 = vmatpush3.bf16.msra.mxu0 %v5004_v27  ;;  %v3731_v27 = vpop.f32.mrb[1].mxu0 }
 0x17d   :  { %5007 = vmatprep.subr.bf16.mxu0 %v5006_v46  ;;  %v8991_v46 = vand.u32 4294901760, %v7435_v22 }
 0x17e   :  { %5049 = vmatpush3.bf16.msra.mxu1 %v7392_v9  ;;  %v3732_v9 = vadd.f32 %v3731_v27, %v3730_v33  ;;  %v8996_v33 = vand.u32 4294901760, %v7450_v45  ;;  %v9002_v27 = vld [vmem:[#allocation21_spill] sm:$0xff] }
 0x17f   :  { %v7488_v12 = vsub.f32 %v7435_v22, %v8991_v46  ;;  %v8993_v46 = vand.u32 4294901760, %v7444_v26  ;;  %5083 = vmatprep.subr.bf16.mxu1 %v7089_v62 }
 0x180   :  { %5009 = vmatpush3.bf16.msra.mxu0 %v5008_v18  ;;  %v7524_v62 = vsub.f32 %v7450_v45, %v8996_v33  ;;  %v311_v55 = vadd.f32 %v3732_v9, %v201_v56  ;;  %v9004_v56 = vand.u32 4294901760, %v8964_v5  ;;  %v9006_v18 = vand.u32 4294901760, %v7474_v52 }
 0x181   :  { %v7506_v22 = vsub.f32 %v7444_v26, %v8993_v46  ;;  %5011 = vmatprep.subr.bf16.mxu0 %v5010_v7  ;;  %v7519_v46 = vsub.f32 %v7448_v38, %v8994_v49  ;;  %2511 = vmatmul.mubr.f32.vlgmr.msra.gmra.mrb[14].mxu1 %v8998_v50  ;;  %v8502_v7 = vand.u32 4294901760, %v7483_v24  ;;  %v8501_v49 = vand.u32 4294901760, %v7488_v12 }
 0x182   :  { %8997 = vst [vmem:[#allocation35_spill] sm:$0xff] %v7524_v62  ;;  %v8999_v26 = vand.u32 4294901760, %v7463_v2  ;;  %5085 = vmatpush3.bf16.msra.mxu1 %v7221_v3  ;;  %3690 = vmatprep.mubr.msk.f32.mxu1 %vm59_vm6, %v8631_v59  ;;  %v8503_v50 = vand.u32 4294901760, %v7501_v42  ;;  %v7553_v3 = vadd.f32 %v7430_v15, %v311_v55  ;;  %v9020_v55 = vand.u32 4294901760, %v8968_v8 }
 0x183   :  { %8995 = vst [vmem:[#allocation33_spill] sm:$0xff] %v7519_v46  ;;  %5087 = vmatprep.subr.bf16.mxu1 %v7249_v29  ;;  %v7561_v9 = vpack.c.bf16 %v8501_v49, %v8502_v7  ;;  %v9008_v15 = vand.u32 4294901760, %v7506_v22  ;;  %v9014_v7 = vand.u32 4294901760, %v7510_v57  ;;  %v9026_v8 = vand.u32 4294901760, %v7530_v61 }
 0x184   :  { %v7538_v33 = vpack.c.bf16 %v9000_v63, %v8999_v26  ;;  %5013 = vmatpush3.bf16.msra.mxu0 %v5012_v39  ;;  %v5016_v63 = vpack.c.bf16 %v8929_v13, %v8927_v44  ;;  %v7555_v26 = vld [vmem:[#allocation2 + $0x3a0] sm:$0xff]  ;;  %v9005_v39 = vand.u32 4294901760, %v8965_v21  ;;  %v7570_v44 = vsub.f32 %v7474_v52, %v9006_v18  ;;  %v7573_v13 = vld [vmem:[#allocation2 + $0x3a8] sm:$0xff] }
 0x185   :  { %9003 = vst [vmem:[#allocation37_spill] sm:$0xff] %v7561_v9  ;;  %5015 = vmatprep.subr.bf16.mxu0 %v5014_v40  ;;  %v7579_v49 = vpack.c.bf16 %v9008_v15, %v8503_v50  ;;  %v9010_v21 = vand.u32 4294901760, %v7476_v28  ;;  %v9012_v18 = vand.u32 4294901760, %v7478_v23  ;;  %v7597_v15 = vsub.f32 %v7510_v57, %v9014_v7 }
 0x186   :  { %9001 = vst [vmem:[#allocation36_spill] sm:$0xff] %v7538_v33  ;;  %v5050_v29 = vpack.c.bf16 %v9005_v39, %v9004_v56  ;;  %9007 = vst [vmem:[#allocation38_spill] sm:$0xff] %v7570_v44  ;;  %5089 = vmatpush3.bf16.msra.mxu1 %v7255_v25  ;;  %v9016_v50 = vand.u32 4294901760, %v7512_v58  ;;  %v9018_v25 = vand.u32 4294901760, %v8966_v4  ;;  %v9021_v7 = vand.u32 4294901760, %v8969_v60 }
 0x187   :  { %9009 = vst [vmem:[#allocation39_spill] sm:$0xff] %v7579_v49  ;;  %v7586_v56 = vsub.f32 %v7476_v28, %v9010_v21  ;;  %v7592_v39 = vsub.f32 %v7478_v23, %v9012_v18  ;;  %9015 = vst [vmem:[#allocation42_spill] sm:$0xff] %v7597_v15  ;;  %5091 = vmatprep.subr.bf16.mxu1 %v7279_v16  ;;  %v9019_v18 = vand.u32 4294901760, %v8967_v53  ;;  %v8504_v9 = vand.u32 4294901760, %v7573_v13 }
 0x188   :  { %v7602_v5 = vsub.f32 %v7512_v58, %v9016_v50  ;;  %5017 = vmatpush3.bf16.msra.mxu0 %v5016_v63  ;;  %v5054_v49 = vpack.c.bf16 %v9021_v7, %v9020_v55  ;;  %v9022_v50 = vand.u32 4294901760, %v8970_v30  ;;  %v9023_v21 = vand.u32 4294901760, %v8971_v1  ;;  %v7629_v55 = vld [vmem:[#allocation2 + $0x320] sm:$0xff] }
 0x189   :  { %9011 = vst [vmem:[#allocation13_spill] sm:$0xff] %v7586_v56  ;;  %9013 = vst [vmem:[#allocation41_spill] sm:$0xff] %v7592_v39  ;;  %v5052_v40 = vpack.c.bf16 %v9019_v18, %v9018_v25  ;;  %5051 = vmatprep.subr.bf16.mxu0 %v5050_v29  ;;  %v9024_v16 = vand.u32 4294901760, %v8972_v32  ;;  %v9025_v4 = vand.u32 4294901760, %v8973_v43  ;;  %v8509_v53 = vand.u32 4294901760, %v7570_v44  ;;  %v7631_v29 = vld [vmem:[#allocation2 + $0x328] sm:$0xff] }
 0x18a   :  { %9017 = vst [vmem:[#allocation14_spill] sm:$0xff] %v7602_v5  ;;  %v5056_v63 = vpack.c.bf16 %v9023_v21, %v9022_v50  ;;  %v7627_v60 = vsub.f32 %v7530_v61, %v9026_v8  ;;  %v9028_v30 = vand.u32 4294901760, %v8974_v48  ;;  %v9029_v1 = vand.u32 4294901760, %v8975_v47  ;;  %5093 = vmatpush3.bf16.msra.mxu1 %v7285_v17  ;;  %v7654_v8 = vld [vmem:[#allocation2 + $0x3b0] sm:$0xff] }
 0x18b   :  { %v5058_v33 = vpack.c.bf16 %v9025_v4, %v9024_v16  ;;  %v9030_v32 = vand.u32 4294901760, %v7519_v46  ;;  %v9031_v25 = vand.u32 4294901760, %v7524_v62  ;;  %v8508_v7 = vand.u32 4294901760, %v7586_v56  ;;  %2403 = vmatmul.mubr.f32.vlgmr.msra.gmra.mrb[14].mxu0 %v7354_v35  ;;  %5095 = vmatprep.subr.bf16.mxu1 %v7305_v19 }
 0x18c   :  { %9027 = vst [vmem:[#allocation43_spill] sm:$0xff] %v7627_v60  ;;  %v5060_v21 = vpack.c.bf16 %v9029_v1, %v9028_v30  ;;  %v8507_v50 = vand.u32 4294901760, %v7592_v39  ;;  %v8505_v48 = vand.u32 4294901760, %v7597_v15  ;;  %v8506_v47 = vand.u32 4294901760, %v7602_v5  ;;  %5053 = vmatpush3.bf16.msra.mxu0 %v5052_v40  ;;  %3688 = vmatprep.mubr.msk.f32.mxu0 %vm59_vm6, %v8631_v59 }
 0x18d   :  { %v3016_v43 = vsub.f32 %v7519_v46, %v9030_v32  ;;  %v3023_v18 = vsub.f32 %v7524_v62, %v9031_v25  ;;  %v9032_v16 = vand.u32 4294901760, %v7555_v26  ;;  %v9034_v17 = vand.u32 4294901760, %v8976_v41  ;;  %5055 = vmatprep.subr.bf16.mxu0 %v5054_v49  ;;  %v7869_v46 = vld [vmem:[#allocation2 + $0x3e0] sm:$0xff] }
 0x18e   :  { %v9035_v35 = vand.u32 4294901760, %v8977_v34  ;;  %v7667_v1 = vsub.f32 %v7573_v13, %v8504_v9  ;;  %v9037_v40 = vand.u32 4294901760, %v8978_v14  ;;  %v9039_v34 = vand.u32 4294901760, %v8980_v51  ;;  %5097 = vmatpush3.bf16.msra.mxu1 %v7318_v31 }
 0x18f   :  { %v7652_v4 = vsub.f32 %v7555_v26, %v9032_v16  ;;  %v9038_v16 = vand.u32 4294901760, %v8979_v37  ;;  %v2904_v9 = vsub.f32 %v7570_v44, %v8509_v53  ;;  %v8510_v25 = vand.u32 4294901760, %v7627_v60  ;;  %v7689_v37 = vld [vmem:[#allocation2 + $0x3b8] sm:$0xff]  ;;  %5099 = vmatprep.subr.bf16.mxu1 %v7325_v36  ;;  %v7787_v44 = vld [vmem:[#allocation2 + $0x340] sm:$0xff] }
 0x190   :  { %v5062_v30 = vpack.c.bf16 %v9035_v35, %v9034_v17  ;;  %9036 = vst [vmem:[#allocation16_spill] sm:$0xff] %v7667_v1  ;;  %v9040_v17 = vand.u32 4294901760, %v8981_v54  ;;  %v3017_v32 = vand.u32 4294901760, %v3016_v43  ;;  %v3024_v19 = vand.u32 4294901760, %v3023_v18  ;;  %5057 = vmatpush3.bf16.msra.mxu0 %v5056_v63  ;;  %v7737_v18 = vld [vmem:[#allocation2 + $0x330] sm:$0xff] }
 0x191   :  { %9033 = vst [vmem:[#allocation44_spill] sm:$0xff] %v7652_v4  ;;  %v5064_v41 = vpack.c.bf16 %v9038_v16, %v9037_v40  ;;  %v2911_v14 = vsub.f32 %v7586_v56, %v8508_v7  ;;  %v8511_v51 = vand.u32 4294901760, %v7654_v8  ;;  %v3030_v54 = vsub.f32 %v7592_v39, %v8507_v50  ;;  %5059 = vmatprep.subr.bf16.mxu0 %v5058_v33  ;;  %v9052_v7 = vld [vmem:[#allocation45_spill] sm:$0xff] }
 0x192   :  { %v7680_v35 = vpack.c.bf16 %v9040_v17, %v9039_v34  ;;  %v3037_v49 = vsub.f32 %v7597_v15, %v8505_v48  ;;  %v2918_v43 = vsub.f32 %v7602_v5, %v8506_v47  ;;  %v9041_v40 = vand.u32 4294901760, %v7147_v20  ;;  %v9048_v20 = vld [vmem:[#allocation15_spill] sm:$0xff] }
 0x193   :  { %v9042_v31 = vand.u32 4294901760, %v7152_v11  ;;  %v9043_v17 = vand.u32 4294901760, %v7629_v55  ;;  %v9045_v47 = vand.u32 4294901760, %v7631_v29  ;;  %v9047_v36 = vand.u32 4294901760, %v7157_v0 }
 0x194   :  { %v9049_v63 = vand.u32 4294901760, %v9048_v20  ;;  %v9053_v53 = vand.u32 4294901760, %v9052_v7  ;;  %v7739_v33 = vpack.c.bf16 %v3024_v19, %v3017_v32  ;;  %v2905_v0 = vand.u32 4294901760, %v2904_v9  ;;  %v7746_v7 = vld [vmem:[#allocation2 + $0x338] sm:$0xff]  ;;  %v7754_v9 = vld [vmem:[#allocation2 + $0x3c8] sm:$0xff]  ;;  %5061 = vmatpush3.bf16.msra.mxu0 %v5060_v21 }
 0x195   :  { %v7708_v16 = vpack.c.bf16 %v9042_v31, %v9041_v40  ;;  %v7714_v48 = vsub.f32 %v7629_v55, %v9043_v17  ;;  %v7719_v50 = vsub.f32 %v7631_v29, %v9045_v47  ;;  %v9050_v40 = vld [vmem:[#allocation8_spill] sm:$0xff]  ;;  %v2925_v17 = vsub.f32 %v7627_v60, %v8510_v25  ;;  %5063 = vmatprep.subr.bf16.mxu0 %v5062_v30  ;;  %v9061_v60 = vld [vmem:[#allocation23_spill] sm:$0xff] }
 0x196   :  { %v7725_v11 = vpack.c.bf16 %v9049_v63, %v9047_v36  ;;  %v9051_v31 = vand.u32 4294901760, %v9050_v40  ;;  %v2912_v20 = vand.u32 4294901760, %v2911_v14  ;;  %v7744_v36 = vsub.f32 %v7654_v8, %v8511_v51  ;;  %v9055_v63 = vld [vmem:[#allocation24_spill] sm:$0xff]  ;;  %9066 = vst [vmem:[#allocation8_spill] sm:$0xff] %v7787_v44 }
 0x197   :  { %9044 = vst [vmem:[#allocation17_spill] sm:$0xff] %v7714_v48  ;;  %9046 = vst [vmem:[#allocation18_spill] sm:$0xff] %v7719_v50  ;;  %5101 = vmatpush3.bf16.msra.mxu1 %v9055_v63  ;;  %v3031_v40 = vand.u32 4294901760, %v3030_v54  ;;  %v2919_v25 = vand.u32 4294901760, %v2918_v43  ;;  %v9056_v47 = vand.u32 4294901760, %v7652_v4  ;;  %v9057_v19 = vld [vmem:[#allocation28_spill] sm:$0xff] }
 0x198   :  { %v7731_v34 = vpack.c.bf16 %v9053_v53, %v9051_v31  ;;  %9054 = vst [vmem:[#allocation19_spill] sm:$0xff] %v7744_v36  ;;  %v7748_v53 = vld [vmem:[#allocation2 + $0x3c0] sm:$0xff]  ;;  %v3038_v31 = vand.u32 4294901760, %v3037_v49  ;;  %5103 = vmatprep.subr.bf16.mxu1 %v9057_v19  ;;  %v9058_v14 = vand.u32 4294901760, %v7667_v1  ;;  %v7763_v49 = vpop.permute.xlu1 %65  ;;  %v3835_v43 = vpop.f32.mrb[2].mxu1  ;;  %v9062_v5 = vand.u32 4294901760, %v9061_v60  ;;  %5065 = vmatpush3.bf16.msra.mxu0 %v5064_v41 }
 0x199   :  { %v3044_v32 = vsub.f32 %v7652_v4, %v9056_v47  ;;  %v2926_v47 = vand.u32 4294901760, %v2925_v17  ;;  %v9059_v4 = vand.u32 4294901760, %v7689_v37  ;;  %v9063_v63 = vld [vmem:[#allocation46_spill] sm:$0xff]  ;;  %v7778_v39 = vpack.c.bf16 %v2912_v20, %v2905_v0  ;;  %v7809_v41 = vld [vmem:[#allocation2 + $0x3d0] sm:$0xff]  ;;  %5067 = vmatprep.subr.bf16.mxu0 %v7680_v35 }
 0x19a   :  { %v3051_v51 = vsub.f32 %v7667_v1, %v9058_v14  ;;  %v3836_v1 = vpop.f32.mrb[3].mxu1  ;;  %v9064_v15 = vand.u32 4294901760, %v9063_v63  ;;  %v7785_v19 = vpack.c.bf16 %v3038_v31, %v3031_v40  ;;  %vm68_vm8 = vcmp.eq.s32.totalorder %v9002_v27, %v7763_v49  ;;  %9073 = vst [vmem:[#allocation28_spill] sm:$0xff] %v7809_v41 }
 0x19b   :  { %v7768_v21 = vsub.f32 %v7689_v37, %v9059_v4  ;;  %v7782_v56 = vadd.f32 %v3836_v1, %v3835_v43  ;;  %v9065_v4 = vld [vmem:[#allocation26_spill] sm:$0xff]  ;;  %v3045_v14 = vand.u32 4294901760, %v3044_v32  ;;  %v9068_v60 = vand.u32 4294901760, %v7714_v48  ;;  %v7807_v32 = vld [vmem:[#allocation2 + $0x348] sm:$0xff] }
 0x19c   :  { %v7776_v54 = vpack.c.bf16 %v9064_v15, %v9062_v5  ;;  %5105 = vmatpush3.bf16.msra.mxu1 %v9065_v4  ;;  %v9067_v5 = vld [vmem:[#allocation27_spill] sm:$0xff]  ;;  %v3052_v15 = vand.u32 4294901760, %v3051_v51  ;;  %v9069_v1 = vand.u32 4294901760, %v7719_v50  ;;  %v9070_v40 = vand.u32 4294901760, %v7737_v18  ;;  %9072 = vst [vmem:[#allocation24_spill] sm:$0xff] %v7807_v32  ;;  %v7811_v51 = vld [vmem:[#allocation2 + $0x3d8] sm:$0xff]  ;;  %5069 = vmatpush3.bf16.msra.mxu0 %v7708_v16 }
 0x19d   :  { %9060 = vst [vmem:[#allocation15_spill] sm:$0xff] %v7768_v21  ;;  %5107 = vmatprep.subr.bf16.mxu1 %v9067_v5  ;;  %v7795_v0 = vsub.f32 %v7714_v48, %v9068_v60  ;;  %v7814_v63 = vpack.c.bf16 %v2926_v47, %v2919_v25  ;;  %v9074_v4 = vand.u32 4294901760, %v7746_v7  ;;  %v9076_v60 = vand.u32 4294901760, %v7748_v53  ;;  %5071 = vmatprep.subr.bf16.mxu0 %v7725_v11 }
 0x19e   :  { %v7800_v20 = vsub.f32 %v7719_v50, %v9069_v1  ;;  %v7805_v31 = vsub.f32 %v7737_v18, %v9070_v40  ;;  %v9078_v40 = vand.u32 4294901760, %v7448_v38  ;;  %v9079_v17 = vand.u32 4294901760, %v7450_v45  ;;  %v9084_v38 = vld [vmem:[#allocation40_spill] sm:$0xff]  ;;  %v7854_v50 = vld [vmem:[#allocation2 + $0x358] sm:$0xff] }
 0x19f   :  { %v7820_v5 = vsub.f32 %v7746_v7, %v9074_v4  ;;  %v7825_v1 = vsub.f32 %v7748_v53, %v9076_v60  ;;  %v9080_v25 = vand.u32 4294901760, %v7744_v36  ;;  %v9081_v47 = vand.u32 4294901760, %v7754_v9 }
 0x1a0   :  { %9071 = vst [vmem:[#allocation45_spill] sm:$0xff] %v7805_v31  ;;  %v7831_v30 = vpack.c.bf16 %v9079_v17, %v9078_v40  ;;  %v9083_v43 = vmov 0.0   ;;  %5109 = vmatpush3.bf16.msra.mxu1 %v9084_v38  ;;  %v7858_v48 = vpack.c.bf16 %v3052_v15, %v3045_v14  ;;  %v2933_v38 = vand.u32 4294901760, %v7795_v0  ;;  %v7871_v14 = vld [vmem:[#allocation2 + $0x3e8] sm:$0xff]  ;;  %v3800_v0 = vpop.f32.mrb[2].mxu0  ;;  %5073 = vmatpush3.bf16.msra.mxu0 %v7731_v34 }
 0x1a1   :  { %9075 = vst [vmem:[#allocation23_spill] sm:$0xff] %v7820_v5  ;;  %9077 = vst [vmem:[#allocation46_spill] sm:$0xff] %v7825_v1  ;;  %v7836_v35 = vsub.f32 %v7744_v36, %v9080_v25  ;;  %v7841_v4 = vsub.f32 %v7754_v9, %v9081_v47  ;;  %v3673_v60 = vsel %vm68_vm8, 1.0, %v9083_v43  ;;  %v7852_v36 = vld [vmem:[#allocation2 + $0x350] sm:$0xff]  ;;  %v2940_v45 = vand.u32 4294901760, %v7800_v20  ;;  %5075 = vmatprep.subr.bf16.mxu0 %v7776_v54 }
 0x1a2   :  { %v9085_v47 = vld [vmem:[#allocation9_spill] sm:$0xff]  ;;  %v9086_v25 = vand.u32 4294901760, %v7768_v21  ;;  %9087 = vst [vmem:[#allocation27_spill] sm:$0xff] %v7871_v14  ;;  %v7873_v15 = vsub.f32 %v3673_v60, %v3673_v60  ;;  %v9089_v16 = vand.u32 4294901760, %v7787_v44  ;;  %v9090_v60 = vand.u32 4294901760, %v7807_v32 }
 0x1a3   :  { %9082 = vst [vmem:[#allocation26_spill] sm:$0xff] %v7841_v4  ;;  %5111 = vmatprep.subr.bf16.mxu1 %v9085_v47  ;;  %v3059_v20 = vand.u32 4294901760, %v7836_v35  ;;  %v9091_v35 = vand.u32 4294901760, %v7809_v41  ;;  %v9092_v17 = vand.u32 4294901760, %v7811_v51  ;;  %v9097_v54 = vand.u32 4294901760, %v7841_v4 }
 0x1a4   :  { %v3065_v40 = vsub.f32 %v7768_v21, %v9086_v25  ;;  %v3801_v25 = vpop.f32.mrb[3].mxu0  ;;  %v9088_v21 = vld [vmem:[#allocation10_spill] sm:$0xff]  ;;  %v7883_v62 = vsub.f32 %v7787_v44, %v9089_v16  ;;  %v7888_v43 = vsub.f32 %v7807_v32, %v9090_v60  ;;  %v9093_v16 = vand.u32 4294901760, %v7805_v31 }
 0x1a5   :  { %5113 = vmatpush3.bf16.msra.mxu1 %v9088_v21  ;;  %v7893_v47 = vsub.f32 %v7809_v41, %v9091_v35  ;;  %v7898_v11 = vsub.f32 %v7811_v51, %v9092_v17  ;;  %v3802_v21 = vadd.f32 %v3801_v25, %v3800_v0  ;;  %v9094_v41 = vand.u32 4294901760, %v7820_v5 }
 0x1a6   :  { %5147 = vmatprep.subr.bf16.mxu1 %v7739_v33  ;;  %v2946_v60 = vsub.f32 %v7805_v31, %v9093_v16  ;;  %v3066_v35 = vand.u32 4294901760, %v3065_v40  ;;  %v9095_v0 = vand.u32 4294901760, %v7825_v1  ;;  %v9096_v16 = vld [vmem:[#allocation20_spill] sm:$0xff]  ;;  %v3079_v40 = vsub.f32 %v7841_v4, %v9097_v54 }
 0x1a7   :  { %v2953_v17 = vsub.f32 %v7820_v5, %v9094_v41  ;;  %v681_v25 = vadd.f32 %v3802_v21, %v7553_v3  ;;  %v9098_v44 = vand.u32 4294901760, %v7852_v36  ;;  %v9102_v21 = vand.u32 4294901760, %v7871_v14  ;;  %v9103_v3 = vld [vmem:[#allocation30_spill] sm:$0xff] }
 0x1a8   :  { %v3072_v34 = vsub.f32 %v7825_v1, %v9095_v0  ;;  %3691 = vmatmul.mubr.msk.f32.vlgmr.msra.gmra.mrb[16].mxu1 %vm58_vm7, %v8631_v59  ;;  %v9099_v0 = vand.u32 4294901760, %v7854_v50  ;;  %v5156_v27 = vpack.c.bf16 %v2940_v45, %v2933_v38  ;;  %v2947_v1 = vand.u32 4294901760, %v2946_v60 }
 0x1a9   :  { %v7926_v41 = vsub.f32 %v7852_v36, %v9098_v44  ;;  %5149 = vmatpush3.bf16.msra.mxu1 %v7778_v39  ;;  %3692 = vmatprep.mubr.msk.f32.mxu1 %vm68_vm8, %v8631_v59  ;;  %v9100_v44 = vld [vmem:[#allocation29_spill] sm:$0xff]  ;;  %v7952_v32 = vsub.f32 %v7871_v14, %v9102_v21  ;;  %v7955_v54 = vadd.f32 %v7782_v56, %v681_v25  ;;  %v2954_v21 = vand.u32 4294901760, %v2953_v17  ;;  %v9111_v17 = vld [vmem:[#allocation34_spill] sm:$0xff] }
 0x1aa   :  { %v7931_v33 = vsub.f32 %v7854_v50, %v9099_v0  ;;  %5077 = vmatpush3.bf16.msra.mxu0 %v9100_v44  ;;  %5151 = vmatprep.subr.bf16.mxu1 %v7785_v19  ;;  %v9101_v0 = vand.u32 4294901760, %v7869_v46  ;;  %v9104_v44 = vand.u32 4294901760, %v7474_v52  ;;  %v9105_v19 = vand.u32 4294901760, %v7476_v28 }
 0x1ab   :  { %5079 = vmatprep.subr.bf16.mxu0 %v9103_v3  ;;  %v5158_v31 = vpack.c.bf16 %v3066_v35, %v3059_v20  ;;  %v8556_v14 = vand.u32 4294901760, %v7926_v41  ;;  %v9107_v45 = vand.u32 4294901760, %v7883_v62  ;;  %v9108_v28 = vand.u32 4294901760, %v7888_v43 }
 0x1ac   :  { %v7947_v39 = vsub.f32 %v7869_v46, %v9101_v0  ;;  %v7962_v4 = vpack.c.bf16 %v9105_v19, %v9104_v44  ;;  %v9106_v0 = vand.u32 4294901760, %v7873_v15  ;;  %v8555_v56 = vand.u32 4294901760, %v7931_v33 }
 0x1ad   :  { %5153 = vmatpush3.bf16.msra.mxu1 %v7814_v63  ;;  %v2960_v52 = vsub.f32 %v7883_v62, %v9107_v45  ;;  %v2967_v38 = vsub.f32 %v7888_v43, %v9108_v28  ;;  %v9109_v60 = vand.u32 4294901760, %v7893_v47  ;;  %v9110_v20 = vand.u32 4294901760, %v7898_v11 }
 0x1ae   :  { %v2887_v5 = vsub.f32 %v7873_v15, %v9106_v0  ;;  %5081 = vmatpush3.bf16.msra.mxu0 %v9111_v17  ;;  %5155 = vmatprep.subr.bf16.mxu1 %v7858_v48  ;;  %v3073_v63 = vand.u32 4294901760, %v3072_v34  ;;  %v3080_v3 = vand.u32 4294901760, %v3079_v40  ;;  %v8554_v44 = vand.u32 4294901760, %v7947_v39 }
 0x1af   :  { %v3086_v25 = vsub.f32 %v7893_v47, %v9109_v60  ;;  %v3093_v35 = vsub.f32 %v7898_v11, %v9110_v20  ;;  %v8553_v19 = vand.u32 4294901760, %v7952_v32  ;;  %5115 = vmatprep.subr.bf16.mxu0 %v7831_v30  ;;  %v9112_v0 = vand.u32 4294901760, %v7478_v23 }
 0x1b0   :  { %v9113_v45 = vand.u32 4294901760, %v7510_v57  ;;  %v2888_v60 = vand.u32 4294901760, %v2887_v5  ;;  %v5160_v20 = vpack.c.bf16 %v2954_v21, %v2947_v1  ;;  %v9114_v17 = vand.u32 4294901760, %v7512_v58 }
 0x1b1   :  { %v9115_v48 = vand.u32 4294901760, %v7530_v61  ;;  %v2974_v40 = vsub.f32 %v7926_v41, %v8556_v14  ;;  %v2981_v23 = vsub.f32 %v7931_v33, %v8555_v56  ;;  %3689 = vmatmul.mubr.msk.f32.vlgmr.msra.gmra.mrb[16].mxu0 %vm58_vm7, %v8631_v59  ;;  %5157 = vmatpush3.bf16.msra.mxu1 %v5156_v27  ;;  %v2961_v57 = vand.u32 4294901760, %v2960_v52 }
 0x1b2   :  { %v7991_v28 = vpack.c.bf16 %v9113_v45, %v9112_v0  ;;  %v2968_v58 = vand.u32 4294901760, %v2967_v38  ;;  %v3087_v5 = vand.u32 4294901760, %v3086_v25  ;;  %v3094_v61 = vand.u32 4294901760, %v3093_v35  ;;  %5117 = vmatpush3.bf16.msra.mxu0 %v7962_v4  ;;  %5159 = vmatprep.subr.bf16.mxu1 %v5158_v31 }
 0x1b3   :  { %v7997_v34 = vpack.c.bf16 %v9115_v48, %v9114_v17  ;;  %v5162_v1 = vpack.c.bf16 %v3080_v3, %v3073_v63  ;;  %v3100_v21 = vsub.f32 %v7947_v39, %v8554_v44  ;;  %v3107_v0 = vsub.f32 %v7952_v32, %v8553_v19  ;;  %2889 = vmatprep.mubr.f32.mxu0 %v2888_v60 }
 0x1b4   :  { %5119 = vmatprep.subr.bf16.mxu0 %v7991_v28  ;;  %v9116_v10 = vand.u32 4294901760, %v7555_v26  ;;  %v9117_v27 = vand.u32 4294901760, %v7573_v13  ;;  %v9118_v31 = vand.u32 4294901760, %v7629_v55  ;;  %v9119_v38 = vand.u32 4294901760, %v7631_v29 }
 0x1b5   :  { %v2975_v35 = vand.u32 4294901760, %v2974_v40  ;;  %v2982_v63 = vand.u32 4294901760, %v2981_v23  ;;  %5161 = vmatpush3.bf16.msra.mxu1 %v5160_v20  ;;  %v5164_v3 = vpack.c.bf16 %v2968_v58, %v2961_v57  ;;  %v5166_v45 = vpack.c.bf16 %v3094_v61, %v3087_v5 }
 0x1b6   :  { %v8021_v52 = vpack.c.bf16 %v9117_v27, %v9116_v10  ;;  %v8027_v25 = vpack.c.bf16 %v9119_v38, %v9118_v31  ;;  %v9120_v17 = vand.u32 4294901760, %v7463_v2  ;;  %v9121_v13 = vand.u32 4294901760, %v7468_v6  ;;  %5121 = vmatpush3.bf16.msra.mxu0 %v7997_v34  ;;  %5163 = vmatprep.subr.bf16.mxu1 %v5162_v1 }
 0x1b7   :  { %v3101_v55 = vand.u32 4294901760, %v3100_v21  ;;  %v3108_v29 = vand.u32 4294901760, %v3107_v0  ;;  %v9122_v60 = vand.u32 4294901760, %v7483_v24  ;;  %v9123_v20 = vand.u32 4294901760, %v7488_v12 }
 0x1b8   :  { %v2988_v26 = vsub.f32 %v7463_v2, %v9120_v17  ;;  %v2995_v48 = vsub.f32 %v7468_v6, %v9121_v13  ;;  %5123 = vmatprep.subr.bf16.mxu0 %v8021_v52  ;;  %v9124_v57 = vand.u32 4294901760, %v7654_v8  ;;  %v9125_v58 = vand.u32 4294901760, %v7689_v37  ;;  %v3905_v17 = vpop.f32.mrb[4].mxu1 }
 0x1b9   :  { %v3114_v40 = vsub.f32 %v7483_v24, %v9122_v60  ;;  %v3121_v23 = vsub.f32 %v7488_v12, %v9123_v20  ;;  %v5168_v61 = vpack.c.bf16 %v2982_v63, %v2975_v35  ;;  %5165 = vmatpush3.bf16.msra.mxu1 %v5164_v3  ;;  %v9126_v0 = vand.u32 4294901760, %v7501_v42  ;;  %v3906_v60 = vpop.f32.mrb[5].mxu1  ;;  %v9134_v20 = vld [vmem:[#allocation24_spill] sm:$0xff] }
 0x1ba   :  { %v8047_v5 = vpack.c.bf16 %v9125_v58, %v9124_v57  ;;  %v2989_v1 = vand.u32 4294901760, %v2988_v26  ;;  %v2996_v21 = vand.u32 4294901760, %v2995_v48  ;;  %v9127_v27 = vand.u32 4294901760, %v7506_v22  ;;  %5125 = vmatpush3.bf16.msra.mxu0 %v8027_v25  ;;  %5167 = vmatprep.subr.bf16.mxu1 %v5166_v45  ;;  %v9136_v57 = vld [vmem:[#allocation28_spill] sm:$0xff] }
 0x1bb   :  { %v3002_v10 = vsub.f32 %v7501_v42, %v9126_v0  ;;  %v9128_v8 = vand.u32 4294901760, %v7737_v18  ;;  %v9129_v37 = vand.u32 4294901760, %v7746_v7  ;;  %v5170_v35 = vpack.c.bf16 %v3108_v29, %v3101_v55  ;;  %v9132_v29 = vld [vmem:[#allocation8_spill] sm:$0xff] }
 0x1bc   :  { %v3009_v31 = vsub.f32 %v7506_v22, %v9127_v27  ;;  %v3115_v63 = vand.u32 4294901760, %v3114_v40  ;;  %v3122_v3 = vand.u32 4294901760, %v3121_v23  ;;  %5127 = vmatprep.subr.bf16.mxu0 %v8047_v5  ;;  %v9130_v26 = vand.u32 4294901760, %v7748_v53 }
 0x1bd   :  { %v8060_v38 = vpack.c.bf16 %v9129_v37, %v9128_v8  ;;  %v9131_v13 = vand.u32 4294901760, %v7754_v9  ;;  %vm67_vm9 = vcmp.eq.s32.totalorder %v9096_v16, %v7763_v49  ;;  %v3907_v18 = vadd.f32 %v3906_v60, %v3905_v17  ;;  %5169 = vmatpush3.bf16.msra.mxu1 %v5168_v61  ;;  %v3870_v17 = vpop.f32.mrb[4].mxu0  ;;  %v9147_v60 = vld [vmem:[#allocation12_spill] sm:$0xff] }
 0x1be   :  { %v5172_v7 = vpack.c.bf16 %v2996_v21, %v2989_v1  ;;  %v3003_v45 = vand.u32 4294901760, %v3002_v10  ;;  %v3010_v55 = vand.u32 4294901760, %v3009_v31  ;;  %5171 = vmatprep.subr.bf16.mxu1 %v5170_v35  ;;  %v9133_v40 = vand.u32 4294901760, %v9132_v29  ;;  %v9143_v35 = vld [vmem:[#allocation27_spill] sm:$0xff] }
 0x1bf   :  { %v8067_v48 = vpack.c.bf16 %v9131_v13, %v9130_v26  ;;  %5129 = vmatpush3.bf16.msra.mxu0 %v8060_v38  ;;  %v9135_v53 = vand.u32 4294901760, %v9134_v20  ;;  %v5174_v9 = vpack.c.bf16 %v3122_v3, %v3115_v63  ;;  %v9137_v58 = vand.u32 4294901760, %v9136_v57  ;;  %v3871_v26 = vpop.f32.mrb[5].mxu0 }
 0x1c0   :  { %v9138_v0 = vand.u32 4294901760, %v7811_v51  ;;  %v9139_v1 = vmov 0.0   ;;  %v5176_v10 = vpack.c.bf16 %v3010_v55, %v3003_v45  ;;  %v9140_v27 = vand.u32 4294901760, %v7852_v36  ;;  %v9149_v55 = vld [vmem:[#allocation22_spill] sm:$0xff] }
 0x1c1   :  { %v8076_v23 = vpack.c.bf16 %v9135_v53, %v9133_v40  ;;  %5131 = vmatprep.subr.bf16.mxu0 %v8067_v48  ;;  %v3672_v21 = vsel %vm67_vm9, 1.0, %v9139_v1  ;;  %5173 = vmatpush3.bf16.msra.mxu1 %v5172_v7  ;;  %v9141_v31 = vand.u32 4294901760, %v7854_v50  ;;  %v9142_v51 = vand.u32 4294901760, %v7869_v46  ;;  %v9145_v50 = vld [vmem:[#allocation11_spill] sm:$0xff]  ;;  %v9151_v40 = vld [vmem:[#allocation25_spill] sm:$0xff]  ;;  %v9156_v1 = vld [vmem:[#allocation32_spill] sm:$0xff] }
 0x1c2   :  { %v8083_v61 = vpack.c.bf16 %v9138_v0, %v9137_v58  ;;  %5175 = vmatprep.subr.bf16.mxu1 %v5174_v9  ;;  %v8096_v37 = vsub.f32 %v3672_v21, %v3672_v21  ;;  %v9144_v63 = vand.u32 4294901760, %v9143_v35  ;;  %v3872_v13 = vadd.f32 %v3871_v26, %v3870_v17  ;;  %v9154_v58 = vld [vmem:[#allocation31_spill] sm:$0xff]  ;;  %v9161_v17 = vld [vmem:[#allocation13_spill] sm:$0xff] }
 0x1c3   :  { %5133 = vmatpush3.bf16.msra.mxu0 %v8076_v23  ;;  %v8094_v8 = vpack.c.bf16 %v9141_v31, %v9140_v27  ;;  %v9146_v36 = vand.u32 4294901760, %v9145_v50  ;;  %v9148_v7 = vand.u32 4294901760, %v9147_v60  ;;  %v9150_v29 = vand.u32 4294901760, %v9149_v55  ;;  %v9158_v31 = vld [vmem:[#allocation33_spill] sm:$0xff]  ;;  %v9163_v50 = vld [vmem:[#allocation42_spill] sm:$0xff] }
 0x1c4   :  { %5135 = vmatprep.subr.bf16.mxu0 %v8083_v61  ;;  %v8103_v3 = vpack.c.bf16 %v9144_v63, %v9142_v51  ;;  %v2892_v46 = vand.u32 4294901760, %v8096_v37  ;;  %v9152_v20 = vand.u32 4294901760, %v9151_v40  ;;  %v957_v9 = vadd.f32 %v3872_v13, %v7955_v54  ;;  %v9159_v51 = vld [vmem:[#allocation35_spill] sm:$0xff]  ;;  %v9160_v63 = vld [vmem:[#allocation38_spill] sm:$0xff]  ;;  %v9167_v40 = vld [vmem:[#allocation16_spill] sm:$0xff] }
 0x1c5   :  { %5177 = vmatpush3.bf16.msra.mxu1 %v5176_v10  ;;  %v8111_v45 = vpack.c.bf16 %v9148_v7, %v9146_v36  ;;  %v9153_v57 = vand.u32 4294901760, %v7873_v15  ;;  %v9155_v0 = vand.u32 4294901760, %v9154_v58  ;;  %v9157_v21 = vand.u32 4294901760, %v9156_v1  ;;  %v9164_v60 = vld [vmem:[#allocation14_spill] sm:$0xff]  ;;  %v9165_v7 = vld [vmem:[#allocation43_spill] sm:$0xff] }
 0x1c6   :  { %5211 = vmatprep.subr.bf16.mxu1 %v7831_v30  ;;  %v8119_v53 = vpack.c.bf16 %v9152_v20, %v9150_v29  ;;  %v1061_v54 = vadd.f32 %v3907_v18, %v957_v9  ;;  %v2893_v27 = vsub.f32 %v8096_v37, %v2892_v46  ;;  %v5178_v35 = vpack.c.bf16 %v9159_v51, %v9158_v31  ;;  %v9162_v18 = vld [vmem:[#allocation41_spill] sm:$0xff]  ;;  %v9166_v29 = vld [vmem:[#allocation44_spill] sm:$0xff] }
 0x1c7   :  { %5137 = vmatpush3.bf16.msra.mxu0 %v8094_v8  ;;  %v8135_v10 = vpack.c.bf16 %v9157_v21, %v9155_v0  ;;  %v5180_v26 = vpack.c.bf16 %v9161_v17, %v9160_v63  ;;  %v5182_v36 = vpack.c.bf16 %v9163_v50, %v9162_v18  ;;  %v5184_v55 = vpack.c.bf16 %v9165_v7, %v9164_v60  ;;  %v9168_v9 = vld [vmem:[#allocation17_spill] sm:$0xff]  ;;  %v9170_v0 = vld [vmem:[#allocation19_spill] sm:$0xff] }
 0x1c8   :  { %5139 = vmatprep.subr.bf16.mxu0 %v8103_v3  ;;  %3693 = vmatmul.mubr.msk.f32.vlgmr.msra.gmra.mrb[18].mxu1 %vm67_vm9, %v8631_v59  ;;  %v2894_v13 = vand.u32 4294901760, %v2893_v27  ;;  %v5186_v20 = vpack.c.bf16 %v9167_v40, %v9166_v29  ;;  %v9172_v21 = vld [vmem:[#allocation45_spill] sm:$0xff]  ;;  %v9173_v27 = vld [vmem:[#allocation23_spill] sm:$0xff]  ;;  %v5206_v56 = vpack.c.bf16 %v7488_v12, %v7483_v24  ;;  %v9177_v12 = vand.u32 4294901760, %v9158_v31 }
 0x1c9   :  { %5213 = vmatpush3.bf16.msra.mxu1 %v7962_v4  ;;  %3369 = vmatprep.mubr.f32.mxu1 %v9153_v57  ;;  %v9169_v57 = vld [vmem:[#allocation18_spill] sm:$0xff]  ;;  %v9178_v24 = vand.u32 4294901760, %v9159_v51 }
 0x1ca   :  { %5215 = vmatprep.subr.bf16.mxu1 %v7991_v28  ;;  %v5188_v58 = vpack.c.bf16 %v9169_v57, %v9168_v9  ;;  %v9188_v31 = vand.u32 4294901760, %v9169_v57 }
 0x1cb   :  { %5141 = vmatpush3.bf16.msra.mxu0 %v8111_v45 }
 0x1cc   :  { %5143 = vmatprep.subr.bf16.mxu0 %v8119_v53 }
 0x1cd   :  { %5217 = vmatpush3.bf16.msra.mxu1 %v7997_v34 }
 0x1ce   :  { %5219 = vmatprep.subr.bf16.mxu1 %v8021_v52 }
 0x1cf   :  { %5145 = vmatpush3.bf16.msra.mxu0 %v8135_v10 }
 0x1d0   :  { %5179 = vmatprep.subr.bf16.mxu0 %v5178_v35  ;;  %v5192_v35 = vpack.c.bf16 %v9173_v27, %v9172_v21 }
 0x1d1   :  { %5221 = vmatpush3.bf16.msra.mxu1 %v8027_v25 }
 0x1d2   :  { %2895 = vmatmul.mubr.f32.vlgmr.msra.gmra.mrb[18].mxu0 %v2894_v13  ;;  %5223 = vmatprep.subr.bf16.mxu1 %v8047_v5  ;;  %v9174_v13 = vld [vmem:[#allocation46_spill] sm:$0xff] }
 0x1d3   :  { %5181 = vmatpush3.bf16.msra.mxu0 %v5180_v26  ;;  %3262 = vmatprep.mubr.f32.mxu0 %v7873_v15  ;;  %v9171_v15 = vld [vmem:[#allocation15_spill] sm:$0xff]  ;;  %v3975_v26 = vpop.f32.mrb[6].mxu1 }
 0x1d4   :  { %5183 = vmatprep.subr.bf16.mxu0 %v5182_v36  ;;  %v5190_v1 = vpack.c.bf16 %v9171_v15, %v9170_v0  ;;  %v9175_v36 = vld [vmem:[#allocation26_spill] sm:$0xff]  ;;  %v3976_v19 = vpop.f32.mrb[7].mxu1 }
 0x1d5   :  { %5225 = vmatpush3.bf16.msra.mxu1 %v8060_v38  ;;  %v3977_v44 = vadd.f32 %v3976_v19, %v3975_v26  ;;  %v5200_v19 = vpack.c.bf16 %v7931_v33, %v7926_v41 }
 0x1d6   :  { %5227 = vmatprep.subr.bf16.mxu1 %v8067_v48 }
 0x1d7   :  { %5185 = vmatpush3.bf16.msra.mxu0 %v5184_v55  ;;  %v5194_v55 = vpack.c.bf16 %v9175_v36, %v9174_v13 }
 0x1d8   :  { %5187 = vmatprep.subr.bf16.mxu0 %v5186_v20  ;;  %v5196_v20 = vpack.c.bf16 %v7888_v43, %v7883_v62 }
 0x1d9   :  { %5229 = vmatpush3.bf16.msra.mxu1 %v8076_v23 }
 0x1da   :  { %5231 = vmatprep.subr.bf16.mxu1 %v8083_v61 }
 0x1db   :  { %5189 = vmatpush3.bf16.msra.mxu0 %v5188_v58  ;;  %v5198_v58 = vpack.c.bf16 %v7898_v11, %v7893_v47 }
 0x1dc   :  { %5191 = vmatprep.subr.bf16.mxu0 %v5190_v1  ;;  %v5202_v1 = vpack.c.bf16 %v7952_v32, %v7947_v39 }
 0x1dd   :  { %5233 = vmatpush3.bf16.msra.mxu1 %v8094_v8 }
 0x1de   :  { %5235 = vmatprep.subr.bf16.mxu1 %v8103_v3 }
 0x1df   :  { %5193 = vmatpush3.bf16.msra.mxu0 %v5192_v35  ;;  %v3940_v35 = vpop.f32.mrb[6].mxu0 }
 0x1e0   :  { %5195 = vmatprep.subr.bf16.mxu0 %v5194_v55  ;;  %v3941_v26 = vpop.f32.mrb[7].mxu0 }
 0x1e1   :  { %5237 = vmatpush3.bf16.msra.mxu1 %v8111_v45  ;;  %v3942_v55 = vadd.f32 %v3941_v26, %v3940_v35 }
 0x1e2   :  { %5239 = vmatprep.subr.bf16.mxu1 %v8119_v53 }
 0x1e3   :  { %5197 = vmatpush3.bf16.msra.mxu0 %v5196_v20  ;;  %v5204_v20 = vpack.c.bf16 %v7468_v6, %v7463_v2  ;;  %v1173_v14 = vadd.f32 %v3942_v55, %v1061_v54  ;;  %v5208_v2 = vpack.c.bf16 %v7506_v22, %v7501_v42  ;;  %v9181_v22 = vand.u32 4294901760, %v9162_v18 }
 0x1e4   :  { %5199 = vmatprep.subr.bf16.mxu0 %v5198_v58  ;;  %v9182_v42 = vand.u32 4294901760, %v9163_v50 }
 0x1e5   :  { %5241 = vmatpush3.bf16.msra.mxu1 %v8135_v10  ;;  %v1405_v6 = vadd.f32 %v3977_v44, %v1173_v14  ;;  %v9184_v44 = vand.u32 4294901760, %v9165_v7  ;;  %v9194_v7 = vand.u32 4294901760, %v9175_v36 }
 0x1e6   :  { %5275 = vmatprep.subr.bf16.mxu1 %v7831_v30  ;;  %v5242_v30 = vpack.c.bf16 %v9178_v24, %v9177_v12  ;;  %v5246_v14 = vpack.c.bf16 %v9182_v42, %v9181_v22 }
 0x1e7   :  { %5201 = vmatpush3.bf16.msra.mxu0 %v5200_v19 }
 0x1e8   :  { %5203 = vmatprep.subr.bf16.mxu0 %v5202_v1  ;;  %3373 = vmatmul.mubr.f32.vlgmr.msra.gmra.mrb[20].mxu1 %v2892_v46  ;;  %v9180_v46 = vand.u32 4294901760, %v9161_v17 }
 0x1e9   :  { %5277 = vmatpush3.bf16.msra.mxu1 %v7962_v4  ;;  %3696 = vmatprep.mubr.msk.f32.mxu1 %vm68_vm8, %v8631_v59  ;;  %v9179_v4 = vand.u32 4294901760, %v9160_v63  ;;  %v9189_v63 = vand.u32 4294901760, %v9170_v0  ;;  %v9197_v0 = vand.u32 4294901760, %v7893_v47 }
 0x1ea   :  { %5279 = vmatprep.subr.bf16.mxu1 %v7991_v28 }
 0x1eb   :  { %5205 = vmatpush3.bf16.msra.mxu0 %v5204_v20  ;;  %v5244_v28 = vpack.c.bf16 %v9180_v46, %v9179_v4 }
 0x1ec   :  { %5207 = vmatprep.subr.bf16.mxu0 %v5206_v56  ;;  %v9183_v56 = vand.u32 4294901760, %v9164_v60  ;;  %v9193_v60 = vand.u32 4294901760, %v9174_v13 }
 0x1ed   :  { %5281 = vmatpush3.bf16.msra.mxu1 %v7997_v34  ;;  %v4045_v50 = vpop.f32.mrb[8].mxu1 }
 0x1ee   :  { %5283 = vmatprep.subr.bf16.mxu1 %v8021_v52  ;;  %v5248_v34 = vpack.c.bf16 %v9184_v44, %v9183_v56  ;;  %v9185_v52 = vand.u32 4294901760, %v9166_v29  ;;  %v5258_v29 = vpack.c.bf16 %v9194_v7, %v9193_v60 }
 0x1ef   :  { %5209 = vmatpush3.bf16.msra.mxu0 %v5208_v2 }
 0x1f0   :  { %5243 = vmatprep.subr.bf16.mxu0 %v5242_v30 }
 0x1f1   :  { %5285 = vmatpush3.bf16.msra.mxu1 %v8027_v25  ;;  %v9187_v25 = vand.u32 4294901760, %v9168_v9 }
 0x1f2   :  { %3265 = vmatmul.mubr.f32.vlgmr.msra.gmra.mrb[20].mxu0 %v8096_v37  ;;  %5287 = vmatprep.subr.bf16.mxu1 %v8047_v5  ;;  %v9186_v37 = vand.u32 4294901760, %v9167_v40  ;;  %v9190_v5 = vand.u32 4294901760, %v9171_v15  ;;  %v4046_v40 = vpop.f32.mrb[9].mxu1  ;;  %v9198_v15 = vand.u32 4294901760, %v7898_v11 }
 0x1f3   :  { %5245 = vmatpush3.bf16.msra.mxu0 %v5244_v28  ;;  %3694 = vmatprep.mubr.msk.f32.mxu0 %vm68_vm8, %v8631_v59  ;;  %v5252_v51 = vpack.c.bf16 %v9188_v31, %v9187_v25  ;;  %v4047_v9 = vadd.f32 %v4046_v40, %v4045_v50 }
 0x1f4   :  { %5247 = vmatprep.subr.bf16.mxu0 %v5246_v14  ;;  %v5250_v54 = vpack.c.bf16 %v9186_v37, %v9185_v52  ;;  %v5254_v17 = vpack.c.bf16 %v9190_v5, %v9189_v63 }
 0x1f5   :  { %5289 = vmatpush3.bf16.msra.mxu1 %v8060_v38  ;;  %v9191_v38 = vand.u32 4294901760, %v9172_v21  ;;  %v5262_v21 = vpack.c.bf16 %v9198_v15, %v9197_v0 }
 0x1f6   :  { %5291 = vmatprep.subr.bf16.mxu1 %v8067_v48  ;;  %v9192_v48 = vand.u32 4294901760, %v9173_v27 }
 0x1f7   :  { %5249 = vmatpush3.bf16.msra.mxu0 %v5248_v34  ;;  %v4010_v47 = vpop.f32.mrb[8].mxu0 }
 0x1f8   :  { %5251 = vmatprep.subr.bf16.mxu0 %v5250_v54  ;;  %v5256_v18 = vpack.c.bf16 %v9192_v48, %v9191_v38  ;;  %v4011_v36 = vpop.f32.mrb[9].mxu0 }
 0x1f9   :  { %5293 = vmatpush3.bf16.msra.mxu1 %v8076_v23  ;;  %v9195_v23 = vand.u32 4294901760, %v7883_v62  ;;  %v9201_v62 = vand.u32 4294901760, %v7947_v39  ;;  %v4012_v11 = vadd.f32 %v4011_v36, %v4010_v47  ;;  %v9204_v39 = vld [vmem:[#allocation37_spill] sm:$0xff] }
 0x1fa   :  { %5295 = vmatprep.subr.bf16.mxu1 %v8083_v61  ;;  %v9196_v61 = vand.u32 4294901760, %v7888_v43  ;;  %v9202_v43 = vand.u32 4294901760, %v7952_v32  ;;  %v9205_v32 = vld [vmem:[#allocation39_spill] sm:$0xff] }
 0x1fb   :  { %5253 = vmatpush3.bf16.msra.mxu0 %v5252_v51 }
 0x1fc   :  { %5255 = vmatprep.subr.bf16.mxu0 %v5254_v17  ;;  %v5260_v57 = vpack.c.bf16 %v9196_v61, %v9195_v23  ;;  %v5266_v13 = vpack.c.bf16 %v9202_v43, %v9201_v62 }
 0x1fd   :  { %5297 = vmatpush3.bf16.msra.mxu1 %v8094_v8  ;;  %v9199_v8 = vand.u32 4294901760, %v7926_v41 }
 0x1fe   :  { %5299 = vmatprep.subr.bf16.mxu1 %v8103_v3  ;;  %v9200_v3 = vand.u32 4294901760, %v7931_v33  ;;  %v9203_v33 = vld [vmem:[#allocation36_spill] sm:$0xff] }
 0x1ff   :  { %5257 = vmatpush3.bf16.msra.mxu0 %v5256_v18 }
 0x200   :  { %5259 = vmatprep.subr.bf16.mxu0 %v5258_v29  ;;  %v5264_v27 = vpack.c.bf16 %v9200_v3, %v9199_v8 }
 0x201   :  { %5301 = vmatpush3.bf16.msra.mxu1 %v8111_v45  ;;  %v1543_v45 = vadd.f32 %v4012_v11, %v1405_v6 }
 0x202   :  { %5303 = vmatprep.subr.bf16.mxu1 %v8119_v53 }
 0x203   :  { %5261 = vmatpush3.bf16.msra.mxu0 %v5260_v57  ;;  %v1651_v41 = vadd.f32 %v4047_v9, %v1543_v45 }
 0x204   :  { %5263 = vmatprep.subr.bf16.mxu0 %v5262_v21 }
 0x205   :  { %5305 = vmatpush3.bf16.msra.mxu1 %v8135_v10 }
 0x207   :  { %5265 = vmatpush3.bf16.msra.mxu0 %v5264_v27 }
 0x208   :  { %5267 = vmatprep.subr.bf16.mxu0 %v5266_v13  ;;  %3697 = vmatmul.mubr.msk.f32.vlgmr.msra.gmra.mrb[22].mxu1 %vm67_vm9, %v8631_v59 }
 0x20b   :  { %5269 = vmatpush3.bf16.msra.mxu0 %v9203_v33 }
 0x20c   :  { %5271 = vmatprep.subr.bf16.mxu0 %v9204_v39 }
 0x20f   :  { %5273 = vmatpush3.bf16.msra.mxu0 %v9205_v32 }
 0x212   :  { %3695 = vmatmul.mubr.msk.f32.vlgmr.msra.gmra.mrb[22].mxu0 %vm67_vm9, %v8631_v59 }
 0x214   :  { %v4115_v53 = vpop.f32.mrb[10].mxu1 }
 0x215   :  { %v4116_v10 = vpop.f32.mrb[11].mxu1 }
 0x216   :  { %v4117_v19 = vadd.f32 %v4116_v10, %v4115_v53 }
 0x21d   :  { %v4080_v1 = vpop.f32.mrb[10].mxu0 }
 0x21e   :  { %v4081_v35 = vpop.f32.mrb[11].mxu0 }
 0x21f   :  { %v4082_v26 = vadd.f32 %v4081_v35, %v4080_v1 }
 0x221   :  { %v1819_v55 = vadd.f32 %v4082_v26, %v1651_v41 }
 0x223   :  { %v1923_v20 = vadd.f32 %v4117_v19, %v1819_v55 }
 0x234   :  { %v4185_v58 = vpop.f32.mrb[12].mxu1 }
 0x235   :  { %v4186_v2 = vpop.f32.mrb[13].mxu1 }
 0x236   :  { %v4187_v6 = vadd.f32 %v4186_v2, %v4185_v58 }
 0x23e   :  { %v4150_v12 = vpop.f32.mrb[12].mxu0 }
 0x23f   :  { %v4151_v24 = vpop.f32.mrb[13].mxu0 }
 0x240   :  { %v4152_v30 = vadd.f32 %v4151_v24, %v4150_v12 }
 0x242   :  { %v2035_v4 = vadd.f32 %v4152_v30, %v1923_v20 }
 0x244   :  { %v2267_v46 = vadd.f32 %v4187_v6, %v2035_v4 }
 0x254   :  { %v4255_v28 = vpop.f32.mrb[14].mxu1 }
 0x255   :  { %v4256_v22 = vpop.f32.mrb[15].mxu1 }
 0x256   :  { %v4257_v49 = vadd.f32 %v4256_v22, %v4255_v28 }
 0x25e   :  { %v4220_v59 = vpop.f32.mrb[14].mxu0 }
 0x25f   :  { %v4221_v16 = vpop.f32.mrb[15].mxu0 }
 0x260   :  { %v4222_v42 = vadd.f32 %v4221_v16, %v4220_v59 }
 0x262   :  { %v2405_v14 = vadd.f32 %v4222_v42, %v2267_v46 }
 0x264   :  { %v2513_v56 = vadd.f32 %v4257_v49, %v2405_v14 }
 0x27b   :  { %v4325_v44 = vpop.f32.mrb[16].mxu1 }
 0x27c   :  { %v4326_v34 = vpop.f32.mrb[17].mxu1 }
 0x27d   :  { %v4327_v52 = vadd.f32 %v4326_v34, %v4325_v44 }
 0x284   :  { %v4290_v37 = vpop.f32.mrb[16].mxu0 }
 0x285   :  { %v4291_v54 = vpop.f32.mrb[17].mxu0 }
 0x286   :  { %v4292_v25 = vadd.f32 %v4291_v54, %v4290_v37 }
 0x288   :  { %v2681_v31 = vadd.f32 %v4292_v25, %v2513_v56 }
 0x28a   :  { %v2785_v51 = vadd.f32 %v4327_v52, %v2681_v31 }
 0x29b   :  { %v4395_v63 = vpop.f32.mrb[18].mxu1 }
 0x29c   :  { %v4396_v5 = vpop.f32.mrb[19].mxu1 }
 0x29d   :  { %v4397_v17 = vadd.f32 %v4396_v5, %v4395_v63 }
 0x2a5   :  { %v4360_v38 = vpop.f32.mrb[18].mxu0 }
 0x2a6   :  { %v4361_v48 = vpop.f32.mrb[19].mxu0 }
 0x2a7   :  { %v4362_v18 = vadd.f32 %v4361_v48, %v4360_v38 }
 0x2a9   :  { %v2897_v50 = vadd.f32 %v4362_v18, %v2785_v51 }
 0x2ab   :  { %v3129_v60 = vadd.f32 %v4397_v17, %v2897_v50 }
 0x2bb   :  { %v4465_v7 = vpop.f32.mrb[20].mxu1 }
 0x2bc   :  { %v4466_v29 = vpop.f32.mrb[21].mxu1 }
 0x2bd   :  { %v4467_v40 = vadd.f32 %v4466_v29, %v4465_v7 }
 0x2c5   :  { %v4430_v9 = vpop.f32.mrb[20].mxu0 }
 0x2c6   :  { %v4431_v23 = vpop.f32.mrb[21].mxu0 }
 0x2c7   :  { %v4432_v61 = vadd.f32 %v4431_v23, %v4430_v9 }
 0x2c9   :  { %v3267_v57 = vadd.f32 %v4432_v61, %v3129_v60 }
 0x2cb   :  { %v3375_v0 = vadd.f32 %v4467_v40, %v3267_v57 }
 0x2db   :  { %v4535_v15 = vpop.f32.mrb[22].mxu1 }
 0x2dc   :  { %v4536_v21 = vpop.f32.mrb[23].mxu1 }
 0x2dd   :  { %v4537_v8 = vadd.f32 %v4536_v21, %v4535_v15 }
 0x2e5   :  { %v4500_v3 = vpop.f32.mrb[22].mxu0 }
 0x2e6   :  { %v4501_v27 = vpop.f32.mrb[23].mxu0 }
 0x2e7   :  { %v4502_v62 = vadd.f32 %v4501_v27, %v4500_v3 }
 0x2e9   :  { %v3543_v43 = vadd.f32 %v4502_v62, %v3375_v0 }
 0x2eb   :  { %v3647_v13 = vadd.f32 %v4537_v8, %v3543_v43 }
 0x2ed   :  { %3650 = vst [vmem:[#allocation5] sm:$0xff] %v3647_v13 }
 0x2ee   :  { %5354 = shalt.err (!%p5351_p12)
}
 0x2ef   :  { %s5355_s5 = scalar_lea.hbm %s8293_s3, 128 }
 0x2f0   :  { %p5356_p13 = scmp.ne.s32.totalorder %s8293_s3, %s5355_s5  ;;  %p5359_p0 = scmp.lt.u32.totalorder %s5355_s5, %s8293_s3 }
 0x2f2   :  { %p5361_p1 = pnand %p5359_p0, %p5356_p13 }
 0x2f4   :  { %5364 = shalt.err (!%p5361_p1)
}
 0x2f5   :  { %3660 = dma.vmem_to_hbm [thread:$0]  %s3658_s28, 128, %s8293_s3, [#allocation4]  }
 0x2f6   :  { %5367 = dma.done.wait [#allocation4], 128  }
 0x2f7   :  { %5368 = vsyncadd [#allocation4], 4294967168 }
 0x2f8   :  { %3664 = vsyncpa [#allocation3], 1 }
 0x2f9   :  { %3665 = vsyncpa [#allocation4], 1 }

</bundles_post_ra>
